<compile_context>
chip_gen: v7x
topology: tpu7x:2x2x1
jax: 0.10.0
libtpu: 0.0.40
codegen_flags: <defaults>
</compile_context>

<pallas_src>
import math
import functools

import jax
import jax.numpy as jnp
from jax.experimental import pallas as pl
from jax.experimental.pallas import tpu as pltpu


# ----------------------------------------------------------------------------
# Fused kernel: Fourier embeddings + positional MLP + feature MLP
# ----------------------------------------------------------------------------
def _fused_query_kernel(c_ref, f_ref, fmat_ref, w1p_ref, w1f_ref, w2_ref, b_ref,
                        q_ref, qp_ref):
    """Both branches on the full row block.

    c_ref    : (R, 3)      f32   sampled voxel coordinates
    f_ref    : (R, Cin)    f32   sampled uresnet features (cast to bf16 here)
    fmat_ref : (3, P/2)    f32   Gaussian Fourier projection matrix (* 2*pi folded)
    w1p_ref  : (P, H)      bf16  pos first 1x1 conv, rows [:P/2]=sin, [P/2:]=cos (BN folded)
    w1f_ref  : (Cin, H)    bf16  feat first 1x1 conv (BN folded)
    w2_ref   : (2, H, H)   bf16  output 1x1 convs, [0]=pos, [1]=feat
    b_ref    : (4, H)      f32   biases: rows = [b1p, b2p, b1f, b2f]
    q_ref    : (R, H)      f32   queries
    qp_ref   : (R, H)      f32   query_pos
    """
    phalf = fmat_ref.shape[1]

    # ---------------- positional branch ----------------
    c = c_ref[...]                                          # (R, 3) f32
    fmat = fmat_ref[...]                                    # (3, P/2) f32, 2*pi pre-folded
    # K=3 projection on the VPU (three broadcasted FMAs), keeps the MXU free.
    proj = (c[:, 0:1] * fmat[0:1, :]
            + c[:, 1:2] * fmat[1:2, :]
            + c[:, 2:3] * fmat[2:3, :])                     # (R, P/2)
    sin_e = jnp.sin(proj).astype(jnp.bfloat16)              # EUP
    cos_e = jnp.cos(proj).astype(jnp.bfloat16)

    # emb = concat([sin, cos]) @ W1p  ==  sin @ W1p[:P/2] + cos @ W1p[P/2:]
    h_pos = (jnp.dot(sin_e, w1p_ref[0:phalf, :],
                     preferred_element_type=jnp.float32)
             + jnp.dot(cos_e, w1p_ref[phalf:2 * phalf, :],
                       preferred_element_type=jnp.float32)
             + b_ref[0:1, :])
    h_pos = jnp.maximum(h_pos, 0.0).astype(jnp.bfloat16)    # BN already folded
    y_pos = (jnp.dot(h_pos, w2_ref[0], preferred_element_type=jnp.float32)
             + b_ref[1:2, :])
    qp_ref[...] = jnp.maximum(y_pos, 0.0).astype(qp_ref.dtype)

    # ---------------- feature branch ----------------
    f = f_ref[...].astype(jnp.bfloat16)                     # in-kernel cast
    h_f = (jnp.dot(f, w1f_ref[...], preferred_element_type=jnp.float32)
           + b_ref[2:3, :])
    h_f = jnp.maximum(h_f, 0.0).astype(jnp.bfloat16)
    y_f = (jnp.dot(h_f, w2_ref[1], preferred_element_type=jnp.float32)
           + b_ref[3:4, :])
    q_ref[...] = jnp.maximum(y_f, 0.0).astype(q_ref.dtype)


# ----------------------------------------------------------------------------
# Wrapper
# ----------------------------------------------------------------------------
def fused_query_mlps(coords_q, feats_q, fourier_scaled, w1p, w1f, w2_stack, b_stack):
    """coords_q: (R, 3) f32, feats_q: (R, Cin) f32 -> two (R, H) f32 outputs."""
    R = coords_q.shape[0]
    Cin = feats_q.shape[1]
    phalf = fourier_scaled.shape[1]
    H = w1f.shape[1]

    # Single grid step: at this size the kernel is launch/DMA-latency bound,
    # and a full-row tile keeps matmul M at B*Q instead of two half tiles.
    full = lambda shape: pl.BlockSpec(shape, lambda i, _s=shape: (0,) * len(_s))

    queries, query_pos = pl.pallas_call(
        _fused_query_kernel,
        out_shape=(jax.ShapeDtypeStruct((R, H), jnp.float32),
                   jax.ShapeDtypeStruct((R, H), jnp.float32)),
        grid=(1,),
        in_specs=[
            full((R, 3)),               # coords
            full((R, Cin)),             # features (f32, cast in-kernel)
            full((3, phalf)),           # fourier matrix (2*pi folded)
            full((2 * phalf, H)),       # w1p [sin rows | cos rows] (BN folded)
            full((Cin, H)),             # w1f (BN folded)
            full((2, H, H)),            # [w2p, w2f]
            full((4, H)),               # [b1p, b2p, b1f, b2f]
        ],
        out_specs=(full((R, H)), full((R, H))),
        compiler_params=pltpu.CompilerParams(
            dimension_semantics=("arbitrary",)),
    )(coords_q, feats_q, fourier_scaled, w1p, w1f, w2_stack, b_stack)
    return queries, query_pos


# ----------------------------------------------------------------------------
# Parameter construction, BN folding & packing
# ----------------------------------------------------------------------------
def _make_mlp_params(key, cin, hidden, out):
    """Conv1d(cin->hidden, bias) -> BN1d(hidden) -> ReLU -> Conv1d(hidden->out, bias) -> ReLU."""
    ks = jax.random.split(key, 6)
    w1 = jax.random.normal(ks[0], (cin, hidden), jnp.float32) * 0.05
    b1 = jax.random.normal(ks[1], (1, hidden), jnp.float32) * 0.01
    gamma = 1.0 + 0.1 * jax.random.normal(ks[2], (1, hidden), jnp.float32)
    beta = 0.01 * jax.random.normal(ks[3], (1, hidden), jnp.float32)
    running_mean = jnp.zeros((1, hidden), jnp.float32)
    running_var = jnp.ones((1, hidden), jnp.float32)
    eps = 1e-5
    s1 = gamma / jnp.sqrt(running_var + eps)
    t1 = beta - running_mean * s1
    w2 = jax.random.normal(ks[4], (hidden, out), jnp.float32) * 0.05
    b2 = jax.random.normal(ks[5], (1, out), jnp.float32) * 0.01
    return (w1, b1, s1, t1, w2, b2)


def _pack_kernel_params(pos_params, feat_params):
    """Fold BN (eval mode) into the first convs and pack operands for the kernel."""
    w1p_raw, b1p_raw, s1p, t1p, w2p, b2p = pos_params
    w1f_raw, b1f_raw, s1f, t1f, w2f, b2f = feat_params

    w1p = (w1p_raw * s1p).astype(jnp.bfloat16)         # (P, H): rows [:P/2]=sin, [P/2:]=cos
    b1p = b1p_raw * s1p + t1p
    w1f = (w1f_raw * s1f).astype(jnp.bfloat16)         # (Cin, H)
    b1f = b1f_raw * s1f + t1f

    w2_stack = jnp.stack([w2p, w2f], axis=0).astype(jnp.bfloat16)            # (2, H, H)
    b_stack = jnp.concatenate([b1p, b2p, b1f, b2f], axis=0).astype(jnp.float32)  # (4, H)
    return (w1p, w1f, w2_stack, b_stack)


# ----------------------------------------------------------------------------
# QueryModule forward (query_type == 'fps')
# ----------------------------------------------------------------------------
def query_module_forward(coords, features, fps_idx, fourier_scaled, packed_params):
    """coords: (B, N, 3), features: (B, N, Cin), fps_idx: (B, Q) int32.

    Returns (queries, query_pos, fps_idx) with queries/query_pos of shape
    (B, Q, mask_dim), matching the PyTorch module's final permutes.
    """
    B, N, _ = coords.shape
    Q = fps_idx.shape[1]
    # Gather sampled coords / features (decomposed_* indexing in PyTorch).
    # TODO(synk): at production N/Q, fold this gather into the kernel via
    # scalar-prefetched indices + manual DMA (see header note).
    idx3 = fps_idx[..., None]
    sampled_coords = jnp.take_along_axis(coords, idx3, axis=1)     # (B, Q, 3)
    sampled_feats = jnp.take_along_axis(features, idx3, axis=1)    # (B, Q, Cin)

    # Fold B into the matmul M dimension; keep features f32 (bf16 cast in-kernel).
    coords_q = sampled_coords.reshape(B * Q, 3).astype(jnp.float32)
    feats_q = sampled_feats.reshape(B * Q, -1).astype(jnp.float32)

    w1p, w1f, w2_stack, b_stack = packed_params
    queries, query_pos = fused_query_mlps(coords_q, feats_q, fourier_scaled,
                                          w1p, w1f, w2_stack, b_stack)
    H = queries.shape[-1]
    return (queries.reshape(B, Q, H),
            query_pos.reshape(B, Q, H),
            fps_idx)


# ----------------------------------------------------------------------------
# Pure-JAX reference (f32 everywhere) for a sanity check
# ----------------------------------------------------------------------------
def _reference_forward(sampled_coords, sampled_feats, fourier_mat,
                       pos_params, feat_params):
    def mlp(x, params):
        w1, b1, s1, t1, w2, b2 = params
        h = x @ w1 + b1
        h = h * s1 + t1
        h = jnp.maximum(h, 0.0)
        y = h @ w2 + b2
        return jnp.maximum(y, 0.0)

    proj = sampled_coords @ fourier_mat * (2.0 * math.pi)
    emb = jnp.concatenate([jnp.sin(proj), jnp.cos(proj)], axis=-1)
    return mlp(sampled_feats, feat_params), mlp(emb, pos_params)


# ----------------------------------------------------------------------------
# Main
# ----------------------------------------------------------------------------
if __name__ == "__main__":
    B = 2                 # batch size
    N = 256               # points per batch element
    NUM_INPUT = 32        # uresnet feature dim
    NUM_POS_INPUT = 128   # fourier positional embedding dim
    NUM_QUERIES = 64      # sampled queries
    MASK_DIM = 128        # output embedding dim

    key = jax.random.PRNGKey(0)
    k_coords, k_feats, k_fmat, k_pos, k_feat_mlp = jax.random.split(key, 5)

    # Inputs standing in for the ME.SparseTensor decomposed coords / features.
    coords = jax.random.uniform(k_coords, (B, N, 3), jnp.float32) * 16.0
    features = jax.random.normal(k_feats, (B, N, NUM_INPUT), jnp.float32)

    # TODO(synk): replace with true farthest-point sampling; deterministic
    # strided indices used as a placeholder.
    fps_idx = jnp.tile(
        jnp.arange(NUM_QUERIES, dtype=jnp.int32)[None, :] * (N // NUM_QUERIES),
        (B, 1))

    # FourierEmbeddings projection matrix (Gaussian Fourier features 3 -> P).
    fourier_mat = jax.random.normal(k_fmat, (3, NUM_POS_INPUT // 2), jnp.float32)
    fourier_scaled = fourier_mat * (2.0 * math.pi)   # 2*pi folded into the constant

    pos_params = _make_mlp_params(k_pos, NUM_POS_INPUT, MASK_DIM, MASK_DIM)
    feat_params = _make_mlp_params(k_feat_mlp, NUM_INPUT, MASK_DIM, MASK_DIM)
    packed_params = _pack_kernel_params(pos_params, feat_params)

    fwd = jax.jit(functools.partial(query_module_forward,
                                    fourier_scaled=fourier_scaled,
                                    packed_params=packed_params))
    queries, query_pos, out_idx = fwd(coords, features, fps_idx)
    jax.block_until_ready((queries, query_pos, out_idx))

    assert queries.shape == (B, NUM_QUERIES, MASK_DIM)
    assert query_pos.shape == (B, NUM_QUERIES, MASK_DIM)
    assert out_idx.shape == (B, NUM_QUERIES)

    # Sanity-check against the f32 reference (bf16 matmuls, f32 accumulation).
    idx3 = fps_idx[..., None]
    sc = jnp.take_along_axis(coords, idx3, axis=1)
    sf = jnp.take_along_axis(features, idx3, axis=1)
    q_ref, qp_ref = _reference_forward(sc, sf, fourier_mat, pos_params, feat_params)
    assert float(jnp.max(jnp.abs(queries - q_ref))) < 5e-2
    assert float(jnp.max(jnp.abs(query_pos - qp_ref))) < 5e-2

    print("KERNEL_OK")
</pallas_src>

<mosaic_0001>
module attributes {stable_mosaic.version = 11 : i64} {
  func.func @_fused_query_kernel(%arg0: i32, %arg1: memref<128x3xf32, #tpu.memory_space<vmem>>, %arg2: memref<128x32xf32, #tpu.memory_space<vmem>>, %arg3: memref<3x64xf32, #tpu.memory_space<vmem>>, %arg4: memref<128x128xbf16, #tpu.memory_space<vmem>>, %arg5: memref<32x128xbf16, #tpu.memory_space<vmem>>, %arg6: memref<2x128x128xbf16, #tpu.memory_space<vmem>>, %arg7: memref<4x128xf32, #tpu.memory_space<vmem>>, %arg8: memref<128x128xf32, #tpu.memory_space<vmem>>, %arg9: memref<128x128xf32, #tpu.memory_space<vmem>>) attributes {dimension_semantics = [#tpu.dimension_semantics<arbitrary>], iteration_bounds = array<i64: 1>, scalar_prefetch = 0 : i64, scratch_operands = 0 : i64, tpu.core_type = #tpu.core_type<tc>, window_params = [{pipeline_mode = #tpu.pipeline_mode<synchronous>, transform_indices = @transform_0, window_bounds = array<i64: 128, 3>}, {pipeline_mode = #tpu.pipeline_mode<synchronous>, transform_indices = @transform_1, window_bounds = array<i64: 128, 32>}, {pipeline_mode = #tpu.pipeline_mode<synchronous>, transform_indices = @transform_2, window_bounds = array<i64: 3, 64>}, {pipeline_mode = #tpu.pipeline_mode<synchronous>, transform_indices = @transform_3, window_bounds = array<i64: 128, 128>}, {pipeline_mode = #tpu.pipeline_mode<synchronous>, transform_indices = @transform_4, window_bounds = array<i64: 32, 128>}, {pipeline_mode = #tpu.pipeline_mode<synchronous>, transform_indices = @transform_5, window_bounds = array<i64: 2, 128, 128>}, {pipeline_mode = #tpu.pipeline_mode<synchronous>, transform_indices = @transform_6, window_bounds = array<i64: 4, 128>}, {pipeline_mode = #tpu.pipeline_mode<synchronous>, transform_indices = @transform_7, window_bounds = array<i64: 128, 128>}, {pipeline_mode = #tpu.pipeline_mode<synchronous>, transform_indices = @transform_8, window_bounds = array<i64: 128, 128>}]} {
    %c0 = arith.constant 0 : index
    %c0_0 = arith.constant 0 : index
    %0 = vector.load %arg1[%c0, %c0_0] : memref<128x3xf32, #tpu.memory_space<vmem>>, vector<128x3xf32>
    %c0_1 = arith.constant 0 : index
    %c0_2 = arith.constant 0 : index
    %1 = vector.load %arg3[%c0_1, %c0_2] : memref<3x64xf32, #tpu.memory_space<vmem>>, vector<3x64xf32>
    %2 = vector.extract_strided_slice %0 {offsets = [0, 0], sizes = [128, 1], strides = [1, 1]} : vector<128x3xf32> to vector<128x1xf32>
    %3 = vector.extract_strided_slice %1 {offsets = [0, 0], sizes = [1, 64], strides = [1, 1]} : vector<3x64xf32> to vector<1x64xf32>
    %4 = vector.broadcast %2 : vector<128x1xf32> to vector<128x64xf32>
    %5 = vector.broadcast %3 : vector<1x64xf32> to vector<128x64xf32>
    %6 = arith.mulf %4, %5 : vector<128x64xf32>
    %7 = vector.extract_strided_slice %0 {offsets = [0, 1], sizes = [128, 1], strides = [1, 1]} : vector<128x3xf32> to vector<128x1xf32>
    %8 = vector.extract_strided_slice %1 {offsets = [1, 0], sizes = [1, 64], strides = [1, 1]} : vector<3x64xf32> to vector<1x64xf32>
    %9 = vector.broadcast %7 : vector<128x1xf32> to vector<128x64xf32>
    %10 = vector.broadcast %8 : vector<1x64xf32> to vector<128x64xf32>
    %11 = arith.mulf %9, %10 : vector<128x64xf32>
    %12 = arith.addf %6, %11 : vector<128x64xf32>
    %13 = vector.extract_strided_slice %0 {offsets = [0, 2], sizes = [128, 1], strides = [1, 1]} : vector<128x3xf32> to vector<128x1xf32>
    %14 = vector.extract_strided_slice %1 {offsets = [2, 0], sizes = [1, 64], strides = [1, 1]} : vector<3x64xf32> to vector<1x64xf32>
    %15 = vector.broadcast %13 : vector<128x1xf32> to vector<128x64xf32>
    %16 = vector.broadcast %14 : vector<1x64xf32> to vector<128x64xf32>
    %17 = arith.mulf %15, %16 : vector<128x64xf32>
    %18 = arith.addf %12, %17 : vector<128x64xf32>
    %19 = math.sin %18 : vector<128x64xf32>
    %20 = arith.truncf %19 : vector<128x64xf32> to vector<128x64xbf16>
    %21 = math.cos %18 : vector<128x64xf32>
    %22 = arith.truncf %21 : vector<128x64xf32> to vector<128x64xbf16>
    %c0_3 = arith.constant 0 : index
    %c0_4 = arith.constant 0 : index
    %23 = vector.load %arg4[%c0_3, %c0_4] : memref<128x128xbf16, #tpu.memory_space<vmem>>, vector<64x128xbf16>
    %cst = arith.constant dense<0.000000e+00> : vector<128x128xf32>
    %24 = tpu.matmul %20, %23, %cst {dimension_numbers = #tpu.dot_dimension_numbers<[1], [0], [0], [1], [0, 0, 1, 1], [], []>} : vector<128x64xbf16>, vector<64x128xbf16>, vector<128x128xf32> -> vector<128x128xf32>
    %c64 = arith.constant 64 : index
    %c0_5 = arith.constant 0 : index
    %25 = vector.load %arg4[%c64, %c0_5] : memref<128x128xbf16, #tpu.memory_space<vmem>>, vector<64x128xbf16>
    %cst_6 = arith.constant dense<0.000000e+00> : vector<128x128xf32>
    %26 = tpu.matmul %22, %25, %cst_6 {dimension_numbers = #tpu.dot_dimension_numbers<[1], [0], [0], [1], [0, 0, 1, 1], [], []>} : vector<128x64xbf16>, vector<64x128xbf16>, vector<128x128xf32> -> vector<128x128xf32>
    %27 = arith.addf %24, %26 : vector<128x128xf32>
    %c0_7 = arith.constant 0 : index
    %c0_8 = arith.constant 0 : index
    %28 = vector.load %arg7[%c0_7, %c0_8] : memref<4x128xf32, #tpu.memory_space<vmem>>, vector<1x128xf32>
    %29 = vector.broadcast %28 : vector<1x128xf32> to vector<128x128xf32>
    %30 = arith.addf %27, %29 : vector<128x128xf32>
    %cst_9 = arith.constant 0.000000e+00 : f32
    %31 = vector.broadcast %cst_9 : f32 to vector<128x128xf32>
    %32 = arith.maximumf %30, %31 : vector<128x128xf32>
    %33 = arith.truncf %32 : vector<128x128xf32> to vector<128x128xbf16>
    %c0_10 = arith.constant 0 : index
    %c0_11 = arith.constant 0 : index
    %c0_12 = arith.constant 0 : index
    %34 = vector.load %arg6[%c0_10, %c0_11, %c0_12] : memref<2x128x128xbf16, #tpu.memory_space<vmem>>, vector<1x128x128xbf16>
    %35 = vector.shape_cast %34 : vector<1x128x128xbf16> to vector<128x128xbf16>
    %cst_13 = arith.constant dense<0.000000e+00> : vector<128x128xf32>
    %36 = tpu.matmul %33, %35, %cst_13 {dimension_numbers = #tpu.dot_dimension_numbers<[1], [0], [0], [1], [0, 0, 1, 1], [], []>} : vector<128x128xbf16>, vector<128x128xbf16>, vector<128x128xf32> -> vector<128x128xf32>
    %c1 = arith.constant 1 : index
    %c0_14 = arith.constant 0 : index
    %37 = vector.load %arg7[%c1, %c0_14] : memref<4x128xf32, #tpu.memory_space<vmem>>, vector<1x128xf32>
    %38 = vector.broadcast %37 : vector<1x128xf32> to vector<128x128xf32>
    %39 = arith.addf %36, %38 : vector<128x128xf32>
    %cst_15 = arith.constant 0.000000e+00 : f32
    %40 = vector.broadcast %cst_15 : f32 to vector<128x128xf32>
    %41 = arith.maximumf %39, %40 : vector<128x128xf32>
    %c0_16 = arith.constant 0 : index
    %c0_17 = arith.constant 0 : index
    %42 = vector.load %arg9[%c0_16, %c0_17] : memref<128x128xf32, #tpu.memory_space<vmem>>, vector<128x128xf32>
    tpu.vector_store %arg9[%c0_16, %c0_17], %41 {strides = array<i32>} : memref<128x128xf32, #tpu.memory_space<vmem>>, vector<128x128xf32>,
    %c0_18 = arith.constant 0 : index
    %c0_19 = arith.constant 0 : index
    %43 = vector.load %arg2[%c0_18, %c0_19] : memref<128x32xf32, #tpu.memory_space<vmem>>, vector<128x32xf32>
    %44 = arith.truncf %43 : vector<128x32xf32> to vector<128x32xbf16>
    %c0_20 = arith.constant 0 : index
    %c0_21 = arith.constant 0 : index
    %45 = vector.load %arg5[%c0_20, %c0_21] : memref<32x128xbf16, #tpu.memory_space<vmem>>, vector<32x128xbf16>
    %cst_22 = arith.constant dense<0.000000e+00> : vector<128x128xf32>
    %46 = tpu.matmul %44, %45, %cst_22 {dimension_numbers = #tpu.dot_dimension_numbers<[1], [0], [0], [1], [0, 0, 1, 1], [], []>} : vector<128x32xbf16>, vector<32x128xbf16>, vector<128x128xf32> -> vector<128x128xf32>
    %c2 = arith.constant 2 : index
    %c0_23 = arith.constant 0 : index
    %47 = vector.load %arg7[%c2, %c0_23] : memref<4x128xf32, #tpu.memory_space<vmem>>, vector<1x128xf32>
    %48 = vector.broadcast %47 : vector<1x128xf32> to vector<128x128xf32>
    %49 = arith.addf %46, %48 : vector<128x128xf32>
    %cst_24 = arith.constant 0.000000e+00 : f32
    %50 = vector.broadcast %cst_24 : f32 to vector<128x128xf32>
    %51 = arith.maximumf %49, %50 : vector<128x128xf32>
    %52 = arith.truncf %51 : vector<128x128xf32> to vector<128x128xbf16>
    %c1_25 = arith.constant 1 : index
    %c0_26 = arith.constant 0 : index
    %c0_27 = arith.constant 0 : index
    %53 = vector.load %arg6[%c1_25, %c0_26, %c0_27] : memref<2x128x128xbf16, #tpu.memory_space<vmem>>, vector<1x128x128xbf16>
    %54 = vector.shape_cast %53 : vector<1x128x128xbf16> to vector<128x128xbf16>
    %cst_28 = arith.constant dense<0.000000e+00> : vector<128x128xf32>
    %55 = tpu.matmul %52, %54, %cst_28 {dimension_numbers = #tpu.dot_dimension_numbers<[1], [0], [0], [1], [0, 0, 1, 1], [], []>} : vector<128x128xbf16>, vector<128x128xbf16>, vector<128x128xf32> -> vector<128x128xf32>
    %c3 = arith.constant 3 : index
    %c0_29 = arith.constant 0 : index
    %56 = vector.load %arg7[%c3, %c0_29] : memref<4x128xf32, #tpu.memory_space<vmem>>, vector<1x128xf32>
    %57 = vector.broadcast %56 : vector<1x128xf32> to vector<128x128xf32>
    %58 = arith.addf %55, %57 : vector<128x128xf32>
    %cst_30 = arith.constant 0.000000e+00 : f32
    %59 = vector.broadcast %cst_30 : f32 to vector<128x128xf32>
    %60 = arith.maximumf %58, %59 : vector<128x128xf32>
    %c0_31 = arith.constant 0 : index
    %c0_32 = arith.constant 0 : index
    %61 = vector.load %arg8[%c0_31, %c0_32] : memref<128x128xf32, #tpu.memory_space<vmem>>, vector<128x128xf32>
    tpu.vector_store %arg8[%c0_31, %c0_32], %60 {strides = array<i32>} : memref<128x128xf32, #tpu.memory_space<vmem>>, vector<128x128xf32>,
    return
  }
  func.func @transform_0(%arg0: i32) -> (i32, i32) {
    %c0_i32 = arith.constant 0 : i32
    %c0_i32_0 = arith.constant 0 : i32
    %c0_i32_1 = arith.constant 0 : i32
    return %c0_i32, %c0_i32_0 : i32, i32
  }
  func.func @transform_1(%arg0: i32) -> (i32, i32) {
    %c0_i32 = arith.constant 0 : i32
    %c0_i32_0 = arith.constant 0 : i32
    %c0_i32_1 = arith.constant 0 : i32
    return %c0_i32, %c0_i32_0 : i32, i32
  }
  func.func @transform_2(%arg0: i32) -> (i32, i32) {
    %c0_i32 = arith.constant 0 : i32
    %c0_i32_0 = arith.constant 0 : i32
    %c0_i32_1 = arith.constant 0 : i32
    return %c0_i32, %c0_i32_0 : i32, i32
  }
  func.func @transform_3(%arg0: i32) -> (i32, i32) {
    %c0_i32 = arith.constant 0 : i32
    %c0_i32_0 = arith.constant 0 : i32
    %c0_i32_1 = arith.constant 0 : i32
    return %c0_i32, %c0_i32_0 : i32, i32
  }
  func.func @transform_4(%arg0: i32) -> (i32, i32) {
    %c0_i32 = arith.constant 0 : i32
    %c0_i32_0 = arith.constant 0 : i32
    %c0_i32_1 = arith.constant 0 : i32
    return %c0_i32, %c0_i32_0 : i32, i32
  }
  func.func @transform_5(%arg0: i32) -> (i32, i32, i32) {
    %c0_i32 = arith.constant 0 : i32
    %c0_i32_0 = arith.constant 0 : i32
    %c0_i32_1 = arith.constant 0 : i32
    %c0_i32_2 = arith.constant 0 : i32
    return %c0_i32, %c0_i32_0, %c0_i32_1 : i32, i32, i32
  }
  func.func @transform_6(%arg0: i32) -> (i32, i32) {
    %c0_i32 = arith.constant 0 : i32
    %c0_i32_0 = arith.constant 0 : i32
    %c0_i32_1 = arith.constant 0 : i32
    return %c0_i32, %c0_i32_0 : i32, i32
  }
  func.func @transform_7(%arg0: i32) -> (i32, i32) {
    %c0_i32 = arith.constant 0 : i32
    %c0_i32_0 = arith.constant 0 : i32
    %c0_i32_1 = arith.constant 0 : i32
    return %c0_i32, %c0_i32_0 : i32, i32
  }
  func.func @transform_8(%arg0: i32) -> (i32, i32) {
    %c0_i32 = arith.constant 0 : i32
    %c0_i32_0 = arith.constant 0 : i32
    %c0_i32_1 = arith.constant 0 : i32
    return %c0_i32, %c0_i32_0 : i32, i32
  }
}

</mosaic_0001>

<bundles_post_ra>
// kernel: query_module_forward.1
= control target key start
LH: loop header
LB: loop body
LE: loop exit
PB: predicated region body
PF: predicated region fallthrough
CT: control target
= control target key end

     0   :  { %14 = vsyncpa [#allocation3], 0  ;;  %v5314_v2 = vmov 2   ;;  %v5315_v3 = vmov 1   ;;  %v5316_v8 = vmov 0   ;;  %s7633_s0 = inlined_call_operand.vmem [shape: f32[128,3], index: 0, kind: input, shape index: {}]   ;;  %s7634_s1 = inlined_call_operand.vmem [shape: f32[128,32], index: 1, kind: input, shape index: {}]   ;;  %s7635_s2 = inlined_call_operand.vmem [shape: f32[3,64], index: 2, kind: input, shape index: {}]   ;;  %s7636_s3 = inlined_call_operand.vmem [shape: bf16[128,128], index: 3, kind: input, shape index: {}]   ;;  %s7637_s4 = inlined_call_operand.vmem [shape: bf16[32,128], index: 4, kind: input, shape index: {}]   ;;  %s7638_s5 = inlined_call_operand.vmem [shape: bf16[2,128,128], index: 5, kind: input, shape index: {}]   ;;  %s7639_s6 = inlined_call_operand.vmem [shape: f32[4,128], index: 6, kind: input, shape index: {}]   ;;  %s7640_s7 = inlined_call_operand.hbm [shape: f32[128,128], index: 7, kind: output, shape index: {0}]   ;;  %s7641_s8 = inlined_call_operand.hbm [shape: f32[128,128], index: 8, kind: output, shape index: {1}]  }
   0x1   :  { %v32_v0 = vld [vmem:[%s7633_s0 + $0x8] sm:$0xff]  ;;  %v31_v1 = vld [vmem:[%s7633_s0] sm:$0xff]  ;;  %5157 = vset.pattern.permute.xlu0 %v5314_v2  ;;  %5153 = vset.pattern.permute.xlu1 %v5315_v3  ;;  %v38_v5 = vld [vmem:[%s7633_s0 + $0x38] sm:$0xff] }
   0x2   :  { %253 = vperm.xlu0 %5157, %v32_v0   ;;  %149 = vperm.xlu1 %5153, %v31_v1   ;;  %v35_v4 = vld [vmem:[%s7633_s0 + $0x20] sm:$0xff]  ;;  %v34_v6 = vld [vmem:[%s7633_s0 + $0x18] sm:$0xff]  ;;  %v40_v7 = vld [vmem:[%s7633_s0 + $0x48] sm:$0xff] }
   0x3   :  { %v33_v9 = vld [vmem:[%s7633_s0 + $0x10] sm:$0xff] }
   0x6   :  { %265 = vperm.xlu0 %5157, %v35_v4   ;;  %153 = vperm.xlu1 %5153, %v32_v0  }
   0xa   :  { %277 = vperm.xlu0 %5157, %v38_v5   ;;  %5154 = vset.pattern.permute.xlu1 %v5316_v8 }
   0xb   :  { %65 = vperm.xlu1 %5154, %v34_v6  }
   0xe   :  { %285 = vperm.xlu0 %5157, %v40_v7  }
   0xf   :  { %5155 = vset.pattern.permute.xlu1 %v5315_v3 }
  0x10   :  { %161 = vperm.xlu1 %5155, %v34_v6  }
  0x12   :  { %5168 = vset.pattern.permute.xlu0 %v5316_v8 }
  0x13   :  { %50 = vperm.xlu0 %5168, %v31_v1  }
  0x14   :  { %5156 = vset.pattern.permute.xlu1 %v5314_v2 }
  0x15   :  { %249 = vperm.xlu1 %5156, %v31_v1  }
  0x17   :  { %55 = vperm.xlu0 %5168, %v32_v0  }
  0x18   :  { %15 = vsyncpa [#allocation5], 0  ;;  %v36_v10 = vld [vmem:[%s7633_s0 + $0x28] sm:$0xff]  ;;  %v41_v11 = vld [vmem:[%s7633_s0 + $0x50] sm:$0xff]  ;;  %v128_v21 = vlaneseq  ;;  %s5323_s26 = smov [#allocation4]  }
  0x19   :  { %257 = vperm.xlu1 %5156, %v33_v9   ;;  %v43_v12 = vld [vmem:[%s7633_s0 + $0x60] sm:$0xff]  ;;  %v37_v13 = vld [vmem:[%s7633_s0 + $0x30] sm:$0xff]  ;;  %v44_v14 = vld [vmem:[%s7633_s0 + $0x68] sm:$0xff]  ;;  %s4633_s27 = sshll.u32 %s5323_s26, 4  ;;  %s4634_s27 = int_to_ptr.vmem [resolvable:$true] %s4633_s27 }
  0x1a   :  { %v39_v15 = vld [vmem:[%s7633_s0 + $0x40] sm:$0xff]  ;;  %v45_v16 = vld [vmem:[%s7633_s0 + $0x70] sm:$0xff]  ;;  %v46_v17 = vld [vmem:[%s7633_s0 + $0x78] sm:$0xff]  ;;  %v129_v24 = vshrl.u32 %v128_v21, 7  ;;  %p5271_p1 = scmp.lt.s32.totalorder %s4634_s27, %s4634_s27 }
  0x1b   :  { %60 = vperm.xlu0 %5168, %v33_v9   ;;  %v42_v18 = vld [vmem:[%s7633_s0 + $0x58] sm:$0xff]  ;;  %v47_v28 = vld [vmem:[%s7635_s2] sm:$0x7] }
  0x1c   :  { %v214_v27 = vsub.s32 1, %v129_v24  ;;  %v130_v29 = vsub.s32 0, %v129_v24  ;;  %v314_v31 = vsub.s32 2, %v129_v24  ;;  %v7652_v24 = vmov 2475754826  }
  0x1d   :  { %261 = vperm.xlu1 %5156, %v34_v6  }
  0x1e   :  { %v5450_v33 = vrot.slane %v47_v28, %v214_v27  ;;  %v5452_v34 = vrot.slane %v47_v28, %v130_v29  ;;  %v5454_v35 = vrot.slane %v47_v28, %v314_v31  ;;  %v7647_v27 = vmov 2131351028  }
  0x1f   :  { %70 = vperm.xlu0 %5168, %v35_v4  }
  0x21   :  { %5158 = vset.pattern.permute.xlu1 %v5316_v8 }
  0x22   :  { %75 = vperm.xlu1 %5158, %v36_v10  }
  0x23   :  { %95 = vperm.xlu0 %5168, %v40_v7  }
  0x26   :  { %5159 = vset.pattern.permute.xlu1 %v5315_v3 }
  0x27   :  { %100 = vperm.xlu0 %5168, %v41_v11   ;;  %165 = vperm.xlu1 %5159, %v35_v4  }
  0x2b   :  { %110 = vperm.xlu0 %5168, %v43_v12   ;;  %5160 = vset.pattern.permute.xlu1 %v5316_v8 }
  0x2c   :  { %80 = vperm.xlu1 %5160, %v37_v13  }
  0x2f   :  { %5169 = vset.pattern.permute.xlu0 %v5315_v3 }
  0x30   :  { %157 = vperm.xlu0 %5169, %v33_v9   ;;  %85 = vperm.xlu1 %5160, %v38_v5  }
  0x34   :  { %169 = vperm.xlu0 %5169, %v36_v10   ;;  %5161 = vset.pattern.permute.xlu1 %v5315_v3 }
  0x35   :  { %177 = vperm.xlu1 %5161, %v38_v5  }
  0x38   :  { %173 = vperm.xlu0 %5169, %v37_v13  }
  0x39   :  { %5162 = vset.pattern.permute.xlu1 %v5314_v2 }
  0x3a   :  { %269 = vperm.xlu1 %5162, %v36_v10  }
  0x3c   :  { %189 = vperm.xlu0 %5169, %v41_v11  }
  0x3e   :  { %273 = vperm.xlu1 %5162, %v37_v13  }
  0x40   :  { %201 = vperm.xlu0 %5169, %v44_v14  }
  0x42   :  { %5163 = vset.pattern.permute.xlu1 %v5316_v8 }
  0x43   :  { %90 = vperm.xlu1 %5163, %v39_v15  }
  0x44   :  { %205 = vperm.xlu0 %5169, %v45_v16  }
  0x47   :  { %5164 = vset.pattern.permute.xlu1 %v5315_v3 }
  0x48   :  { %181 = vperm.xlu1 %5164, %v39_v15   ;;  %5174 = vset.pattern.permute.xlu0 %v5314_v2 }
  0x49   :  { %297 = vperm.xlu0 %5174, %v43_v12  }
  0x4c   :  { %185 = vperm.xlu1 %5164, %v40_v7  }
  0x4d   :  { %309 = vperm.xlu0 %5174, %v46_v17  }
  0x50   :  { %5165 = vset.pattern.permute.xlu1 %v5316_v8 }
  0x51   :  { %105 = vperm.xlu1 %5165, %v42_v18  }
  0x55   :  { %5166 = vset.pattern.permute.xlu1 %v5315_v3 }
  0x56   :  { %193 = vperm.xlu1 %5166, %v42_v18  }
  0x5a   :  { %5167 = vset.pattern.permute.xlu1 %v5314_v2 }
  0x5b   :  { %281 = vperm.xlu1 %5167, %v39_v15  }
  0x5f   :  { %289 = vperm.xlu1 %5167, %v41_v11  }
  0x63   :  { %293 = vperm.xlu1 %5167, %v42_v18  }
  0x67   :  { %5170 = vset.pattern.permute.xlu1 %v5316_v8 }
  0x68   :  { %115 = vperm.xlu1 %5170, %v44_v14  }
  0x6c   :  { %5171 = vset.pattern.permute.xlu1 %v5315_v3 }
  0x6d   :  { %197 = vperm.xlu1 %5171, %v43_v12  }
  0x71   :  { %5172 = vset.pattern.permute.xlu1 %v5316_v8 }
  0x72   :  { %120 = vperm.xlu1 %5172, %v45_v16  }
  0x76   :  { %125 = vperm.xlu1 %5172, %v46_v17  }
  0x7a   :  { %5173 = vset.pattern.permute.xlu1 %v5315_v3 }
  0x7b   :  { %209 = vperm.xlu1 %5173, %v46_v17  }
  0x7f   :  { %5175 = vset.pattern.permute.xlu1 %v5314_v2 }
  0x80   :  { %301 = vperm.xlu1 %5175, %v44_v14  }
  0x81   :  { %v150_v19 = vpop.permute.xlu1 %149  ;;  %v254_v20 = vpop.permute.xlu0 %253 }
  0x82   :  { %v216_v38 = vmul.f32 %v5450_v33, %v150_v19  ;;  %v317_v56 = vmul.f32 %v5454_v35, %v254_v20 }
  0x84   :  { %305 = vperm.xlu1 %5175, %v45_v16  }
  0x85   :  { %v154_v22 = vpop.permute.xlu1 %153  ;;  %v266_v23 = vpop.permute.xlu0 %265 }
  0x86   :  { %v217_v54 = vmul.f32 %v5450_v33, %v154_v22  ;;  %v320_v6 = vmul.f32 %v5454_v35, %v266_v23  ;;  %v7650_v22 = vmov 683565275  }
  0x89   :  { %v5443_v25 = vpop.permute.xlu0 %277 }
  0x8a   :  { %v66_v26 = vpop.permute.xlu1 %65 }
  0x8b   :  { %v135_v47 = vmul.f32 %v5452_v34, %v66_v26 }
  0x8d   :  { %v5448_v30 = vpop.permute.xlu0 %285 }
  0x8f   :  { %v162_v32 = vpop.permute.xlu1 %161 }
  0x90   :  { %v219_v44 = vmul.f32 %v5450_v33, %v162_v32 }
  0x92   :  { %v51_v36 = vpop.permute.xlu0 %50  ;;  %v235_v49 = vadd.f32 %v219_v44, %v135_v47  ;;  %v7665_v44 = vmov 1326507024  }
  0x93   :  { %v132_v37 = vmul.f32 %v5452_v34, %v51_v36  ;;  %v7645_v36 = vmov 2102212464  }
  0x94   :  { %v250_v39 = vpop.permute.xlu1 %249 }
  0x95   :  { %v232_v40 = vadd.f32 %v216_v38, %v132_v37  ;;  %v316_v41 = vmul.f32 %v5454_v35, %v250_v39 }
  0x96   :  { %v56_v42 = vpop.permute.xlu0 %55 }
  0x97   :  { %v5462_v45 = vadd.f32 %v316_v41, %v232_v40  ;;  %v133_v50 = vmul.f32 %v5452_v34, %v56_v42  ;;  %v7667_v40 = vmov 920167782  }
  0x98   :  { %v5459_v43 = vpop.permute.xlu1 %257 }
  0x99   :  { %7762 = vst [vmem:[#allocation8_spill] sm:$0xff] %v5462_v45  ;;  %v351_v52 = vand.u32 2139095040, %v5462_v45  ;;  %v233_v57 = vadd.f32 %v217_v54, %v133_v50 }
  0x9a   :  { %v5464_v46 = vpop.permute.xlu0 %60 }
  0x9b   :  { %v352_v59 = vshrl.u32 %v351_v52, 23  ;;  %v5480_v0 = vadd.f32 %v317_v56, %v233_v57 }
  0x9c   :  { %v262_v48 = vpop.permute.xlu1 %261 }
  0x9d   :  { %v319_v51 = vmul.f32 %v5454_v35, %v262_v48  ;;  %7764 = vst [vmem:[#allocation10_spill] sm:$0xff] %v5480_v0  ;;  %v4648_v2 = vadd.s32 4294967169, %v352_v59  ;;  %v455_v9 = vand.u32 2139095040, %v5480_v0 }
  0x9e   :  { %v71_v53 = vpop.permute.xlu0 %70 }
  0x9f   :  { %v5471_v55 = vadd.f32 %v319_v51, %v235_v49  ;;  %v136_v1 = vmul.f32 %v5452_v34, %v71_v53  ;;  %v358_v11 = vadd.s32 1, %v4648_v2  ;;  %v456_v17 = vshrl.u32 %v455_v9, 23 }
  0xa1   :  { %7763 = vst [vmem:[#allocation9_spill] sm:$0xff] %v5471_v55  ;;  %v5474_v58 = vpop.permute.xlu1 %75  ;;  %v7644_v60 = vand.u32 2147483647, %v5471_v55  ;;  %v663_v61 = vand.u32 2139095040, %v5471_v55  ;;  %vm359_vm1 = vcmp.gt.s32.totalorder %v358_v11, 0 }
  0xa2   :  { %v5478_v63 = vpop.permute.xlu0 %95 }
  0xa3   :  { %v664_v62 = vshrl.u32 %v663_v61, 23  ;;  %v667_v4 = vand.u32 8388607, %v7644_v60 }
  0xa5   :  { %v4660_v3 = vadd.s32 4294967169, %v664_v62  ;;  %v668_v12 = vor.u32 8388608, %v667_v4 }
  0xa6   :  { %v166_v5 = vpop.permute.xlu1 %165  ;;  %v5488_v13 = vpop.permute.xlu0 %100 }
  0xa7   :  { %v220_v7 = vmul.f32 %v5450_v33, %v166_v5  ;;  %v670_v8 = vadd.s32 1, %v4660_v3  ;;  %v5492_v20 = vshll.u32 %v668_v12, 8 }
  0xa9   :  { %v236_v10 = vadd.f32 %v220_v7, %v136_v1  ;;  %vm671_vm0 = vcmp.gt.s32.totalorder %v670_v8, 0 }
  0xaa   :  { %v672_v14 = vsel %vm671_vm0, %v670_v8, 0  ;;  %v5503_v39 = vpop.permute.xlu0 %110 }
  0xab   :  { %v5490_v15 = vadd.f32 %v320_v6, %v236_v10  ;;  %v674_v16 = vand.u32 31, %v672_v14  ;;  %v673_v18 = vshrl.u32 %v672_v14, 5  ;;  %v5518_v12 = vpop.permute.xlu1 %80 }
  0xad   :  { %7765 = vst [vmem:[#allocation11_spill] sm:$0xff] %v5490_v15  ;;  %v675_v19 = vsub.s32 32, %v674_v16  ;;  %v7643_v21 = vand.u32 2147483647, %v5490_v15  ;;  %v677_v23 = vshll.u32 %v7650_v22, %v674_v16  ;;  %v680_v26 = vshll.u32 %v7652_v24, %v674_v16 }
  0xae   :  { %v683_v28 = vshll.u32 %v7647_v27, %v674_v16  ;;  %v767_v29 = vand.u32 2139095040, %v5490_v15  ;;  %v686_v38 = vshll.u32 %v7645_v36, %v674_v16  ;;  %v689_v42 = vshll.u32 %v7667_v40, %v674_v16 }
  0xaf   :  { %v678_v31 = vshrl.u32 %v7652_v24, %v675_v19  ;;  %v681_v32 = vshrl.u32 %v7647_v27, %v675_v19  ;;  %v684_v37 = vshrl.u32 %v7645_v36, %v675_v19  ;;  %v687_v41 = vshrl.u32 %v7667_v40, %v675_v19  ;;  %v158_v6 = vpop.permute.xlu0 %157 }
  0xb0   :  { %v690_v47 = vshrl.u32 %v7665_v44, %v675_v19  ;;  %vm692_vm2 = vcmp.lt.s32.totalorder %v673_v18, 1  ;;  %vm693_vm3 = vcmp.lt.s32.totalorder %v673_v18, 2  ;;  %vm695_vm4 = vcmp.lt.s32.totalorder %v673_v18, 4 }
  0xb1   :  { %v679_v48 = vor.u32 %v678_v31, %v677_v23  ;;  %v682_v49 = vor.u32 %v681_v32, %v680_v26  ;;  %v685_v50 = vor.u32 %v684_v37, %v683_v28  ;;  %v688_v51 = vor.u32 %v687_v41, %v686_v38 }
  0xb2   :  { %v691_v52 = vor.u32 %v690_v47, %v689_v42  ;;  %v768_v53 = vshrl.u32 %v767_v29, 23  ;;  %v676_v54 = vshrl.u32 %v7650_v22, %v675_v19  ;;  %vm694_vm5 = vcmp.lt.s32.totalorder %v673_v18, 3 }
  0xb3   :  { %v697_v56 = vsel %vm695_vm4, %v685_v50, 2102212464  ;;  %v700_v57 = vsel %vm692_vm2, %v679_v48, %v682_v49  ;;  %v704_v59 = vsel %vm692_vm2, %v682_v49, %v685_v50  ;;  %v701_v61 = vsel %vm695_vm4, %v688_v51, 920167782 }
  0xb4   :  { %v705_v62 = vsel %vm695_vm4, %v691_v52, 1326507024  ;;  %v4664_v1 = vadd.s32 4294967169, %v768_v53  ;;  %v696_v2 = vsel %vm692_vm2, %v676_v54, %v679_v48  ;;  %v702_v3 = vsel %vm694_vm5, %v685_v50, %v701_v61 }
  0xb5   :  { %v706_v4 = vsel %vm694_vm5, %v688_v51, %v705_v62  ;;  %v5514_v5 = vand.u32 8388607, %v7643_v21  ;;  %v698_v7 = vsel %vm694_vm5, %v682_v49, %v697_v56  ;;  %v703_v8 = vsel %vm693_vm3, %v700_v57, %v702_v3 }
  0xb6   :  { %v707_v9 = vsel %vm693_vm3, %v704_v59, %v706_v4  ;;  %v774_v10 = vadd.s32 1, %v4664_v1  ;;  %v5525_v19 = vmul.u32.u64.low %v5492_v20, %v703_v8  ;;  %v5526_v23 = vmul.u32.u64.high %v5492_v20, %v703_v8, %v5525_v19 }
  0xb7   :  { %v5521_v14 = vmul.u32.u64.low %v5492_v20, %v707_v9  ;;  %v5522_v16 = vmul.u32.u64.high %v5492_v20, %v707_v9, %v5521_v14  ;;  %v5530_v26 = vsel %vm359_vm1, %v358_v11, 0  ;;  %v134_v28 = vmul.f32 %v5452_v34, %v5464_v46 }
  0xb8   :  { %vm775_vm6 = vcmp.gt.s32.totalorder %v774_v10, 0  ;;  %v218_v29 = vmul.f32 %v5450_v33, %v158_v6  ;;  %v699_v31 = vsel %vm693_vm3, %v696_v2, %v698_v7  ;;  %v4652_v37 = vadd.s32 4294967169, %v456_v17  ;;  %v86_v17 = vpop.permute.xlu1 %85 }
  0xb9   :  { %v776_v32 = vsel %vm775_vm6, %v774_v10, 0  ;;  %v318_v38 = vmul.f32 %v5454_v35, %v5459_v43  ;;  %v5539_v42 = vand.u32 31, %v5530_v26  ;;  %vm717_vm7 = vc.u32 %v5522_v16, %v5525_v19 }
  0xba   :  { %v778_v41 = vand.u32 31, %v776_v32  ;;  %v718_v11 = vadd.s32 1, %v5526_v23  ;;  %v772_v46 = vor.u32 8388608, %v5514_v5  ;;  %v715_v47 = vmul.u32 %v5492_v20, %v699_v31 }
  0xbb   :  { %7766 = vst [vmem:[#allocation12_spill] sm:$0xff] %v5539_v42  ;;  %v777_v18 = vshrl.u32 %v776_v32, 5  ;;  %v234_v49 = vadd.f32 %v218_v29, %v134_v28 }
  0xbc   :  { %v779_v48 = vsub.s32 32, %v778_v41  ;;  %v719_v50 = vsel %vm717_vm7, %v718_v11, %v5526_v23  ;;  %v781_v43 = vshll.u32 %v7650_v22, %v778_v41  ;;  %v784_v51 = vshll.u32 %v7652_v24, %v778_v41  ;;  %v178_v10 = vpop.permute.xlu1 %177 }
  0xbd   :  { %v787_v52 = vshll.u32 %v7647_v27, %v778_v41  ;;  %v720_v53 = vadd.s32 %v719_v50, %v715_v47  ;;  %v790_v57 = vshll.u32 %v7645_v36, %v778_v41  ;;  %v793_v61 = vshll.u32 %v7667_v40, %v778_v41 }
  0xbe   :  { %v782_v54 = vshrl.u32 %v7652_v24, %v779_v48  ;;  %v785_v56 = vshrl.u32 %v7647_v27, %v779_v48  ;;  %v788_v20 = vshrl.u32 %v7645_v36, %v779_v48  ;;  %v791_v59 = vshrl.u32 %v7667_v40, %v779_v48 }
  0xbf   :  { %v794_v62 = vshrl.u32 %v7665_v44, %v779_v48  ;;  %v721_v1 = vadd.s32 536870912, %v720_v53  ;;  %vm796_vm8 = vcmp.lt.s32.totalorder %v777_v18, 1  ;;  %v780_v4 = vshrl.u32 %v7650_v22, %v779_v48 }
  0xc0   :  { %v783_v2 = vor.u32 %v782_v54, %v781_v43  ;;  %v786_v3 = vor.u32 %v785_v56, %v784_v51  ;;  %v789_v5 = vor.u32 %v788_v20, %v787_v52  ;;  %v792_v6 = vor.u32 %v791_v59, %v790_v57 }
  0xc1   :  { %v795_v7 = vor.u32 %v794_v62, %v793_v61  ;;  %v5558_v8 = vshrl.u32 %v721_v1, 30  ;;  %vm798_vm9 = vcmp.lt.s32.totalorder %v777_v18, 3  ;;  %vm799_vm10 = vcmp.lt.s32.totalorder %v777_v18, 4 }
  0xc2   :  { %v804_v9 = vsel %vm796_vm8, %v783_v2, %v786_v3  ;;  %v801_v14 = vsel %vm799_vm10, %v789_v5, 2102212464  ;;  %v805_v23 = vsel %vm799_vm10, %v792_v6, 920167782  ;;  %v808_v28 = vsel %vm796_vm8, %v786_v3, %v789_v5 }
  0xc3   :  { %v809_v29 = vsel %vm799_vm10, %v795_v7, 1326507024  ;;  %v723_v31 = vshll.u32 %v5558_v8, 30  ;;  %vm797_vm11 = vcmp.lt.s32.totalorder %v777_v18, 2  ;;  %v806_v32 = vsel %vm798_vm9, %v789_v5, %v805_v23 }
  0xc4   :  { %v5564_v41 = vadd.f32 %v318_v38, %v234_v49  ;;  %v807_v11 = vsel %vm797_vm11, %v804_v9, %v806_v32  ;;  %v810_v47 = vsel %vm798_vm9, %v792_v6, %v809_v29  ;;  %v812_v48 = vshll.u32 %v772_v46, 8 }
  0xc5   :  { %v223_v50 = vmul.f32 %v5450_v33, %v178_v10  ;;  %v5569_v43 = vsub.s32 %v720_v53, %v723_v31  ;;  %v800_v51 = vsel %vm796_vm8, %v780_v4, %v783_v2  ;;  %v802_v52 = vsel %vm798_vm9, %v786_v3, %v801_v14 }
  0xc6   :  { %7767 = vst [vmem:[#allocation13_spill] sm:$0xff] %v5564_v41  ;;  %v811_v54 = vsel %vm797_vm11, %v808_v28, %v810_v47  ;;  %v5577_v38 = vmul.u32.u64.low %v812_v48, %v807_v11  ;;  %v5578_v49 = vmul.u32.u64.high %v812_v48, %v807_v11, %v5577_v38  ;;  %v559_v20 = vand.u32 2139095040, %v5564_v41  ;;  %v170_v47 = vpop.permute.xlu0 %169 }
  0xc7   :  { %v5574_v56 = vmul.u32.u64.low %v812_v48, %v811_v54  ;;  %v5575_v57 = vmul.u32.u64.high %v812_v48, %v811_v54, %v5574_v56  ;;  %v139_v46 = vmul.f32 %v5452_v34, %v86_v17  ;;  %v462_v59 = vadd.s32 1, %v4652_v37 }
  0xc8   :  { %v726_v53 = vsub.s32 0, %v5569_v43  ;;  %v803_v61 = vsel %vm797_vm11, %v800_v51, %v802_v52  ;;  %v323_v62 = vmul.f32 %v5454_v35, %v5443_v25  ;;  %v560_v1 = vshrl.u32 %v559_v20, 23  ;;  %v270_v52 = vpop.permute.xlu1 %269 }
  0xc9   :  { %v239_v2 = vadd.f32 %v223_v50, %v139_v46  ;;  %v5588_v3 = vsub.s32 32, %v5539_v42  ;;  %vm821_vm12 = vc.u32 %v5575_v57, %v5577_v38  ;;  %v822_v4 = vadd.s32 1, %v5578_v49 }
  0xca   :  { %v819_v5 = vmul.u32 %v812_v48, %v803_v61  ;;  %v4656_v17 = vadd.s32 4294967169, %v560_v1  ;;  %vm463_vm13 = vcmp.gt.s32.totalorder %v462_v59, 0  ;;  %v4661_v37 = vmin.u32 %v726_v53, %v5569_v43 }
  0xcb   :  { %7768 = vst [vmem:[#allocation14_spill] sm:$0xff] %v5588_v3  ;;  %v823_v18 = vsel %vm821_vm12, %v822_v4, %v5578_v49  ;;  %v5595_v25 = vadd.f32 %v323_v62, %v239_v2  ;;  %v5599_v9 = vmul.f32 %v5454_v35, %v5448_v30  ;;  %v5602_v10 = vshrl.u32 %v5530_v26, 5 }
  0xcc   :  { %v824_v6 = vadd.s32 %v823_v18, %v819_v5  ;;  %v566_v7 = vadd.s32 1, %v4656_v17  ;;  %v375_v14 = vshrl.u32 %v7667_v40, %v5588_v3  ;;  %v137_v23 = vmul.f32 %v5452_v34, %v5474_v58 }
  0xcd   :  { %7769 = vst [vmem:[#allocation15_spill] sm:$0xff] %v5595_v25  ;;  %v5610_v28 = vshrl.u32 %v7665_v44, %v5588_v3  ;;  %v464_v29 = vsel %vm463_vm13, %v462_v59, 0  ;;  %v728_v32 = vclz %v4661_v37  ;;  %v5614_v30 = vmul.f32 %v5452_v34, %v5478_v63 }
  0xce   :  { %v825_v31 = vadd.s32 536870912, %v824_v6  ;;  %vm567_vm14 = vcmp.gt.s32.totalorder %v566_v7, 0  ;;  %v7642_v26 = vand.u32 2147483647, %v5564_v41  ;;  %v374_v48 = vshll.u32 %v7645_v36, %v5539_v42 }
  0xcf   :  { %v568_v11 = vsel %vm567_vm14, %v566_v7, 0  ;;  %v5621_v58 = vshll.u32 %v7667_v40, %v5539_v42  ;;  %v1079_v51 = vand.u32 2139095040, %v5595_v25  ;;  %v5626_v54 = vshrl.u32 %v464_v29, 5 }
  0xd0   :  { %v5623_v50 = vshrl.u32 %v825_v31, 30  ;;  %v5628_v63 = vand.u32 31, %v464_v29  ;;  %v570_v56 = vand.u32 31, %v568_v11  ;;  %v5631_v20 = vor.u32 %v375_v14, %v374_v48 }
  0xd1   :  { %7771 = vst [vmem:[#allocation17_spill] sm:$0xff] %v5626_v54  ;;  %v221_v53 = vmul.f32 %v5450_v33, %v170_v47  ;;  %v4662_v61 = vadd.s32 4294967294, %v728_v32  ;;  %v563_v62 = vand.u32 8388607, %v7642_v26  ;;  %v321_v2 = vmul.f32 %v5454_v35, %v270_v52 }
  0xd2   :  { %7770 = vst [vmem:[#allocation16_spill] sm:$0xff] %v5623_v50  ;;  %7772 = vst [vmem:[#allocation18_spill] sm:$0xff] %v5628_v63  ;;  %v827_v59 = vshll.u32 %v5623_v50, 30  ;;  %v571_v1 = vsub.s32 32, %v570_v56  ;;  %v569_v5 = vshrl.u32 %v568_v11, 5  ;;  %v573_v17 = vshll.u32 %v7650_v22, %v570_v56 }
  0xd3   :  { %v1080_v37 = vshrl.u32 %v1079_v51, 23  ;;  %v576_v7 = vshll.u32 %v7652_v24, %v570_v56  ;;  %v579_v32 = vshll.u32 %v7647_v27, %v570_v56  ;;  %v582_v47 = vshll.u32 %v7645_v36, %v570_v56 }
  0xd4   :  { %v5640_v4 = vsub.s32 %v824_v6, %v827_v59  ;;  %v574_v18 = vshrl.u32 %v7652_v24, %v571_v1  ;;  %v577_v14 = vshrl.u32 %v7647_v27, %v571_v1  ;;  %v580_v29 = vshrl.u32 %v7645_v36, %v571_v1 }
  0xd5   :  { %v583_v6 = vshrl.u32 %v7667_v40, %v571_v1  ;;  %v564_v11 = vor.u32 8388608, %v563_v62  ;;  %v237_v51 = vadd.f32 %v221_v53, %v137_v23  ;;  %v585_v21 = vshll.u32 %v7667_v40, %v570_v56 }
  0xd6   :  { %v830_v31 = vsub.s32 0, %v5640_v4  ;;  %v575_v48 = vor.u32 %v574_v18, %v573_v17  ;;  %v578_v52 = vor.u32 %v577_v14, %v576_v7  ;;  %v581_v59 = vor.u32 %v580_v29, %v579_v32 }
  0xd7   :  { %v584_v26 = vor.u32 %v583_v6, %v582_v47  ;;  %v586_v60 = vshrl.u32 %v7665_v44, %v571_v1  ;;  %v5655_v49 = vmul.f32 %v5452_v34, %v5488_v13  ;;  %v5659_v46 = vmul.f32 %v5452_v34, %v5518_v12  ;;  %v174_v47 = vpop.permute.xlu0 %173 }
  0xd8   :  { %v4676_v36 = vadd.s32 4294967169, %v1080_v37  ;;  %v5661_v27 = vadd.f32 %v321_v2, %v237_v51  ;;  %vm4663_vm15 = vcmp.lt.s32.totalorder %v4662_v61, 0  ;;  %v4665_v23 = vmin.u32 %v830_v31, %v5640_v4  ;;  %v274_v51 = vpop.permute.xlu1 %273 }
  0xd9   :  { %v587_v53 = vor.u32 %v586_v60, %v585_v21  ;;  %vm591_vm0 = vcmp.lt.s32.totalorder %v569_v5, 4  ;;  %vm588_vm1 = vcmp.lt.s32.totalorder %v569_v5, 1  ;;  %vm590_vm2 = vcmp.lt.s32.totalorder %v569_v5, 3 }
  0xda   :  { %7773 = vst [vmem:[#allocation19_spill] sm:$0xff] %v5661_v27  ;;  %v597_v56 = vsel %vm591_vm0, %v584_v26, 920167782  ;;  %v604_v62 = vshll.u32 %v564_v11, 8  ;;  %v596_v17 = vsel %vm588_vm1, %v575_v48, %v578_v52  ;;  %v600_v18 = vsel %vm588_vm1, %v578_v52, %v581_v59 }
  0xdb   :  { %v598_v13 = vsel %vm590_vm2, %v581_v59, %v597_v56  ;;  %v7649_v12 = vand.u32 2147483647, %v5595_v25  ;;  %v5668_v37 = vsel %vm4663_vm15, 0, %v4662_v61  ;;  %v593_v2 = vsel %vm591_vm0, %v581_v59, 2102212464 }
  0xdc   :  { %v601_v7 = vsel %vm591_vm0, %v587_v53, 1326507024  ;;  %v1086_v14 = vadd.s32 1, %v4676_v36  ;;  %v832_v29 = vclz %v4665_v23  ;;  %v572_v60 = vshrl.u32 %v7650_v22, %v571_v1 }
  0xdd   :  { %vm589_vm3 = vcmp.lt.s32.totalorder %v569_v5, 2  ;;  %v602_v21 = vsel %vm590_vm2, %v584_v26, %v601_v7  ;;  %v871_v6 = vand.u32 2139095040, %v5661_v27  ;;  %v732_v61 = vsub.s32 32, %v5668_v37 }
  0xde   :  { %v599_v31 = vsel %vm589_vm3, %v596_v17, %v598_v13  ;;  %v603_v32 = vsel %vm589_vm3, %v600_v18, %v602_v21  ;;  %vm1087_vm4 = vcmp.gt.s32.totalorder %v1086_v14, 0  ;;  %v592_v11 = vsel %vm588_vm1, %v572_v60, %v575_v48 }
  0xdf   :  { %v594_v36 = vsel %vm590_vm2, %v578_v52, %v593_v2  ;;  %v5680_v1 = vand.u32 8388607, %v7649_v12  ;;  %v736_v26 = vsub.s32 4294967266, %v5668_v37  ;;  %v1088_v53 = vsel %vm1087_vm4, %v1086_v14, 0 }
  0xe0   :  { %v5683_v59 = vmul.u32.u64.low %v604_v62, %v603_v32  ;;  %v5684_v23 = vmul.u32.u64.high %v604_v62, %v603_v32, %v5683_v59  ;;  %v4666_v56 = vadd.s32 4294967294, %v832_v29  ;;  %v5691_v48 = vmul.f32 %v5450_v33, %v174_v47 }
  0xe1   :  { %v5686_v17 = vmul.u32.u64.low %v604_v62, %v599_v31  ;;  %v5687_v13 = vmul.u32.u64.high %v604_v62, %v599_v31, %v5686_v17  ;;  %v716_v52 = vadd.s32 %v5525_v19, %v5522_v16  ;;  %v595_v18 = vsel %vm589_vm3, %v592_v11, %v594_v36 }
  0xe2   :  { %v1090_v2 = vand.u32 31, %v1088_v53  ;;  %v5697_v7 = vmul.f32 %v5454_v35, %v274_v51  ;;  %v1084_v29 = vor.u32 8388608, %v5680_v1  ;;  %v872_v21 = vshrl.u32 %v871_v6, 23 }
  0xe3   :  { %v734_v31 = vshrl.u32 %v716_v52, %v732_v61  ;;  %v737_v32 = vadd.s32 127, %v736_v26  ;;  %vm613_vm5 = vc.u32 %v5684_v23, %v5686_v17  ;;  %vm4667_vm6 = vcmp.lt.s32.totalorder %v4666_v56, 0 }
  0xe4   :  { %v1091_v16 = vsub.s32 32, %v1090_v2  ;;  %v611_v19 = vmul.u32 %v604_v62, %v595_v18  ;;  %v614_v5 = vadd.s32 1, %v5687_v13  ;;  %v1089_v47 = vshrl.u32 %v1088_v53, 5 }
  0xe5   :  { %v1093_v11 = vshll.u32 %v7650_v22, %v1090_v2  ;;  %v1096_v1 = vshll.u32 %v7652_v24, %v1090_v2  ;;  %v7774_v51 = vmov 2131351028   ;;  %v7775_v26 = vmov 2102212464  }
  0xe6   :  { %v1094_v36 = vshrl.u32 %v7652_v24, %v1091_v16  ;;  %v1097_v59 = vshrl.u32 %v7774_v51, %v1091_v16  ;;  %v615_v6 = vsel %vm613_vm5, %v614_v5, %v5687_v13  ;;  %v1099_v61 = vshll.u32 %v7774_v51, %v1090_v2 }
  0xe7   :  { %v1100_v52 = vshrl.u32 %v7775_v26, %v1091_v16  ;;  %v1102_v12 = vshll.u32 %v7775_v26, %v1090_v2  ;;  %v616_v62 = vadd.s32 %v615_v6, %v611_v19  ;;  %v1103_v53 = vshrl.u32 %v7667_v40, %v1091_v16 }
  0xe8   :  { %v1095_v18 = vor.u32 %v1094_v36, %v1093_v11  ;;  %v1098_v14 = vor.u32 %v1097_v59, %v1096_v1  ;;  %v1105_v22 = vshll.u32 %v7667_v40, %v1090_v2  ;;  %v1106_v24 = vshrl.u32 %v7665_v44, %v1091_v16 }
  0xe9   :  { %v1101_v60 = vor.u32 %v1100_v52, %v1099_v61  ;;  %v4668_v50 = vadd.s32 4294967169, %v872_v21  ;;  %v738_v54 = vshll.u32 %v737_v32, 23  ;;  %v5718_v13 = vsel %vm4667_vm6, 0, %v4666_v56 }
  0xea   :  { %v617_v5 = vadd.s32 536870912, %v616_v62  ;;  %v1104_v0 = vor.u32 %v1103_v53, %v1102_v12  ;;  %v7776_v42 = vmov 683565275   ;;  %v1107_v25 = vor.u32 %v1106_v24, %v1105_v22 }
  0xeb   :  { %v1092_v3 = vshrl.u32 %v7776_v42, %v1091_v16  ;;  %vm1108_vm7 = vcmp.lt.s32.totalorder %v1089_v47, 1  ;;  %vm1111_vm8 = vcmp.lt.s32.totalorder %v1089_v47, 4  ;;  %vm1110_vm9 = vcmp.lt.s32.totalorder %v1089_v47, 3 }
  0xec   :  { %v5721_v19 = vshrl.u32 %v617_v5, 30  ;;  %v1113_v11 = vsel %vm1111_vm8, %v1101_v60, 2102212464  ;;  %v1116_v36 = vsel %vm1108_vm7, %v1095_v18, %v1098_v14  ;;  %v1117_v21 = vsel %vm1111_vm8, %v1104_v0, 920167782 }
  0xed   :  { %v1112_v2 = vsel %vm1108_vm7, %v1092_v3, %v1095_v18  ;;  %v1114_v1 = vsel %vm1110_vm9, %v1098_v14, %v1113_v11  ;;  %v878_v32 = vadd.s32 1, %v4668_v50  ;;  %vm1109_vm10 = vcmp.lt.s32.totalorder %v1089_v47, 2 }
  0xee   :  { %7777 = vst [vmem:[#allocation20_spill] sm:$0xff] %v5721_v19  ;;  %v619_v56 = vshll.u32 %v5721_v19, 30  ;;  %v1118_v12 = vsel %vm1110_vm9, %v1101_v60, %v1117_v21  ;;  %v1120_v59 = vsel %vm1108_vm7, %v1098_v14, %v1101_v60  ;;  %v840_v22 = vsub.s32 4294967266, %v5718_v13 }
  0xef   :  { %v1119_v24 = vsel %vm1109_vm10, %v1116_v36, %v1118_v12  ;;  %v1121_v16 = vsel %vm1111_vm8, %v1107_v25, 1326507024  ;;  %v1124_v6 = vshll.u32 %v1084_v29, 8  ;;  %v1115_v52 = vsel %vm1109_vm10, %v1112_v2, %v1114_v1 }
  0xf0   :  { %v5727_v61 = vsub.s32 %v616_v62, %v619_v56  ;;  %v1122_v3 = vsel %vm1110_vm9, %v1104_v0, %v1121_v16  ;;  %v7778_v18 = vand.u32 2147483647, %v5661_v27  ;;  %vm879_vm11 = vcmp.gt.s32.totalorder %v878_v32, 0 }
  0xf1   :  { %v1123_v50 = vsel %vm1109_vm10, %v1120_v59, %v1122_v3  ;;  %v5732_v5 = vmul.u32.u64.low %v1124_v6, %v1119_v24  ;;  %v5733_v11 = vmul.u32.u64.high %v1124_v6, %v1119_v24, %v5732_v5  ;;  %v880_v25 = vsel %vm879_vm11, %v878_v32, 0 }
  0xf2   :  { %v875_v53 = vand.u32 8388607, %v7778_v18  ;;  %v622_v14 = vsub.s32 0, %v5727_v61  ;;  %v5737_v60 = vmul.u32.u64.low %v1124_v6, %v1123_v50  ;;  %v5738_v36 = vmul.u32.u64.high %v1124_v6, %v1123_v50, %v5737_v60 }
  0xf3   :  { %v7779_v29 = vshll.u32 %v5569_v43, %v5668_v37  ;;  %v820_v0 = vadd.s32 %v5577_v38, %v5575_v57  ;;  %v238_v62 = vadd.f32 %v5691_v48, %v5659_v46  ;;  %v882_v2 = vand.u32 31, %v880_v25 }
  0xf4   :  { %v5749_v1 = vor.u32 4788187, %v738_v54  ;;  %v836_v21 = vsub.s32 32, %v5718_v13  ;;  %v5752_v56 = vadd.s32 127, %v840_v22  ;;  %v4657_v32 = vmin.u32 %v622_v14, %v5727_v61 }
  0xf5   :  { %v5743_v47 = vor.u32 %v734_v31, %v7779_v29  ;;  %v1131_v12 = vmul.u32 %v1124_v6, %v1115_v52  ;;  %v1134_v43 = vadd.s32 1, %v5733_v11  ;;  %v883_v37 = vsub.s32 32, %v882_v2 }
  0xf6   :  { %v5757_v31 = vadd.f32 %v5697_v7, %v238_v62  ;;  %v624_v57 = vclz %v4657_v32  ;;  %vm1133_vm12 = vc.u32 %v5738_v36, %v5732_v5  ;;  %v876_v38 = vor.u32 8388608, %v875_v53 }
  0xf7   :  { %v5761_v54 = vshrl.u32 %v880_v25, 5  ;;  %v1135_v46 = vsel %vm1133_vm12, %v1134_v43, %v5733_v11  ;;  %v885_v48 = vshll.u32 %v7776_v42, %v882_v2  ;;  %v7781_v59 = vmov 2475754826  }
  0xf8   :  { %7780 = vst [vmem:[#allocation21_spill] sm:$0xff] %v5757_v31  ;;  %v886_v22 = vshrl.u32 %v7781_v59, %v883_v37  ;;  %v889_v24 = vshrl.u32 %v7774_v51, %v883_v37  ;;  %v4658_v16 = vadd.s32 4294967294, %v624_v57  ;;  %v1136_v6 = vadd.s32 %v1135_v46, %v1131_v12 }
  0xf9   :  { %v888_v7 = vshll.u32 %v7781_v59, %v882_v2  ;;  %v892_v52 = vshrl.u32 %v7775_v26, %v883_v37  ;;  %v891_v18 = vshll.u32 %v7774_v51, %v882_v2  ;;  %v894_v53 = vshll.u32 %v7775_v26, %v882_v2 }
  0xfa   :  { %v887_v3 = vor.u32 %v886_v22, %v885_v48  ;;  %v895_v50 = vshrl.u32 %v7667_v40, %v883_v37  ;;  %vm4659_vm13 = vcmp.lt.s32.totalorder %v4658_v16, 0  ;;  %v1137_v11 = vadd.s32 536870912, %v1136_v6 }
  0xfb   :  { %v890_v14 = vor.u32 %v889_v24, %v888_v7  ;;  %v898_v60 = vshrl.u32 %v7665_v44, %v883_v37  ;;  %v5773_v25 = vsel %vm4659_vm13, 0, %v4658_v16  ;;  %v893_v29 = vor.u32 %v892_v52, %v891_v18  ;;  %v5782_v44 = vpop.permute.xlu1 %90 }
  0xfc   :  { %v896_v62 = vor.u32 %v895_v50, %v894_v53  ;;  %v897_v32 = vshll.u32 %v7667_v40, %v882_v2  ;;  %v740_v12 = vand.u32 2147483647, %v5749_v1  ;;  %v742_v43 = vcvt.s32.f32 %v5743_v47 }
  0xfd   :  { %v632_v57 = vsub.s32 4294967266, %v5773_v25  ;;  %v5779_v46 = vshrl.u32 %v1137_v11, 30  ;;  %v838_v48 = vshrl.u32 %v820_v0, %v836_v21  ;;  %v842_v22 = vshll.u32 %v5752_v56, 23 }
  0xfe   :  { %v899_v24 = vor.u32 %v898_v60, %v897_v32  ;;  %v916_v7 = vshll.u32 %v876_v38, 8  ;;  %vm900_vm14 = vcmp.lt.s32.totalorder %v5761_v54, 1  ;;  %vm903_vm15 = vcmp.lt.s32.totalorder %v5761_v54, 4 }
  0xff   :  { %7782 = vst [vmem:[#allocation22_spill] sm:$0xff] %v5779_v46  ;;  %v1139_v16 = vshll.u32 %v5779_v46, 30  ;;  %v975_v2 = vand.u32 2139095040, %v5757_v31  ;;  %v884_v47 = vshrl.u32 %v7776_v42, %v883_v37  ;;  %v905_v1 = vsel %vm903_vm15, %v893_v29, 2102212464  ;;  %v5808_v40 = vpop.permute.xlu1 %181 }
 0x100   :  { %v908_v0 = vsel %vm900_vm14, %v887_v3, %v890_v14  ;;  %v909_v21 = vsel %vm903_vm15, %v896_v62, 920167782  ;;  %v633_v56 = vadd.s32 127, %v632_v57  ;;  %vm901_vm0 = vcmp.lt.s32.totalorder %v5761_v54, 2 }
 0x101   :  { %v5791_v52 = vsub.s32 %v1136_v6, %v1139_v16  ;;  %vm902_vm1 = vcmp.lt.s32.totalorder %v5761_v54, 3  ;;  %v628_v38 = vsub.s32 32, %v5773_v25  ;;  %v912_v53 = vsel %vm900_vm14, %v890_v14, %v893_v29 }
 0x102   :  { %v910_v18 = vsel %vm902_vm1, %v893_v29, %v909_v21  ;;  %v913_v50 = vsel %vm903_vm15, %v899_v24, 1326507024  ;;  %vm383_vm2 = vcmp.lt.s32.totalorder %v5602_v10, 4  ;;  %v904_v11 = vsel %vm900_vm14, %v884_v47, %v887_v3 }
 0x103   :  { %v1142_v37 = vsub.s32 0, %v5791_v52  ;;  %v906_v6 = vsel %vm902_vm1, %v890_v14, %v905_v1  ;;  %v911_v60 = vsel %vm901_vm0, %v908_v0, %v910_v18  ;;  %v914_v32 = vsel %vm902_vm1, %v896_v62, %v913_v50 }
 0x104   :  { %v5804_v57 = vmul.u32.u64.low %v916_v7, %v911_v60  ;;  %v5805_v16 = vmul.u32.u64.high %v916_v7, %v911_v60, %v5804_v57  ;;  %v976_v21 = vshrl.u32 %v975_v2, 23  ;;  %v612_v29 = vadd.s32 %v5686_v17, %v5684_v23 }
 0x105   :  { %v634_v24 = vshll.u32 %v633_v56, 23  ;;  %v915_v46 = vsel %vm901_vm0, %v912_v53, %v914_v32  ;;  %v7671_v3 = vand.u32 2147483647, %v5757_v31  ;;  %vm662_vm3 = vcmp.lt.s32.totalorder %v5471_v55, 0 }
 0x106   :  { %v4677_v14 = vmin.u32 %v1142_v37, %v5791_v52  ;;  %v5817_v62 = vmul.u32.u64.low %v916_v7, %v915_v46  ;;  %v5818_v47 = vmul.u32.u64.high %v916_v7, %v915_v46, %v5817_v62  ;;  %v4672_v1 = vadd.s32 4294967169, %v976_v21 }
 0x107   :  { %v5821_v2 = vsub.s32 32, %v5628_v63  ;;  %v837_v23 = vshll.u32 %v5640_v4, %v5718_v13  ;;  %v630_v17 = vshrl.u32 %v612_v29, %v628_v38  ;;  %v907_v0 = vsel %vm901_vm0, %v904_v11, %v906_v6  ;;  %v186_v4 = vpop.permute.xlu1 %185 }
 0x108   :  { %v743_v56 = vmul.f32 %v742_v43, %v740_v12  ;;  %v843_v18 = vor.u32 4788187, %v842_v22  ;;  %v926_v53 = vadd.s32 1, %v5805_v16  ;;  %v982_v50 = vadd.s32 1, %v4672_v1 }
 0x109   :  { %7783 = vst [vmem:[#allocation23_spill] sm:$0xff] %v5821_v2  ;;  %v839_v37 = vor.u32 %v838_v48, %v837_v23  ;;  %v629_v46 = vshll.u32 %v5727_v61, %v5773_v25  ;;  %v635_v60 = vor.u32 4788187, %v634_v24  ;;  %v979_v32 = vand.u32 8388607, %v7671_v3 }
 0x10a   :  { %v1144_v21 = vclz %v4677_v14  ;;  %v923_v62 = vmul.u32 %v916_v7, %v907_v0  ;;  %vm925_vm4 = vc.u32 %v5818_v47, %v5804_v57  ;;  %vm983_vm5 = vcmp.gt.s32.totalorder %v982_v50, 0 }
 0x10b   :  { %v746_v13 = vsub.s32 4, %v5558_v8  ;;  %v631_v54 = vor.u32 %v630_v17, %v629_v46  ;;  %v927_v12 = vsel %vm925_vm4, %v926_v53, %v5805_v16  ;;  %v984_v43 = vsel %vm983_vm5, %v982_v50, 0 }
 0x10c   :  { %v5839_v61 = vsel %vm383_vm2, %v5631_v20, 920167782  ;;  %v744_v25 = vxor.u32 2147483648, %v743_v56  ;;  %v844_v48 = vand.u32 2147483647, %v843_v18  ;;  %v928_v22 = vadd.s32 %v927_v12, %v923_v62 }
 0x10d   :  { %v7784_v7 = vor.u32 %v5610_v28, %v5621_v58  ;;  %v636_v11 = vand.u32 2147483647, %v635_v60  ;;  %v980_v6 = vor.u32 8388608, %v979_v32  ;;  %v225_v16 = vmul.f32 %v5450_v33, %v186_v4 }
 0x10e   :  { %v846_v29 = vcvt.s32.f32 %v839_v37  ;;  %v4678_v24 = vadd.s32 4294967294, %v1144_v21  ;;  %v929_v14 = vadd.s32 536870912, %v928_v22  ;;  %v986_v1 = vand.u32 31, %v984_v43 }
 0x10f   :  { %v5846_v38 = vsel %vm383_vm2, %v7784_v7, 1326507024  ;;  %v5852_v23 = vsel %vm662_vm3, %v746_v13, %v5558_v8  ;;  %v5856_v28 = vmul.f32 %v5452_v34, %v5503_v39  ;;  %v638_v58 = vcvt.s32.f32 %v631_v54 }
 0x110   :  { %7785 = vst [vmem:[#allocation24_spill] sm:$0xff] %v5852_v23  ;;  %v7786_v17 = vand.u32 2147483647, %v5462_v45  ;;  %v745_v18 = vsel %vm662_vm3, %v744_v25, %v743_v56  ;;  %v5864_v53 = vmul.f32 %v846_v29, %v844_v48  ;;  %v5866_v50 = vshrl.u32 %v929_v14, 30  ;;  %v5892_v14 = vpop.permute.xlu1 %105 }
 0x111   :  { %v987_v37 = vsub.s32 32, %v986_v1  ;;  %v5868_v46 = vmul.f32 %v638_v58, %v636_v11  ;;  %v985_v8 = vshrl.u32 %v984_v43, 5  ;;  %v5870_v60 = vshll.u32 %v980_v6, 8 }
 0x112   :  { %v5860_v0 = vand.u32 8388607, %v7786_v17  ;;  %v241_v39 = vadd.f32 %v225_v16, %v5614_v30  ;;  %vm4679_vm6 = vcmp.lt.s32.totalorder %v4678_v24, 0  ;;  %v931_v32 = vshll.u32 %v5866_v50, 30 }
 0x113   :  { %v989_v21 = vshll.u32 %v7776_v42, %v986_v1  ;;  %v990_v62 = vshrl.u32 %v7781_v59, %v987_v37  ;;  %v992_v56 = vshll.u32 %v7781_v59, %v986_v1  ;;  %v993_v4 = vshrl.u32 %v7774_v51, %v987_v37 }
 0x114   :  { %v995_v13 = vshll.u32 %v7774_v51, %v986_v1  ;;  %v996_v54 = vshrl.u32 %v7775_v26, %v987_v37  ;;  %v7787_v12 = vand.u32 2147483647, %v5471_v55  ;;  %v7788_v43 = vmov 0 }
 0x115   :  { %v5886_v30 = vsub.s32 %v928_v22, %v931_v32  ;;  %v991_v25 = vor.u32 %v990_v62, %v989_v21  ;;  %v998_v48 = vshll.u32 %v7775_v26, %v986_v1  ;;  %v7791_v7 = vmov 920167782  }
 0x116   :  { %vm5882_vm7 = vcmp.le.f32.partialorder %v7787_v12, 0.7853982  ;;  %v999_v11 = vshrl.u32 %v7791_v7, %v987_v37  ;;  %v5890_v6 = vsel %vm4679_vm6, 0, %v4678_v24  ;;  %v994_v16 = vor.u32 %v993_v4, %v992_v56 }
 0x117   :  { %v7789_v43 = vsel %vm5882_vm7, 4294967295, %v7788_v43  ;;  %v997_v29 = vor.u32 %v996_v54, %v995_v13  ;;  %vm1004_vm8 = vcmp.lt.s32.totalorder %v985_v8, 1  ;;  %v934_v58 = vsub.s32 0, %v5886_v30 }
 0x118   :  { %7790 = vst [vmem:[#allocation25_spill] sm:$0xff] %v7789_v43  ;;  %v1000_v17 = vor.u32 %v999_v11, %v998_v48  ;;  %v1001_v12 = vshll.u32 %v7791_v7, %v986_v1  ;;  %v7792_v3 = vmov 1326507024   ;;  %vm7719_vm9 = vcmp.lt.s32.totalorder %v5490_v15, 0 }
 0x119   :  { %v1002_v22 = vshrl.u32 %v7792_v3, %v987_v37  ;;  %v988_v32 = vshrl.u32 %v7776_v42, %v987_v37  ;;  %vm1006_vm10 = vcmp.lt.s32.totalorder %v985_v8, 3  ;;  %vm1007_vm11 = vcmp.lt.s32.totalorder %v985_v8, 4 }
 0x11a   :  { %v1012_v24 = vsel %vm1004_vm8, %v991_v25, %v994_v16  ;;  %v4669_v21 = vmin.u32 %v934_v58, %v5886_v30  ;;  %v1009_v56 = vsel %vm1007_vm11, %v997_v29, 2102212464  ;;  %v1013_v4 = vsel %vm1007_vm11, %v1000_v17, 920167782 }
 0x11b   :  { %v1003_v62 = vor.u32 %v1002_v22, %v1001_v12  ;;  %v1152_v13 = vsub.s32 4294967266, %v5890_v6  ;;  %vm1005_vm12 = vcmp.lt.s32.totalorder %v985_v8, 2  ;;  %v1014_v1 = vsel %vm1006_vm10, %v997_v29, %v1013_v4 }
 0x11c   :  { %v1016_v54 = vsel %vm1004_vm8, %v994_v16, %v997_v29  ;;  %v936_v48 = vclz %v4669_v21  ;;  %v1008_v11 = vsel %vm1004_vm8, %v988_v32, %v991_v25  ;;  %v1015_v37 = vsel %vm1005_vm12, %v1012_v24, %v1014_v1  ;;  %v5919_v29 = vpop.permute.xlu1 %193 }
 0x11d   :  { %v1017_v23 = vsel %vm1007_vm11, %v1003_v62, 1326507024  ;;  %v7793_v19 = vand.u32 2147483647, %v5490_v15  ;;  %v7794_v58 = vmov 0  ;;  %v1010_v12 = vsel %vm1006_vm10, %v994_v16, %v1009_v56 }
 0x11e   :  { %v1018_v22 = vsel %vm1006_vm10, %v1000_v17, %v1017_v23  ;;  %v5915_v4 = vmul.u32.u64.low %v5870_v60, %v1015_v37  ;;  %v5916_v45 = vmul.u32.u64.high %v5870_v60, %v1015_v37, %v5915_v4  ;;  %v848_v25 = vxor.u32 2147483648, %v5864_v53 }
 0x11f   :  { %vm5908_vm13 = vcmp.le.f32.partialorder %v7793_v19, 0.7853982  ;;  %v4670_v32 = vadd.s32 4294967294, %v936_v48  ;;  %v1019_v24 = vsel %vm1005_vm12, %v1016_v54, %v1018_v22  ;;  %v5924_v19 = vadd.f32 %v5599_v9, %v241_v39 }
 0x120   :  { %v7795_v58 = vsel %vm5908_vm13, 4294967295, %v7794_v58  ;;  %v748_v16 = vsel %vm5882_vm7, %v5471_v55, %v745_v18  ;;  %v7798_v23 = vand.u32 2147483647, %v5564_v41  ;;  %v7799_v17 = vmov 0 }
 0x121   :  { %7796 = vst [vmem:[#allocation26_spill] sm:$0xff] %v7795_v58  ;;  %7797 = vst [vmem:[#allocation27_spill] sm:$0xff] %v5924_v19  ;;  %v5936_v21 = vmul.u32.u64.low %v5870_v60, %v1019_v24  ;;  %v5937_v62 = vmul.u32.u64.high %v5870_v60, %v1019_v24, %v5936_v21  ;;  %v640_v56 = vxor.u32 2147483648, %v5868_v46  ;;  %v1148_v1 = vsub.s32 32, %v5890_v6 }
 0x122   :  { %vm5931_vm14 = vcmp.le.f32.partialorder %v7798_v23, 0.7853982  ;;  %v1153_v9 = vadd.s32 127, %v1152_v13  ;;  %v1011_v39 = vsel %vm1005_vm12, %v1008_v11, %v1010_v12  ;;  %vm7720_vm15 = vcmp.lt.s32.totalorder %v5564_v41, 0  ;;  %v282_v11 = vpop.permute.xlu1 %281 }
 0x123   :  { %v7800_v17 = vsel %vm5931_vm14, 4294967295, %v7799_v17  ;;  %v1030_v18 = vadd.s32 1, %v5916_v45  ;;  %v140_v54 = vmul.f32 %v5452_v34, %v5782_v44  ;;  %v1287_v48 = vand.u32 2139095040, %v5924_v19 }
 0x124   :  { %7801 = vst [vmem:[#allocation28_spill] sm:$0xff] %v7800_v17  ;;  %5202 = vcosq.f32 %v748_v16  ;;  %v849_v37 = vsel %vm7719_vm9, %v848_v25, %v5864_v53  ;;  %v1132_v22 = vadd.s32 %v5732_v5, %v5738_v36  ;;  %vm4671_vm0 = vcmp.lt.s32.totalorder %v4670_v32, 0  ;;  %v190_v5 = vpop.permute.xlu0 %189 }
 0x125   :  { %v1027_v8 = vmul.u32 %v5870_v60, %v1011_v39  ;;  %vm1029_vm1 = vc.u32 %v5937_v62, %v5915_v4  ;;  %v224_v13 = vmul.f32 %v5450_v33, %v5808_v40  ;;  %v1288_v44 = vshrl.u32 %v1287_v48, 23 }
 0x126   :  { %v641_v12 = vsel %vm7720_vm15, %v640_v56, %v5868_v46  ;;  %v1150_v24 = vshrl.u32 %v1132_v22, %v1148_v1  ;;  %v1154_v53 = vshll.u32 %v1153_v9, 23  ;;  %v1031_v25 = vsel %vm1029_vm1, %v1030_v18, %v5916_v45 }
 0x127   :  { %v5961_v36 = vsel %vm4671_vm0, 0, %v4670_v32  ;;  %v1032_v60 = vadd.s32 %v1031_v25, %v1027_v8  ;;  %v7676_v23 = vand.u32 2147483647, %v5924_v19  ;;  %v4684_v21 = vadd.s32 4294967169, %v1288_v44 }
 0x128   :  { %5204 = vsinq.f32 %v748_v16  ;;  %v852_v40 = vsel %vm5908_vm13, %v5490_v15, %v849_v37  ;;  %v1149_v39 = vshll.u32 %v5791_v52, %v5890_v6  ;;  %v324_v46 = vmul.f32 %v5454_v35, %v282_v11 }
 0x129   :  { %v1033_v56 = vadd.s32 536870912, %v1032_v60  ;;  %v240_v1 = vadd.f32 %v224_v13, %v140_v54  ;;  %v226_v45 = vmul.f32 %v5450_v33, %v190_v5  ;;  %v1294_v32 = vadd.s32 1, %v4684_v21 }
 0x12a   :  { %v5974_v9 = vsel %vm5931_vm14, %v5564_v41, %v641_v12  ;;  %v5976_v16 = vor.u32 %v1150_v24, %v1149_v39  ;;  %v5978_v18 = vor.u32 4788187, %v1154_v53  ;;  %v940_v48 = vsub.s32 32, %v5961_v36  ;;  %v290_v12 = vpop.permute.xlu1 %289 }
 0x12b   :  { %v944_v52 = vsub.s32 4294967266, %v5961_v36  ;;  %v5982_v6 = vshrl.u32 %v1033_v56, 30  ;;  %v1291_v54 = vand.u32 8388607, %v7676_v23  ;;  %vm1295_vm3 = vcmp.gt.s32.totalorder %v1294_v32, 0 }
 0x12c   :  { %5206 = vcosq.f32 %v852_v40  ;;  %v924_v37 = vadd.s32 %v5804_v57, %v5818_v47  ;;  %v1296_v22 = vsel %vm1295_vm3, %v1294_v32, 0  ;;  %v5988_v8 = vadd.f32 %v324_v46, %v240_v1 }
 0x12d   :  { %5208 = vsinq.f32 %v852_v40  ;;  %v1035_v13 = vshll.u32 %v5982_v6, 30  ;;  %v242_v44 = vadd.f32 %v226_v45, %v5655_v49  ;;  %v1298_v11 = vand.u32 31, %v1296_v22 }
 0x12e   :  { %v5992_v24 = vpop.eup %5202  ;;  %5210 = vcosq.f32 %v5974_v9  ;;  %v942_v5 = vshrl.u32 %v924_v37, %v940_v48  ;;  %v945_v57 = vadd.s32 127, %v944_v52  ;;  %v1292_v21 = vor.u32 8388608, %v1291_v54 }
 0x12f   :  { %7802 = vst [vmem:[#allocation29_spill] sm:$0xff] %v5992_v24  ;;  %v5997_v47 = vsub.s32 %v1032_v60, %v1035_v13  ;;  %v1299_v40 = vsub.s32 32, %v1298_v11  ;;  %v1297_v39 = vshrl.u32 %v1296_v22, 5  ;;  %v1301_v46 = vshll.u32 %v7776_v42, %v1298_v11 }
 0x130   :  { %v1183_v49 = vand.u32 2139095040, %v5988_v8  ;;  %v326_v56 = vmul.f32 %v5454_v35, %v290_v12  ;;  %v1304_v32 = vshll.u32 %v7781_v59, %v1298_v11  ;;  %v1307_v60 = vshll.u32 %v7774_v51, %v1298_v11 }
 0x131   :  { %v1038_v1 = vsub.s32 0, %v5997_v47  ;;  %v1302_v45 = vshrl.u32 %v7781_v59, %v1299_v40  ;;  %v1305_v48 = vshrl.u32 %v7774_v51, %v1299_v40  ;;  %v1308_v54 = vshrl.u32 %v7775_v26, %v1299_v40 }
 0x132   :  { %v6006_v52 = vpop.eup %5204  ;;  %v1310_v37 = vshll.u32 %v7775_v26, %v1298_v11  ;;  %v1311_v22 = vshrl.u32 %v7791_v7, %v1299_v40  ;;  %v946_v13 = vshll.u32 %v945_v57, 23  ;;  %v1313_v15 = vshll.u32 %v7791_v7, %v1298_v11 }
 0x133   :  { %7803 = vst [vmem:[#allocation30_spill] sm:$0xff] %v6006_v52  ;;  %v4673_v12 = vmin.u32 %v1038_v1, %v5997_v47  ;;  %v1303_v23 = vor.u32 %v1302_v45, %v1301_v46  ;;  %v1306_v25 = vor.u32 %v1305_v48, %v1304_v32  ;;  %v1309_v53 = vor.u32 %v1308_v54, %v1307_v60 }
 0x134   :  { %v1312_v58 = vor.u32 %v1311_v22, %v1310_v37  ;;  %v1314_v24 = vshrl.u32 %v7792_v3, %v1299_v40  ;;  %v1300_v52 = vshrl.u32 %v7776_v42, %v1299_v40  ;;  %v1332_v43 = vshll.u32 %v1292_v21, 8 }
 0x135   :  { %v1040_v55 = vclz %v4673_v12  ;;  %v1184_v17 = vshrl.u32 %v1183_v49, 23  ;;  %vm1316_vm4 = vcmp.lt.s32.totalorder %v1297_v39, 1  ;;  %vm1318_vm5 = vcmp.lt.s32.totalorder %v1297_v39, 3 }
 0x136   :  { %v6016_v41 = vpop.eup %5206  ;;  %v1315_v63 = vor.u32 %v1314_v24, %v1313_v15  ;;  %vm1319_vm6 = vcmp.lt.s32.totalorder %v1297_v39, 4  ;;  %v1324_v45 = vsel %vm1316_vm4, %v1303_v23, %v1306_v25  ;;  %vm1317_vm8 = vcmp.lt.s32.totalorder %v1297_v39, 2 }
 0x137   :  { %7804 = vst [vmem:[#allocation31_spill] sm:$0xff] %v6016_v41  ;;  %v6018_v57 = vpop.eup %5208  ;;  %v4674_v46 = vadd.s32 4294967294, %v1040_v55  ;;  %v1321_v1 = vsel %vm1319_vm6, %v1309_v53, 2102212464  ;;  %v1325_v32 = vsel %vm1319_vm6, %v1312_v58, 920167782  ;;  %v1328_v40 = vsel %vm1316_vm4, %v1306_v25, %v1309_v53 }
 0x138   :  { %7805 = vst [vmem:[#allocation32_spill] sm:$0xff] %v6018_v57  ;;  %v6020_v11 = vpop.eup %5210  ;;  %v1326_v48 = vsel %vm1318_vm5, %v1309_v53, %v1325_v32  ;;  %v1329_v21 = vsel %vm1319_vm6, %v1315_v63, 1326507024  ;;  %v1320_v49 = vsel %vm1316_vm4, %v1300_v52, %v1303_v23  ;;  %v1322_v60 = vsel %vm1318_vm5, %v1306_v25, %v1321_v1 }
 0x139   :  { %7806 = vst [vmem:[#allocation33_spill] sm:$0xff] %v6020_v11  ;;  %vm4675_vm10 = vcmp.lt.s32.totalorder %v4674_v46, 0  ;;  %v1327_v15 = vsel %vm1317_vm8, %v1324_v45, %v1326_v48  ;;  %v1330_v24 = vsel %vm1318_vm5, %v1312_v58, %v1329_v21  ;;  %v941_v22 = vshll.u32 %v5886_v30, %v5961_v36 }
 0x13a   :  { %v1331_v55 = vsel %vm1317_vm8, %v1328_v40, %v1330_v24  ;;  %v6027_v54 = vmul.u32.u64.low %v1332_v43, %v1327_v15  ;;  %v6028_v37 = vmul.u32.u64.high %v1332_v43, %v1327_v15, %v6027_v54  ;;  %v947_v12 = vor.u32 4788187, %v946_v13 }
 0x13b   :  { %v7690_v63 = vand.u32 2147483647, %v5988_v8  ;;  %v6034_v53 = vadd.f32 %v326_v56, %v242_v44  ;;  %v6036_v23 = vsel %vm4675_vm10, 0, %v4674_v46  ;;  %v4680_v25 = vadd.s32 4294967169, %v1184_v17 }
 0x13c   :  { %v6038_v52 = vmul.u32.u64.low %v1332_v43, %v1331_v55  ;;  %v6039_v58 = vmul.u32.u64.high %v1332_v43, %v1331_v55, %v6038_v52  ;;  %5212 = vsinq.f32 %v5974_v9  ;;  %v943_v1 = vor.u32 %v942_v5, %v941_v22 }
 0x13d   :  { %7807 = vst [vmem:[#allocation34_spill] sm:$0xff] %v6034_v53  ;;  %v1323_v45 = vsel %vm1317_vm8, %v1320_v49, %v1322_v60  ;;  %v143_v32 = vmul.f32 %v5452_v34, %v5892_v14  ;;  %v7808_v30 = vand.u32 2147483647, %v5978_v18  ;;  %v7809_v36 = vcvt.s32.f32 %v5976_v16 }
 0x13e   :  { %v1342_v56 = vadd.s32 1, %v6028_v37  ;;  %v227_v13 = vmul.f32 %v5450_v33, %v5919_v29  ;;  %v1190_v17 = vadd.s32 1, %v4680_v25  ;;  %v948_v46 = vand.u32 2147483647, %v947_v12 }
 0x13f   :  { %v6049_v44 = vmul.f32 %v7809_v36, %v7808_v30  ;;  %v1044_v9 = vsub.s32 32, %v6036_v23  ;;  %v1048_v5 = vsub.s32 4294967266, %v6036_v23  ;;  %v1187_v14 = vand.u32 8388607, %v7690_v63 }
 0x140   :  { %v1339_v39 = vmul.u32 %v1332_v43, %v1323_v45  ;;  %vm1341_vm11 = vc.u32 %v6039_v58, %v6027_v54  ;;  %vm1191_vm12 = vcmp.gt.s32.totalorder %v1190_v17, 0  ;;  %v1391_v16 = vand.u32 2139095040, %v6034_v53 }
 0x141   :  { %v950_v18 = vcvt.s32.f32 %v943_v1  ;;  %v1028_v29 = vadd.s32 %v5915_v4, %v5937_v62  ;;  %v1343_v48 = vsel %vm1341_vm11, %v1342_v56, %v6028_v37  ;;  %v1192_v40 = vsel %vm1191_vm12, %v1190_v17, 0 }
 0x142   :  { %v1344_v49 = vadd.s32 %v1343_v48, %v1339_v39  ;;  %v243_v15 = vadd.f32 %v227_v13, %v143_v32  ;;  %v1194_v24 = vand.u32 31, %v1192_v40  ;;  %v1188_v55 = vor.u32 8388608, %v1187_v14  ;;  %v294_v13 = vpop.permute.xlu1 %293  ;;  %v7812_v39 = vld [vmem:[#allocation15_spill] sm:$0xff] }
 0x143   :  { %v6065_v60 = vmul.f32 %v950_v18, %v948_v46  ;;  %v6067_v43 = vshrl.u32 %v1028_v29, %v1044_v9  ;;  %v6070_v12 = vadd.s32 127, %v1048_v5  ;;  %v1392_v4 = vshrl.u32 %v1391_v16, 23 }
 0x144   :  { %v1345_v52 = vadd.s32 536870912, %v1344_v49  ;;  %v1195_v25 = vsub.s32 32, %v1194_v24  ;;  %v1193_v62 = vshrl.u32 %v1192_v40, 5  ;;  %v1197_v37 = vshll.u32 %v7776_v42, %v1194_v24 }
 0x145   :  { %v1200_v1 = vshll.u32 %v7781_v59, %v1194_v24  ;;  %v1203_v45 = vshll.u32 %v7774_v51, %v1194_v24  ;;  %v1206_v56 = vshll.u32 %v7775_v26, %v1194_v24  ;;  %v1209_v5 = vshll.u32 %v7791_v7, %v1194_v24 }
 0x146   :  { %v6075_v32 = vshrl.u32 %v1345_v52, 30  ;;  %v1198_v30 = vshrl.u32 %v7781_v59, %v1195_v25  ;;  %v1201_v36 = vshrl.u32 %v7774_v51, %v1195_v25  ;;  %v6080_v17 = vpop.eup %5212  ;;  %v1204_v46 = vshrl.u32 %v7775_v26, %v1195_v25 }
 0x147   :  { %7811 = vst [vmem:[#allocation36_spill] sm:$0xff] %v6080_v17  ;;  %v1207_v9 = vshrl.u32 %v7791_v7, %v1195_v25  ;;  %v1210_v14 = vshrl.u32 %v7792_v3, %v1195_v25  ;;  %vm7707_vm0 = vcmp.lt.s32.totalorder %v7812_v39, 0  ;;  %v1228_v48 = vshll.u32 %v1188_v55, 8 }
 0x148   :  { %7810 = vst [vmem:[#allocation35_spill] sm:$0xff] %v6075_v32  ;;  %v1347_v16 = vshll.u32 %v6075_v32, 30  ;;  %v1199_v18 = vor.u32 %v1198_v30, %v1197_v37  ;;  %v1202_v29 = vor.u32 %v1201_v36, %v1200_v1  ;;  %v1205_v40 = vor.u32 %v1204_v46, %v1203_v45 }
 0x149   :  { %v1208_v52 = vor.u32 %v1207_v9, %v1206_v56  ;;  %v1211_v63 = vor.u32 %v1210_v14, %v1209_v5  ;;  %v327_v22 = vmul.f32 %v5454_v35, %v294_v13  ;;  %v1050_v21 = vshll.u32 %v6070_v12, 23 }
 0x14a   :  { %v6090_v41 = vsub.s32 %v1344_v49, %v1347_v16  ;;  %vm1212_vm1 = vcmp.lt.s32.totalorder %v1193_v62, 1  ;;  %v4688_v24 = vadd.s32 4294967169, %v1392_v4  ;;  %v1196_v57 = vshrl.u32 %v7776_v42, %v1195_v25 }
 0x14b   :  { %vm1213_vm3 = vcmp.lt.s32.totalorder %v1193_v62, 2  ;;  %vm1215_vm4 = vcmp.lt.s32.totalorder %v1193_v62, 4  ;;  %v1220_v11 = vsel %vm1212_vm1, %v1199_v18, %v1202_v29  ;;  %v7813_v37 = vand.u32 2147483647, %v7812_v39 }
 0x14c   :  { %v7814_v55 = vmov 0  ;;  %vm870_vm6 = vcmp.lt.s32.totalorder %v5661_v27, 0  ;;  %v1350_v1 = vsub.s32 0, %v6090_v41  ;;  %vm1214_vm8 = vcmp.lt.s32.totalorder %v1193_v62, 3 }
 0x14d   :  { %vm6095_vm5 = vcmp.le.f32.partialorder %v7813_v37, 0.7853982  ;;  %v1217_v49 = vsel %vm1215_vm4, %v1205_v40, 2102212464  ;;  %v1221_v12 = vsel %vm1215_vm4, %v1208_v52, 920167782  ;;  %v1216_v45 = vsel %vm1212_vm1, %v1196_v57, %v1199_v18 }
 0x14e   :  { %v7815_v55 = vsel %vm6095_vm5, 4294967295, %v7814_v55  ;;  %v1222_v4 = vsel %vm1214_vm8, %v1205_v40, %v1221_v12  ;;  %v1224_v30 = vsel %vm1212_vm1, %v1202_v29, %v1205_v40  ;;  %v1225_v25 = vsel %vm1215_vm4, %v1211_v63, 1326507024 }
 0x14f   :  { %7816 = vst [vmem:[#allocation37_spill] sm:$0xff] %v7815_v55  ;;  %v4685_v36 = vmin.u32 %v1350_v1, %v6090_v41  ;;  %v1218_v56 = vsel %vm1214_vm8, %v1202_v29, %v1217_v49  ;;  %v1223_v13 = vsel %vm1213_vm3, %v1220_v11, %v1222_v4  ;;  %v1226_v46 = vsel %vm1214_vm8, %v1208_v52, %v1225_v25  ;;  %v6189_v55 = vpop.permute.xlu1 %115 }
 0x150   :  { %v1227_v9 = vsel %vm1213_vm3, %v1224_v30, %v1226_v46  ;;  %v6104_v5 = vmul.u32.u64.low %v1228_v48, %v1223_v13  ;;  %v6105_v14 = vmul.u32.u64.high %v1228_v48, %v1223_v13, %v6104_v5  ;;  %v6108_v16 = vadd.f32 %v327_v22, %v243_v15 }
 0x151   :  { %v1352_v37 = vclz %v4685_v36  ;;  %v6110_v32 = vmul.u32.u64.low %v1228_v48, %v1227_v9  ;;  %v6111_v57 = vmul.u32.u64.high %v1228_v48, %v1227_v9, %v6110_v32  ;;  %v1398_v18 = vadd.s32 1, %v4688_v24 }
 0x152   :  { %7817 = vst [vmem:[#allocation38_spill] sm:$0xff] %v6108_v16  ;;  %v7818_v63 = vxor.u32 2147483648, %v6049_v44  ;;  %v954_v29 = vsub.s32 4, %v5866_v50  ;;  %v1045_v40 = vshll.u32 %v5997_v47, %v6036_v23  ;;  %v1219_v52 = vsel %vm1213_vm3, %v1216_v45, %v1218_v56 }
 0x153   :  { %v952_v15 = vxor.u32 2147483648, %v6065_v60  ;;  %v4686_v22 = vadd.s32 4294967294, %v1352_v37  ;;  %v7819_v1 = vand.u32 2147483647, %v6034_v53  ;;  %vm1399_vm10 = vcmp.gt.s32.totalorder %v1398_v18, 0 }
 0x154   :  { %v1161_v11 = vsel %vm7707_vm0, %v7818_v63, %v6049_v44  ;;  %v1047_v24 = vor.u32 %v6067_v43, %v1045_v40  ;;  %v1051_v49 = vor.u32 4788187, %v1050_v21  ;;  %v1238_v12 = vadd.s32 1, %v6105_v14 }
 0x155   :  { %v1395_v32 = vand.u32 8388607, %v7819_v1  ;;  %v1400_v44 = vsel %vm1399_vm10, %v1398_v18, 0  ;;  %vm4687_vm11 = vcmp.lt.s32.totalorder %v4686_v22, 0  ;;  %v1235_v4 = vmul.u32 %v1228_v48, %v1219_v52 }
 0x156   :  { %vm1237_vm12 = vc.u32 %v6111_v57, %v6104_v5  ;;  %v1495_v47 = vand.u32 2139095040, %v6108_v16  ;;  %v6133_v23 = vsel %vm6095_vm5, %v7812_v39, %v1161_v11  ;;  %v6138_v43 = vsel %vm870_vm6, %v954_v29, %v5866_v50 }
 0x157   :  { %7820 = vst [vmem:[#allocation39_spill] sm:$0xff] %v6138_v43  ;;  %v1239_v21 = vsel %vm1237_vm12, %v1238_v12, %v6105_v14  ;;  %v1402_v62 = vand.u32 31, %v1400_v44  ;;  %v6144_v48 = vsel %vm870_vm6, %v952_v15, %v6065_v60  ;;  %v1340_v45 = vadd.s32 %v6027_v54, %v6039_v58 }
 0x158   :  { %v1240_v30 = vadd.s32 %v1239_v21, %v1235_v4  ;;  %v1396_v25 = vor.u32 8388608, %v1395_v32  ;;  %v1052_v36 = vand.u32 2147483647, %v1051_v49  ;;  %v1054_v56 = vcvt.s32.f32 %v1047_v24 }
 0x159   :  { %v6148_v13 = vsel %vm4687_vm11, 0, %v4686_v22  ;;  %v1403_v46 = vsub.s32 32, %v1402_v62  ;;  %v1401_v9 = vshrl.u32 %v1400_v44, 5  ;;  %v1405_v14 = vshll.u32 %v7776_v42, %v1402_v62 }
 0x15a   :  { %v1241_v50 = vadd.s32 536870912, %v1240_v30  ;;  %v1496_v37 = vshrl.u32 %v1495_v47, 23  ;;  %v1408_v60 = vshll.u32 %v7781_v59, %v1402_v62  ;;  %v1360_v58 = vsub.s32 4294967266, %v6148_v13 }
 0x15b   :  { %v1406_v18 = vshrl.u32 %v7781_v59, %v1403_v46  ;;  %v1409_v63 = vshrl.u32 %v7774_v51, %v1403_v46  ;;  %v1412_v54 = vshrl.u32 %v7775_v26, %v1403_v46  ;;  %v1411_v29 = vshll.u32 %v7774_v51, %v1402_v62 }
 0x15c   :  { %v6156_v11 = vshrl.u32 %v1241_v50, 30  ;;  %v1415_v40 = vshrl.u32 %v7791_v7, %v1403_v46  ;;  %v1414_v22 = vshll.u32 %v7775_v26, %v1402_v62  ;;  %v6161_v1 = vshll.u32 %v1396_v25, 8 }
 0x15d   :  { %v1407_v52 = vor.u32 %v1406_v18, %v1405_v14  ;;  %v1410_v15 = vor.u32 %v1409_v63, %v1408_v60  ;;  %v7821_v32 = vand.u32 2147483647, %v5661_v27  ;;  %v7822_v24 = vmov 0 }
 0x15e   :  { %v1055_v49 = vmul.f32 %v1054_v56, %v1052_v36  ;;  %v1243_v12 = vshll.u32 %v6156_v11, 30  ;;  %v1413_v44 = vor.u32 %v1412_v54, %v1411_v29  ;;  %v1416_v47 = vor.u32 %v1415_v40, %v1414_v22 }
 0x15f   :  { %vm6165_vm1 = vcmp.le.f32.partialorder %v7821_v32, 0.7853982  ;;  %v1417_v21 = vshll.u32 %v7791_v7, %v1402_v62  ;;  %v1418_v50 = vshrl.u32 %v7792_v3, %v1403_v46  ;;  %v4692_v14 = vadd.s32 4294967169, %v1496_v37 }
 0x160   :  { %v7823_v24 = vsel %vm6165_vm1, 4294967295, %v7822_v24  ;;  %v1356_v25 = vsub.s32 32, %v6148_v13  ;;  %v1361_v18 = vadd.s32 127, %v1360_v58  ;;  %v6174_v60 = vsub.s32 %v1240_v30, %v1243_v12 }
 0x161   :  { %7824 = vst [vmem:[#allocation40_spill] sm:$0xff] %v7823_v24  ;;  %vm1420_vm3 = vcmp.lt.s32.totalorder %v1401_v9, 1  ;;  %v1404_v63 = vshrl.u32 %v7776_v42, %v1403_v46  ;;  %v1419_v36 = vor.u32 %v1418_v50, %v1417_v21  ;;  %vm1423_vm4 = vcmp.lt.s32.totalorder %v1401_v9, 4 }
 0x162   :  { %v1428_v56 = vsel %vm1420_vm3, %v1407_v52, %v1410_v15  ;;  %v1246_v54 = vsub.s32 0, %v6174_v60  ;;  %vm1422_vm6 = vcmp.lt.s32.totalorder %v1401_v9, 3  ;;  %v1425_v29 = vsel %vm1423_vm4, %v1413_v44, 2102212464 }
 0x163   :  { %v1429_v62 = vsel %vm1423_vm4, %v1416_v47, 920167782  ;;  %vm974_vm8 = vcmp.lt.s32.totalorder %v5757_v31, 0  ;;  %vm1421_vm10 = vcmp.lt.s32.totalorder %v1401_v9, 2  ;;  %v1432_v58 = vsel %vm1420_vm3, %v1410_v15, %v1413_v44 }
 0x164   :  { %v1430_v37 = vsel %vm1422_vm6, %v1413_v44, %v1429_v62  ;;  %v1433_v30 = vsel %vm1423_vm4, %v1419_v36, 1326507024  ;;  %v1362_v40 = vshll.u32 %v1361_v18, 23  ;;  %v4681_v22 = vmin.u32 %v1246_v54, %v6174_v60  ;;  %v202_v36 = vpop.permute.xlu0 %201 }
 0x165   :  { %v1424_v46 = vsel %vm1420_vm3, %v1404_v63, %v1407_v52  ;;  %v1431_v32 = vsel %vm1421_vm10, %v1428_v56, %v1430_v37  ;;  %v1426_v12 = vsel %vm1422_vm6, %v1410_v15, %v1425_v29  ;;  %v1434_v21 = vsel %vm1422_vm6, %v1416_v47, %v1433_v30 }
 0x166   :  { %v6185_v50 = vmul.u32.u64.low %v6161_v1, %v1431_v32  ;;  %v6186_v4 = vmul.u32.u64.high %v6161_v1, %v1431_v32, %v6185_v50  ;;  %v1358_v62 = vshrl.u32 %v1340_v45, %v1356_v25  ;;  %v1248_v39 = vclz %v4681_v22 }
 0x167   :  { %v1435_v44 = vsel %vm1421_vm10, %v1432_v58, %v1434_v21  ;;  %v1502_v18 = vadd.s32 1, %v4692_v14  ;;  %v6196_v52 = vsel %vm6165_vm1, %v5661_v27, %v6144_v48  ;;  %v1056_v15 = vxor.u32 2147483648, %v1055_v49 }
 0x168   :  { %v6199_v47 = vmul.u32.u64.low %v6161_v1, %v1435_v44  ;;  %v6200_v63 = vmul.u32.u64.high %v6161_v1, %v1435_v44, %v6199_v47  ;;  %v1357_v56 = vshll.u32 %v6090_v41, %v6148_v13  ;;  %v4682_v45 = vadd.s32 4294967294, %v1248_v39  ;;  %v198_v39 = vpop.permute.xlu1 %197 }
 0x169   :  { %v1427_v25 = vsel %vm1421_vm10, %v1424_v46, %v1426_v12  ;;  %vm1503_vm11 = vcmp.gt.s32.totalorder %v1502_v18, 0  ;;  %v1363_v14 = vor.u32 4788187, %v1362_v40  ;;  %v1446_v54 = vadd.s32 1, %v6186_v4 }
 0x16a   :  { %v7825_v29 = vand.u32 2147483647, %v6108_v16  ;;  %v1504_v37 = vsel %vm1503_vm11, %v1502_v18, 0  ;;  %5214 = vcosq.f32 %v6133_v23  ;;  %v1359_v58 = vor.u32 %v1358_v62, %v1357_v56 }
 0x16b   :  { %vm4683_vm12 = vcmp.lt.s32.totalorder %v4682_v45, 0  ;;  %v1506_v30 = vand.u32 31, %v1504_v37  ;;  %5216 = vsinq.f32 %v6133_v23  ;;  %v1443_v41 = vmul.u32 %v6161_v1, %v1427_v25  ;;  %v6224_v1 = vpop.permute.xlu0 %205 }
 0x16c   :  { %v1499_v48 = vand.u32 8388607, %v7825_v29  ;;  %v6210_v22 = vsel %vm4683_vm12, 0, %v4682_v45  ;;  %vm1445_vm3 = vc.u32 %v6200_v63, %v6185_v50  ;;  %5218 = vcosq.f32 %v6196_v52 }
 0x16d   :  { %v6218_v13 = vsel %vm974_vm8, %v1056_v15, %v1055_v49  ;;  %v1447_v9 = vsel %vm1445_vm3, %v1446_v54, %v6186_v4  ;;  %v6222_v40 = vmul.f32 %v5450_v33, %v202_v36  ;;  %v1364_v23 = vand.u32 2147483647, %v1363_v14  ;;  %v5176_v14 = vld [vmem:[%s7636_s3 + $0x20] sm:$0xff]   ;;  %v5177_v54 = vld [vmem:[%s7636_s3 + $0x28] sm:$0xff]  }
 0x16e   :  { %v1448_v46 = vadd.s32 %v1447_v9, %v1443_v41  ;;  %v1500_v32 = vor.u32 8388608, %v1499_v48  ;;  %v1507_v12 = vsub.s32 32, %v1506_v30  ;;  %v1366_v21 = vcvt.s32.f32 %v1359_v58  ;;  %4912 = vmatprep.subr.bf16.mxu0 %v5176_v14 }
 0x16f   :  { %v1256_v62 = vsub.s32 4294967266, %v6210_v22  ;;  %v1509_v44 = vshll.u32 %v7776_v42, %v1506_v30  ;;  %v228_v18 = vmul.f32 %v5450_v33, %v198_v39  ;;  %v1512_v4 = vshll.u32 %v7781_v59, %v1506_v30  ;;  %v298_v39 = vpop.permute.xlu0 %297  ;;  %4913 = vmatpush3.bf16.msra.mxu0 %v5176_v14 }
 0x170   :  { %v1449_v49 = vadd.s32 536870912, %v1448_v46  ;;  %v1510_v15 = vshrl.u32 %v7781_v59, %v1507_v12  ;;  %v1513_v47 = vshrl.u32 %v7774_v51, %v1507_v12  ;;  %v1515_v36 = vshll.u32 %v7774_v51, %v1506_v30  ;;  %4914 = vmatprep.subr.bf16.mxu0 %v5177_v54 }
 0x171   :  { %v1516_v56 = vshrl.u32 %v7775_v26, %v1507_v12  ;;  %v1518_v45 = vshll.u32 %v7775_v26, %v1506_v30  ;;  %v1519_v25 = vshrl.u32 %v7791_v7, %v1507_v12  ;;  %v6242_v29 = vmul.f32 %v1366_v21, %v1364_v23 }
 0x172   :  { %v6244_v48 = vshrl.u32 %v1449_v49, 30  ;;  %v1505_v58 = vshrl.u32 %v1504_v37, 5  ;;  %v6246_v41 = vshll.u32 %v1500_v32, 8  ;;  %v1511_v9 = vor.u32 %v1510_v15, %v1509_v44 }
 0x173   :  { %v1514_v27 = vor.u32 %v1513_v47, %v1512_v4  ;;  %v1517_v24 = vor.u32 %v1516_v56, %v1515_v36  ;;  %v1520_v43 = vor.u32 %v1519_v25, %v1518_v45  ;;  %v1521_v16 = vshll.u32 %v7791_v7, %v1506_v30  ;;  %4915 = vmatpush3.bf16.msra.mxu0 %v5177_v54 }
 0x174   :  { %v1451_v17 = vshll.u32 %v6244_v48, 30  ;;  %v1522_v2 = vshrl.u32 %v7792_v3, %v1507_v12  ;;  %v244_v23 = vadd.f32 %v228_v18, %v5856_v28  ;;  %v6252_v21 = vpop.eup %5214  ;;  %v1252_v37 = vsub.s32 32, %v6210_v22 }
 0x175   :  { %7826 = vst [vmem:[#allocation41_spill] sm:$0xff] %v6252_v21  ;;  %v1257_v32 = vadd.s32 127, %v1256_v62  ;;  %v1508_v44 = vshrl.u32 %v7776_v42, %v1507_v12  ;;  %v328_v49 = vmul.f32 %v5454_v35, %v298_v39  ;;  %v6257_v15 = vpop.eup %5216  ;;  %v7828_v4 = vand.u32 2147483647, %v5757_v31 }
 0x176   :  { %7827 = vst [vmem:[#allocation42_spill] sm:$0xff] %v6257_v15  ;;  %v7829_v30 = vmov 0  ;;  %v6265_v28 = vsub.s32 %v1448_v46, %v1451_v17  ;;  %v1523_v18 = vor.u32 %v1522_v2, %v1521_v16  ;;  %vm1524_vm6 = vcmp.lt.s32.totalorder %v1505_v58, 1  ;;  %v6267_v47 = vpop.eup %5218 }
 0x177   :  { %vm6261_vm4 = vcmp.le.f32.partialorder %v7828_v4, 0.7853982  ;;  %vm1527_vm10 = vcmp.lt.s32.totalorder %v1505_v58, 4  ;;  %7832 = vst [vmem:[#allocation44_spill] sm:$0xff] %v6267_v47  ;;  %vm1526_vm11 = vcmp.lt.s32.totalorder %v1505_v58, 3  ;;  %v1532_v62 = vsel %vm1524_vm6, %v1511_v9, %v1514_v27 }
 0x178   :  { %v7830_v30 = vsel %vm6261_vm4, 4294967295, %v7829_v30  ;;  %v1529_v12 = vsel %vm1527_vm10, %v1517_v24, 2102212464  ;;  %v1533_v36 = vsel %vm1527_vm10, %v1520_v43, 920167782  ;;  %vm7718_vm12 = vcmp.lt.s32.totalorder %v5924_v19, 0 }
 0x179   :  { %7831 = vst [vmem:[#allocation43_spill] sm:$0xff] %v7830_v30  ;;  %v1454_v56 = vsub.s32 0, %v6265_v28  ;;  %vm1525_vm3 = vcmp.lt.s32.totalorder %v1505_v58, 2  ;;  %v1534_v45 = vsel %vm1526_vm11, %v1517_v24, %v1533_v36  ;;  %v1536_v25 = vsel %vm1524_vm6, %v1514_v27, %v1517_v24 }
 0x17a   :  { %v1528_v14 = vsel %vm1524_vm6, %v1508_v44, %v1511_v9  ;;  %v1530_v17 = vsel %vm1526_vm11, %v1514_v27, %v1529_v12  ;;  %v1535_v2 = vsel %vm1525_vm3, %v1532_v62, %v1534_v45  ;;  %v1537_v16 = vsel %vm1527_vm10, %v1523_v18, 1326507024 }
 0x17b   :  { %v4689_v46 = vmin.u32 %v1454_v56, %v6265_v28  ;;  %v1538_v39 = vsel %vm1526_vm11, %v1520_v43, %v1537_v16  ;;  %v6274_v4 = vmul.u32.u64.low %v6246_v41, %v1535_v2  ;;  %v6275_v21 = vmul.u32.u64.high %v6246_v41, %v1535_v2, %v6274_v4 }
 0x17c   :  { %v7833_v15 = vand.u32 2147483647, %v5924_v19  ;;  %v7834_v47 = vmov 0  ;;  %v1236_v27 = vadd.s32 %v6104_v5, %v6111_v57  ;;  %v1258_v24 = vshll.u32 %v1257_v32, 23 }
 0x17d   :  { %v1539_v54 = vsel %vm1525_vm3, %v1536_v25, %v1538_v39  ;;  %v6287_v9 = vadd.f32 %v328_v49, %v244_v23  ;;  %v1368_v43 = vxor.u32 2147483648, %v6242_v29  ;;  %v1456_v44 = vclz %v4689_v46 }
 0x17e   :  { %vm6280_vm0 = vcmp.le.f32.partialorder %v7833_v15, 0.7853982  ;;  %v6291_v18 = vmul.u32.u64.low %v6246_v41, %v1539_v54  ;;  %v6292_v12 = vmul.u32.u64.high %v6246_v41, %v1539_v54, %v6291_v18  ;;  %v1254_v62 = vshrl.u32 %v1236_v27, %v1252_v37 }
 0x17f   :  { %v7835_v47 = vsel %vm6280_vm0, 4294967295, %v7834_v47  ;;  %7837 = vst [vmem:[#allocation46_spill] sm:$0xff] %v6287_v9  ;;  %v1531_v15 = vsel %vm1525_vm3, %v1528_v14, %v1530_v17  ;;  %v7709_v36 = vand.u32 2147483647, %v6287_v9  ;;  %v1599_v56 = vand.u32 2139095040, %v6287_v9 }
 0x180   :  { %7836 = vst [vmem:[#allocation45_spill] sm:$0xff] %v7835_v47  ;;  %5220 = vsinq.f32 %v6196_v52  ;;  %v1058_v5 = vsub.s32 4, %v5982_v6  ;;  %v4690_v57 = vadd.s32 4294967294, %v1456_v44  ;;  %v1550_v23 = vadd.s32 1, %v6275_v21 }
 0x181   :  { %v1060_v32 = vsel %vm6261_vm4, %v5757_v31, %v6218_v13  ;;  %v1253_v58 = vshll.u32 %v6174_v60, %v6210_v22  ;;  %v1259_v37 = vor.u32 4788187, %v1258_v24  ;;  %v1600_v49 = vshrl.u32 %v1599_v56, 23 }
 0x182   :  { %vm4691_vm6 = vcmp.lt.s32.totalorder %v4690_v57, 0  ;;  %v1547_v45 = vmul.u32 %v6246_v41, %v1531_v15  ;;  %vm1549_vm10 = vc.u32 %v6292_v12, %v6274_v4  ;;  %v1603_v52 = vand.u32 8388607, %v7709_v36 }
 0x183   :  { %v1369_v25 = vsel %vm7718_vm12, %v1368_v43, %v6242_v29  ;;  %v1255_v14 = vor.u32 %v1254_v62, %v1253_v58  ;;  %v1551_v13 = vsel %vm1549_vm10, %v1550_v23, %v6275_v21  ;;  %v4696_v17 = vadd.s32 4294967169, %v1600_v49  ;;  %v7840_v62 = vld [vmem:[#allocation12_spill] sm:$0xff] }
 0x184   :  { %v6318_v60 = vsel %vm974_vm8, %v1058_v5, %v5982_v6  ;;  %5222 = vcosq.f32 %v1060_v32  ;;  %v6320_v22 = vsel %vm4691_vm6, 0, %v4690_v57  ;;  %v1552_v41 = vadd.s32 %v1551_v13, %v1547_v45  ;;  %v7839_v6 = vld [vmem:[#allocation14_spill] sm:$0xff] }
 0x185   :  { %7838 = vst [vmem:[#allocation47_spill] sm:$0xff] %v6318_v60  ;;  %5224 = vsinq.f32 %v1060_v32  ;;  %v1260_v2 = vand.u32 2147483647, %v1259_v37  ;;  %v6324_v16 = vmul.f32 %v5450_v33, %v6224_v1  ;;  %v1606_v29 = vadd.s32 1, %v4696_v17 }
 0x186   :  { %v6329_v21 = vsel %vm6280_vm0, %v5924_v19, %v1369_v25  ;;  %v1553_v46 = vadd.s32 536870912, %v1552_v41  ;;  %v1604_v39 = vor.u32 8388608, %v1603_v52  ;;  %v366_v27 = vshrl.u32 %v7781_v59, %v7839_v6 }
 0x187   :  { %v1262_v24 = vcvt.s32.f32 %v1255_v14  ;;  %v1464_v54 = vsub.s32 4294967266, %v6320_v22  ;;  %v6336_v43 = vmul.f32 %v5452_v34, %v6189_v55  ;;  %vm1607_vm8 = vcmp.gt.s32.totalorder %v1606_v29, 0 }
 0x188   :  { %v6339_v44 = vshrl.u32 %v1553_v46, 30  ;;  %v1608_v18 = vsel %vm1607_vm8, %v1606_v29, 0  ;;  %v365_v15 = vshll.u32 %v7776_v42, %v7840_v62  ;;  %5226 = vcosq.f32 %v6329_v21 }
 0x189   :  { %v6344_v56 = vmul.f32 %v1262_v24, %v1260_v2  ;;  %v1444_v5 = vadd.s32 %v6185_v50, %v6200_v63  ;;  %v1610_v57 = vand.u32 31, %v1608_v18  ;;  %v1460_v55 = vsub.s32 32, %v6320_v22 }
 0x18a   :  { %v6348_v23 = vpop.eup %5220  ;;  %v1555_v32 = vshll.u32 %v6339_v44, 30  ;;  %v6352_v58 = vshll.u32 %v1604_v39, 8  ;;  %v6354_v37 = vor.u32 %v366_v27, %v365_v15  ;;  %v1465_v49 = vadd.s32 127, %v1464_v54 }
 0x18b   :  { %7841 = vst [vmem:[#allocation14_spill] sm:$0xff] %v6348_v23  ;;  %v1611_v45 = vsub.s32 32, %v1610_v57  ;;  %v368_v52 = vshll.u32 %v7781_v59, %v7840_v62  ;;  %v369_v25 = vshrl.u32 %v7774_v51, %v7839_v6  ;;  %v1609_v63 = vshrl.u32 %v1608_v18, 5 }
 0x18c   :  { %v6360_v50 = vsub.s32 %v1552_v41, %v1555_v32  ;;  %v1613_v14 = vshll.u32 %v7776_v42, %v1610_v57  ;;  %v1616_v13 = vshll.u32 %v7781_v59, %v1610_v57  ;;  %v1619_v29 = vshll.u32 %v7774_v51, %v1610_v57 }
 0x18d   :  { %v1614_v17 = vshrl.u32 %v7781_v59, %v1611_v45  ;;  %v1617_v2 = vshrl.u32 %v7774_v51, %v1611_v45  ;;  %v1620_v46 = vshrl.u32 %v7775_v26, %v1611_v45  ;;  %v1622_v41 = vshll.u32 %v7775_v26, %v1610_v57 }
 0x18e   :  { %v6368_v39 = vpop.eup %5222  ;;  %v1558_v27 = vsub.s32 0, %v6360_v50  ;;  %v1623_v24 = vshrl.u32 %v7791_v7, %v1611_v45  ;;  %v1625_v54 = vshll.u32 %v7791_v7, %v1610_v57  ;;  %v1626_v1 = vshrl.u32 %v7792_v3, %v1611_v45 }
 0x18f   :  { %7842 = vst [vmem:[#allocation12_spill] sm:$0xff] %v6368_v39  ;;  %v6374_v18 = vpop.eup %5224  ;;  %v1615_v15 = vor.u32 %v1614_v17, %v1613_v14  ;;  %v1618_v32 = vor.u32 %v1617_v2, %v1616_v13  ;;  %v1621_v36 = vor.u32 %v1620_v46, %v1619_v29  ;;  %v1462_v47 = vshrl.u32 %v1444_v5, %v1460_v55 }
 0x190   :  { %v4693_v19 = vmin.u32 %v1558_v27, %v6360_v50  ;;  %v1624_v31 = vor.u32 %v1623_v24, %v1622_v41  ;;  %v371_v39 = vshll.u32 %v7774_v51, %v7840_v62  ;;  %v1466_v30 = vshll.u32 %v1465_v49, 23  ;;  %v5178_v27 = vld [vmem:[%s7636_s3 + $0x30] sm:$0xff]  }
 0x191   :  { %v1627_v60 = vor.u32 %v1626_v1, %v1625_v54  ;;  %vm1631_vm11 = vcmp.lt.s32.totalorder %v1609_v63, 4  ;;  %v372_v57 = vshrl.u32 %v7775_v26, %v7839_v6  ;;  %v1612_v14 = vshrl.u32 %v7776_v42, %v1611_v45  ;;  %4916 = vmatprep.subr.bf16.mxu0 %v5178_v27 }
 0x192   :  { %v1560_v23 = vclz %v4693_v19  ;;  %vm1628_vm3 = vcmp.lt.s32.totalorder %v1609_v63, 1  ;;  %v1633_v13 = vsel %vm1631_vm11, %v1621_v36, 2102212464  ;;  %v6384_v17 = vpop.eup %5226  ;;  %vm1630_vm6 = vcmp.lt.s32.totalorder %v1609_v63, 3  ;;  %4917 = vmatpush3.bf16.msra.mxu0 %v5178_v27 }
 0x193   :  { %v1636_v5 = vsel %vm1628_vm3, %v1615_v15, %v1618_v32  ;;  %v1637_v55 = vsel %vm1631_vm11, %v1624_v31, 920167782  ;;  %v370_v2 = vor.u32 %v369_v25, %v368_v52  ;;  %vm1629_vm10 = vcmp.lt.s32.totalorder %v1609_v63, 2 }
 0x194   :  { %v4694_v62 = vadd.s32 4294967294, %v1560_v23  ;;  %v1632_v1 = vsel %vm1628_vm3, %v1612_v14, %v1615_v15  ;;  %v1638_v49 = vsel %vm1630_vm6, %v1621_v36, %v1637_v55  ;;  %v1634_v29 = vsel %vm1630_vm6, %v1618_v32, %v1633_v13 }
 0x195   :  { %v1639_v46 = vsel %vm1629_vm10, %v1636_v5, %v1638_v49  ;;  %v1640_v19 = vsel %vm1628_vm3, %v1618_v32, %v1621_v36  ;;  %v1641_v45 = vsel %vm1631_vm11, %v1627_v60, 1326507024  ;;  %vm1182_vm12 = vcmp.lt.s32.totalorder %v5988_v8, 0 }
 0x196   :  { %vm4695_vm8 = vcmp.lt.s32.totalorder %v4694_v62, 0  ;;  %v1642_v41 = vsel %vm1630_vm6, %v1624_v31, %v1641_v45  ;;  %v6393_v24 = vmul.u32.u64.low %v6352_v58, %v1639_v46  ;;  %v6394_v54 = vmul.u32.u64.high %v6352_v58, %v1639_v46, %v6393_v24 }
 0x197   :  { %v1467_v23 = vor.u32 4788187, %v1466_v30  ;;  %v6398_v52 = vsel %vm4695_vm8, 0, %v4694_v62  ;;  %v1643_v36 = vsel %vm1629_vm10, %v1640_v19, %v1642_v41  ;;  %v373_v25 = vor.u32 %v372_v57, %v371_v39  ;;  %v5179_v39 = vld [vmem:[%s7636_s3 + $0x38] sm:$0xff]  }
 0x198   :  { %v1264_v60 = vxor.u32 2147483648, %v6344_v56  ;;  %v1461_v15 = vshll.u32 %v6265_v28, %v6320_v22  ;;  %v356_v31 = vor.u32 8388608, %v5860_v0  ;;  %v364_v32 = vshrl.u32 %v7776_v42, %v7839_v6  ;;  %4918 = vmatprep.subr.bf16.mxu0 %v5179_v39 }
 0x199   :  { %v1635_v14 = vsel %vm1629_vm10, %v1632_v1, %v1634_v29  ;;  %v6409_v30 = vmul.u32.u64.low %v6352_v58, %v1643_v36  ;;  %v6410_v13 = vmul.u32.u64.high %v6352_v58, %v1643_v36, %v6409_v30  ;;  %vm380_vm11 = vcmp.lt.s32.totalorder %v5602_v10, 1  ;;  %4919 = vmatpush3.bf16.msra.mxu0 %v5179_v39 }
 0x19a   :  { %v7843_v28 = vand.u32 2147483647, %v5988_v8  ;;  %v1463_v22 = vor.u32 %v1462_v47, %v1461_v15  ;;  %v1568_v6 = vsub.s32 4294967266, %v6398_v52  ;;  %v1654_v63 = vadd.s32 1, %v6394_v54 }
 0x19b   :  { %vm382_vm6 = vcmp.lt.s32.totalorder %v5602_v10, 3  ;;  %v1468_v57 = vand.u32 2147483647, %v1467_v23  ;;  %v388_v5 = vsel %vm380_vm11, %v6354_v37, %v370_v2  ;;  %v392_v62 = vsel %vm380_vm11, %v370_v2, %v373_v25 }
 0x19c   :  { %vm6418_vm3 = vcmp.le.f32.partialorder %v7843_v28, 0.7853982  ;;  %v390_v55 = vsel %vm382_vm6, %v373_v25, %v5839_v61  ;;  %v1651_v47 = vmul.u32 %v6352_v58, %v1635_v14  ;;  %vm381_vm10 = vcmp.lt.s32.totalorder %v5602_v10, 2  ;;  %v7847_v28 = vld [vmem:[#allocation10_spill] sm:$0xff] }
 0x19d   :  { %v385_v1 = vsel %vm383_vm2, %v373_v25, 2102212464  ;;  %v394_v49 = vsel %vm382_vm6, %v5631_v20, %v5846_v38  ;;  %vm1653_vm8 = vc.u32 %v6410_v13, %v6393_v24  ;;  %v391_v61 = vsel %vm381_vm10, %v388_v5, %v390_v55 }
 0x19e   :  { %v395_v58 = vsel %vm381_vm10, %v392_v62, %v394_v49  ;;  %v396_v29 = vshll.u32 %v356_v31, 8  ;;  %v1470_v46 = vcvt.s32.f32 %v1463_v22  ;;  %v1569_v19 = vadd.s32 127, %v1568_v6 }
 0x19f   :  { %v1655_v45 = vsel %vm1653_vm8, %v1654_v63, %v6394_v54  ;;  %v384_v27 = vsel %vm380_vm11, %v364_v32, %v6354_v37  ;;  %v386_v38 = vsel %vm382_vm6, %v370_v2, %v385_v1  ;;  %v1265_v36 = vsel %vm1182_vm12, %v1264_v60, %v6344_v56  ;;  %v7849_v1 = vld [vmem:[#allocation18_spill] sm:$0xff] }
 0x1a0   :  { %v1656_v20 = vadd.s32 %v1655_v45, %v1651_v47  ;;  %v6453_v41 = vmul.u32.u64.low %v396_v29, %v395_v58  ;;  %v6454_v23 = vmul.u32.u64.high %v396_v29, %v395_v58, %v6453_v41  ;;  %v1471_v25 = vmul.f32 %v1470_v46, %v1468_v57  ;;  %v7848_v57 = vld [vmem:[#allocation23_spill] sm:$0xff] }
 0x1a1   :  { %v6459_v15 = vmul.u32.u64.low %v396_v29, %v391_v61  ;;  %v6460_v31 = vmul.u32.u64.high %v396_v29, %v391_v61, %v6459_v15  ;;  %5228 = vsinq.f32 %v6329_v21  ;;  %v7846_v37 = vsub.s32 4, %v6156_v11 }
 0x1a2   :  { %v6473_v54 = vadd.f32 %v6222_v40, %v6336_v43  ;;  %v1657_v32 = vadd.s32 536870912, %v1656_v20  ;;  %vm1390_vm2 = vcmp.lt.s32.totalorder %v6034_v53, 0  ;;  %v1474_v56 = vsub.s32 4, %v6244_v48 }
 0x1a3   :  { %v6469_v2 = vsel %vm1182_vm12, %v7846_v37, %v6156_v11  ;;  %v1564_v60 = vsub.s32 32, %v6398_v52  ;;  %v1570_v14 = vshll.u32 %v1569_v19, 23  ;;  %v387_v21 = vsel %vm381_vm10, %v384_v27, %v386_v38 }
 0x1a4   :  { %v6483_v11 = vsel %vm6418_vm3, %v5988_v8, %v1265_v36  ;;  %v1548_v40 = vadd.s32 %v6274_v4, %v6292_v12  ;;  %v6487_v43 = vshrl.u32 %v1657_v32, 30  ;;  %vm405_vm12 = vc.u32 %v6454_v23, %v6459_v15 }
 0x1a5   :  { %v1472_v30 = vxor.u32 2147483648, %v1471_v25  ;;  %v1565_v39 = vshll.u32 %v6360_v50, %v6398_v52  ;;  %v406_v10 = vadd.s32 1, %v6460_v31  ;;  %v452_v22 = vand.u32 2147483647, %v7847_v28 }
 0x1a6   :  { %v1659_v6 = vshll.u32 %v6487_v43, 30  ;;  %v403_v63 = vmul.u32 %v396_v29, %v387_v21  ;;  %v470_v5 = vshrl.u32 %v7781_v59, %v7848_v57  ;;  %v473_v4 = vshrl.u32 %v7774_v51, %v7848_v57 }
 0x1a7   :  { %v1566_v12 = vshrl.u32 %v1548_v40, %v1564_v60  ;;  %v6500_v55 = vor.u32 4788187, %v1570_v14  ;;  %v407_v62 = vsel %vm405_vm12, %v406_v10, %v6460_v31  ;;  %v476_v50 = vshrl.u32 %v7775_v26, %v7848_v57 }
 0x1a8   :  { %v6505_v52 = vsub.s32 %v1656_v20, %v1659_v6  ;;  %v408_v47 = vadd.s32 %v407_v62, %v403_v63  ;;  %v469_v49 = vshll.u32 %v7776_v42, %v7849_v1  ;;  %v472_v61 = vshll.u32 %v7781_v59, %v7849_v1  ;;  %v7854_v62 = vld [vmem:[#allocation17_spill] sm:$0xff] }
 0x1a9   :  { %v459_v58 = vand.u32 8388607, %v452_v22  ;;  %v475_v29 = vshll.u32 %v7774_v51, %v7849_v1  ;;  %v478_v46 = vshll.u32 %v7775_v26, %v7849_v1  ;;  %v479_v19 = vshrl.u32 %v7791_v7, %v7848_v57 }
 0x1aa   :  { %v1662_v45 = vsub.s32 0, %v6505_v52  ;;  %v409_v27 = vadd.s32 536870912, %v408_v47  ;;  %v471_v20 = vor.u32 %v470_v5, %v469_v49  ;;  %v474_v38 = vor.u32 %v473_v4, %v472_v61 }
 0x1ab   :  { %v477_v41 = vor.u32 %v476_v50, %v475_v29  ;;  %v480_v36 = vor.u32 %v479_v19, %v478_v46  ;;  %v481_v31 = vshll.u32 %v7791_v7, %v7849_v1  ;;  %v482_v37 = vshrl.u32 %v7792_v3, %v7848_v57  ;;  %v6524_v32 = vpop.eup %5228  ;;  %v6539_v50 = vpop.permute.xlu1 %120 }
 0x1ac   :  { %v1473_v60 = vsel %vm1390_vm2, %v1472_v30, %v1471_v25  ;;  %v1567_v14 = vor.u32 %v1566_v12, %v1565_v39  ;;  %v4697_v21 = vmin.u32 %v1662_v45, %v6505_v52  ;;  %v6529_v40 = vshrl.u32 %v409_v27, 30 }
 0x1ad   :  { %v7850_v10 = vand.u32 2147483647, %v6034_v53  ;;  %v7851_v6 = vmov 0  ;;  %v1572_v63 = vand.u32 2147483647, %v6500_v55  ;;  %v460_v5 = vor.u32 8388608, %v459_v58 }
 0x1ae   :  { %v483_v4 = vor.u32 %v482_v37, %v481_v31  ;;  %vm484_vm6 = vcmp.lt.s32.totalorder %v7854_v62, 1  ;;  %v1664_v25 = vclz %v4697_v21  ;;  %v411_v30 = vshll.u32 %v6529_v40, 30  ;;  %v7855_v37 = vld [vmem:[#allocation8_spill] sm:$0xff] }
 0x1af   :  { %vm6533_vm11 = vcmp.le.f32.partialorder %v7850_v10, 0.7853982  ;;  %vm486_vm10 = vcmp.lt.s32.totalorder %v7854_v62, 3  ;;  %vm487_vm8 = vcmp.lt.s32.totalorder %v7854_v62, 4  ;;  %v492_v39 = vsel %vm484_vm6, %v471_v20, %v474_v38 }
 0x1b0   :  { %v7852_v6 = vsel %vm6533_vm11, 4294967295, %v7851_v6  ;;  %v493_v12 = vsel %vm487_vm8, %v480_v36, 920167782  ;;  %v496_v55 = vsel %vm484_vm6, %v474_v38, %v477_v41  ;;  %v497_v1 = vsel %vm487_vm8, %v483_v4, 1326507024 }
 0x1b1   :  { %7853 = vst [vmem:[#allocation10_spill] sm:$0xff] %v7852_v6  ;;  %v4698_v49 = vadd.s32 4294967294, %v1664_v25  ;;  %v6548_v61 = vsub.s32 %v408_v47, %v411_v30  ;;  %v468_v58 = vshrl.u32 %v7776_v42, %v7848_v57  ;;  %v494_v29 = vsel %vm486_vm10, %v477_v41, %v493_v12 }
 0x1b2   :  { %vm485_vm12 = vcmp.lt.s32.totalorder %v7854_v62, 2  ;;  %v489_v46 = vsel %vm487_vm8, %v477_v41, 2102212464  ;;  %v498_v19 = vsel %vm486_vm10, %v480_v36, %v497_v1  ;;  %v500_v45 = vshll.u32 %v460_v5, 8  ;;  %v126_v36 = vpop.permute.xlu1 %125  ;;  %v7856_v1 = vld [vmem:[#allocation38_spill] sm:$0xff] }
 0x1b3   :  { %vm4699_vm9 = vcmp.lt.s32.totalorder %v4698_v49, 0  ;;  %v414_v27 = vsub.s32 0, %v6548_v61  ;;  %v495_v47 = vsel %vm485_vm12, %v492_v39, %v494_v29  ;;  %v499_v31 = vsel %vm485_vm12, %v496_v55, %v498_v19 }
 0x1b4   :  { %v1667_v57 = vsel %vm4699_vm9, 0, %v4698_v49  ;;  %vm350_vm15 = vcmp.lt.s32.totalorder %v7855_v37, 0  ;;  %v488_v21 = vsel %vm484_vm6, %v468_v58, %v471_v20  ;;  %v490_v30 = vsel %vm486_vm10, %v474_v38, %v489_v46 }
 0x1b5   :  { %v6565_v41 = vmul.u32.u64.low %v500_v45, %v499_v31  ;;  %v6566_v10 = vmul.u32.u64.high %v500_v45, %v499_v31, %v6565_v41  ;;  %v1668_v5 = vsub.s32 32, %v1667_v57  ;;  %v1672_v4 = vsub.s32 4294967266, %v1667_v57 }
 0x1b6   :  { %v4649_v25 = vmin.u32 %v414_v27, %v6548_v61  ;;  %5230 = vcosq.f32 %v6483_v11  ;;  %v1574_v39 = vcvt.s32.f32 %v1567_v14  ;;  %v1476_v20 = vsel %vm6533_vm11, %v6034_v53, %v1473_v60 }
 0x1b7   :  { %v6572_v12 = vmul.u32.u64.low %v500_v45, %v495_v47  ;;  %v6573_v55 = vmul.u32.u64.high %v500_v45, %v495_v47, %v6572_v12  ;;  %vm7721_vm9 = vcmp.lt.s32.totalorder %v7856_v1, 0  ;;  %v1652_v49 = vadd.s32 %v6393_v24, %v6410_v13 }
 0x1b8   :  { %v1673_v58 = vadd.s32 127, %v1672_v4  ;;  %v416_v29 = vclz %v4649_v25  ;;  %5232 = vsinq.f32 %v6483_v11  ;;  %v1575_v38 = vmul.f32 %v1574_v39, %v1572_v63 }
 0x1b9   :  { %v7857_v14 = vand.u32 2147483647, %v7855_v37  ;;  %v434_v19 = vsub.s32 4, %v6529_v40  ;;  %v491_v60 = vsel %vm485_vm12, %v488_v21, %v490_v30  ;;  %v1670_v27 = vshrl.u32 %v1652_v49, %v1668_v5  ;;  %v210_v21 = vpop.permute.xlu1 %209 }
 0x1ba   :  { %v1674_v47 = vshll.u32 %v1673_v58, 23  ;;  %v4650_v31 = vadd.s32 4294967294, %v416_v29  ;;  %vm509_vm10 = vc.u32 %v6566_v10, %v6572_v12  ;;  %v6599_v24 = vsel %vm1390_vm2, %v1474_v56, %v6244_v48  ;;  %v310_v48 = vpop.permute.xlu0 %309 }
 0x1bb   :  { %vm6585_vm6 = vcmp.le.f32.partialorder %v7857_v14, 0.7853982  ;;  %5234 = vcosq.f32 %v1476_v20  ;;  %v7860_v13 = vand.u32 2147483647, %v7856_v1  ;;  %v7861_v11 = vmov 0 }
 0x1bc   :  { %v510_v62 = vadd.s32 1, %v6573_v55  ;;  %v1669_v41 = vshll.u32 %v6505_v52, %v1667_v57  ;;  %v1675_v5 = vor.u32 4788187, %v1674_v47  ;;  %v404_v4 = vadd.s32 %v6459_v15, %v6454_v23 }
 0x1bd   :  { %vm6603_vm8 = vcmp.le.f32.partialorder %v7860_v13, 0.7853982  ;;  %vm4651_vm2 = vcmp.lt.s32.totalorder %v4650_v31, 0  ;;  %v1576_v56 = vxor.u32 2147483648, %v1575_v38  ;;  %v507_v30 = vmul.u32 %v500_v45, %v491_v60 }
 0x1be   :  { %v7862_v11 = vsel %vm6603_vm8, 4294967295, %v7861_v11  ;;  %v419_v25 = vsel %vm4651_vm2, 0, %v4650_v31  ;;  %v511_v39 = vsel %vm509_vm10, %v510_v62, %v6573_v55  ;;  %v1671_v49 = vor.u32 %v1670_v27, %v1669_v41  ;;  %v6623_v55 = vld [vmem:[%s7636_s3] sm:$0xff]  }
 0x1bf   :  { %7863 = vst [vmem:[#allocation23_spill] sm:$0xff] %v7862_v11  ;;  %v420_v58 = vsub.s32 32, %v419_v25  ;;  %v424_v29 = vsub.s32 4294967266, %v419_v25  ;;  %v435_v14 = vsel %vm350_vm15, %v434_v19, %v6529_v40  ;;  %v512_v13 = vadd.s32 %v511_v39, %v507_v30  ;;  %v302_v19 = vpop.permute.xlu1 %301  ;;  %4936 = vmatprep.subr.bf16.mxu0 %v6623_v55 }
 0x1c0   :  { %v147_v52 = vmul.f32 %v5452_v34, %v126_v36  ;;  %v231_v57 = vmul.f32 %v5450_v33, %v210_v21  ;;  %v331_v23 = vmul.f32 %v5454_v35, %v310_v48  ;;  %v1676_v15 = vand.u32 2147483647, %v1675_v5  ;;  %v6625_v27 = vpop.eup %5230 }
 0x1c1   :  { %v421_v47 = vshll.u32 %v6548_v61, %v419_v25  ;;  %v422_v45 = vshrl.u32 %v404_v4, %v420_v58  ;;  %v425_v60 = vadd.s32 127, %v424_v29  ;;  %5236 = vsinq.f32 %v1476_v20 }
 0x1c2   :  { %v1577_v40 = vsel %vm7721_vm9, %v1576_v56, %v1575_v38  ;;  %v513_v36 = vadd.s32 536870912, %v512_v13  ;;  %v247_v33 = vadd.f32 %v231_v57, %v147_v52  ;;  %v1678_v31 = vcvt.s32.f32 %v1671_v49  ;;  %v6632_v41 = vpop.eup %5232 }
 0x1c3   :  { %v423_v62 = vor.u32 %v422_v45, %v421_v47  ;;  %v426_v21 = vshll.u32 %v425_v60, 23  ;;  %v437_v61 = vsel %vm6585_vm6, 0, %v435_v14  ;;  %vm7723_vm12 = vcmp.lt.s32.totalorder %v6287_v9, 0 }
 0x1c4   :  { %vm6637_vm10 = vcmp.le.f32.partialorder %v452_v22, 0.7853982  ;;  %vm7722_vm2 = vcmp.lt.s32.totalorder %v7847_v28, 0  ;;  %v514_v38 = vshrl.u32 %v513_v36, 30  ;;  %v6642_v5 = vadd.f32 %v331_v23, %v247_v33 }
 0x1c5   :  { %v1580_v4 = vsel %vm6603_vm8, %v7856_v1, %v1577_v40  ;;  %v1679_v48 = vmul.f32 %v1678_v31, %v1676_v15  ;;  %v427_v56 = vor.u32 4788187, %v426_v21  ;;  %v329_v25 = vmul.f32 %v5454_v35, %v302_v19  ;;  %v6648_v30 = vpop.eup %5234  ;;  %v306_v31 = vpop.permute.xlu1 %305 }
 0x1c6   :  { %7866 = vst [vmem:[#allocation18_spill] sm:$0xff] %v6648_v30  ;;  %v441_v39 = vadd.s32 3, %v437_v61  ;;  %v515_v22 = vshll.u32 %v514_v38, 30  ;;  %v538_v49 = vsub.s32 4, %v514_v38  ;;  %v7725_v58 = vand.u32 2147483647, %v6642_v5 }
 0x1c7   :  { %v428_v14 = vand.u32 2147483647, %v427_v56  ;;  %v430_v52 = vcvt.s32.f32 %v423_v62  ;;  %v1911_v57 = vand.u32 2139095040, %v6642_v5  ;;  %5238 = vcosq.f32 %v1580_v4 }
 0x1c8   :  { %v7867_v23 = vand.u32 2147483647, %v6287_v9  ;;  %v7868_v15 = vmov 0  ;;  %v6659_v47 = vsub.s32 %v512_v13, %v515_v22  ;;  %v539_v45 = vsel %vm7722_vm2, %v538_v49, %v514_v38 }
 0x1c9   :  { %v146_v60 = vmul.f32 %v5452_v34, %v6539_v50  ;;  %v1680_v40 = vxor.u32 2147483648, %v1679_v48  ;;  %v431_v36 = vmul.f32 %v430_v52, %v428_v14  ;;  %v1912_v33 = vshrl.u32 %v1911_v57, 23 }
 0x1ca   :  { %vm6655_vm9 = vcmp.le.f32.partialorder %v7867_v23, 0.7853982  ;;  %v6666_v19 = vadd.f32 %v329_v25, %v6473_v54  ;;  %5240 = vsinq.f32 %v1580_v4  ;;  %v6668_v62 = vand.u32 3, %v441_v39  ;;  %v7872_v39 = vld [vmem:[#allocation20_spill] sm:$0xff] }
 0x1cb   :  { %v7869_v15 = vsel %vm6655_vm9, 4294967295, %v7868_v15  ;;  %v518_v21 = vsub.s32 0, %v6659_v47  ;;  %v1915_v13 = vand.u32 8388607, %v7725_v58  ;;  %v432_v56 = vxor.u32 2147483648, %v431_v36  ;;  %v6677_v22 = vpop.eup %5236 }
 0x1cc   :  { %7870 = vst [vmem:[#allocation17_spill] sm:$0xff] %v7869_v15  ;;  %v541_v38 = vsel %vm6637_vm10, 0, %v539_v45  ;;  %v6675_v34 = vand.u32 3, %v437_v61  ;;  %v4708_v50 = vadd.s32 4294967169, %v1912_v33  ;;  %7871 = vst [vmem:[#allocation8_spill] sm:$0xff] %v6677_v22  ;;  %v246_v4 = vadd.f32 %v6324_v16, %v146_v60 }
 0x1cd   :  { %v4653_v54 = vmin.u32 %v518_v21, %v6659_v47  ;;  %v330_v25 = vmul.f32 %v5454_v35, %v306_v31  ;;  %v642_v49 = vsub.s32 4, %v7872_v39  ;;  %v1681_v14 = vsel %vm7723_vm12, %v1680_v40, %v1679_v48 }
 0x1ce   :  { %v433_v52 = vsel %vm350_vm15, %v432_v56, %v431_v36  ;;  %v1918_v57 = vadd.s32 1, %v4708_v50  ;;  %v7724_v61 = vand.u32 2147483647, %v6666_v19  ;;  %v545_v33 = vadd.s32 3, %v541_v38 }
 0x1cf   :  { %v436_v23 = vsel %vm6585_vm6, %v7855_v37, %v433_v52  ;;  %v520_v45 = vclz %v4653_v54  ;;  %v1916_v16 = vor.u32 8388608, %v1915_v13  ;;  %v508_v35 = vadd.s32 %v6572_v12, %v6566_v10  ;;  %v7873_v13 = vld [vmem:[#allocation13_spill] sm:$0xff] }
 0x1d0   :  { %5242 = vcosq.f32 %v436_v23  ;;  %vm1919_vm2 = vcmp.gt.s32.totalorder %v1918_v57, 0  ;;  %v1703_v48 = vand.u32 2139095040, %v6666_v19  ;;  %v6694_v36 = vadd.f32 %v330_v25, %v246_v4 }
 0x1d1   :  { %5244 = vsinq.f32 %v436_v23  ;;  %v4654_v60 = vadd.s32 4294967294, %v520_v45  ;;  %v1920_v40 = vsel %vm1919_vm2, %v1918_v57, 0  ;;  %v6699_v46 = vsel %vm6655_vm9, %v6287_v9, %v1681_v14  ;;  %v6708_v12 = vpop.eup %5238 }
 0x1d2   :  { %v6701_v31 = vand.u32 3, %v541_v38  ;;  %v1922_v21 = vand.u32 31, %v1920_v40  ;;  %vm7874_vm15 = vcmp.lt.s32.totalorder %v7873_v13, 0  ;;  %7875 = vst [vmem:[#allocation38_spill] sm:$0xff] %v6708_v12  ;;  %v6710_v56 = vand.u32 3, %v545_v33 }
 0x1d3   :  { %v6706_v10 = vsel %vm7874_vm15, %v642_v49, %v7872_v39  ;;  %vm4655_vm6 = vcmp.lt.s32.totalorder %v4654_v60, 0  ;;  %v6712_v50 = vshll.u32 %v1916_v16, 8  ;;  %v6716_v54 = vand.u32 8388607, %v7724_v61 }
 0x1d4   :  { %vm447_vm2 = vcmp.eq.s32.totalorder %v6668_v62, 2  ;;  %v523_v38 = vsel %vm4655_vm6, 0, %v4654_v60  ;;  %v6719_v4 = vshrl.u32 %v1920_v40, 5  ;;  %v1923_v25 = vsub.s32 32, %v1922_v21  ;;  %v6723_v39 = vpop.eup %5240 }
 0x1d5   :  { %v6721_v14 = vshrl.u32 %v1703_v48, 23  ;;  %7876 = vst [vmem:[#allocation20_spill] sm:$0xff] %v6723_v39  ;;  %v524_v49 = vsub.s32 32, %v523_v38  ;;  %v528_v52 = vsub.s32 4294967266, %v523_v38  ;;  %v1925_v57 = vshll.u32 %v7776_v42, %v1922_v21 }
 0x1d6   :  { %v1928_v23 = vshll.u32 %v7781_v59, %v1922_v21  ;;  %v525_v45 = vshll.u32 %v6659_v47, %v523_v38  ;;  %v1926_v33 = vshrl.u32 %v7781_v59, %v1923_v25  ;;  %v1929_v16 = vshrl.u32 %v7774_v51, %v1923_v25 }
 0x1d7   :  { %v1932_v48 = vshrl.u32 %v7775_v26, %v1923_v25  ;;  %v526_v60 = vshrl.u32 %v508_v35, %v524_v49  ;;  %v529_v40 = vadd.s32 127, %v528_v52  ;;  %v1931_v61 = vshll.u32 %v7774_v51, %v1922_v21 }
 0x1d8   :  { %v1935_v58 = vshrl.u32 %v7791_v7, %v1923_v25  ;;  %v1927_v29 = vor.u32 %v1926_v33, %v1925_v57  ;;  %v1930_v63 = vor.u32 %v1929_v16, %v1928_v23  ;;  %v1934_v15 = vshll.u32 %v7775_v26, %v1922_v21 }
 0x1d9   :  { %v527_v38 = vor.u32 %v526_v60, %v525_v45  ;;  %v530_v12 = vshll.u32 %v529_v40, 23  ;;  %v1933_v39 = vor.u32 %v1932_v48, %v1931_v61  ;;  %v1938_v35 = vshrl.u32 %v7792_v3, %v1923_v25 }
 0x1da   :  { %v5243_v49 = vpop.eup %5242  ;;  %v1936_v52 = vor.u32 %v1935_v58, %v1934_v15  ;;  %v1937_v30 = vshll.u32 %v7791_v7, %v1922_v21  ;;  %v1807_v23 = vand.u32 2139095040, %v6694_v36  ;;  %v1924_v45 = vshrl.u32 %v7776_v42, %v1923_v25 }
 0x1db   :  { %v5245_v33 = vpop.eup %5244  ;;  %v448_v16 = vxor.u32 2147483648, %v5243_v49  ;;  %v531_v47 = vor.u32 4788187, %v530_v12  ;;  %vm1940_vm12 = vcmp.lt.s32.totalorder %v6719_v4, 1  ;;  %v534_v40 = vcvt.s32.f32 %v527_v38 }
 0x1dc   :  { %v445_v60 = vxor.u32 2147483648, %v5245_v33  ;;  %v1939_v61 = vor.u32 %v1938_v35, %v1937_v30  ;;  %vm1943_vm6 = vcmp.lt.s32.totalorder %v6719_v4, 4  ;;  %v1948_v12 = vsel %vm1940_vm12, %v1927_v29, %v1930_v63 }
 0x1dd   :  { %v449_v58 = vsel %vm447_vm2, %v448_v16, %v5245_v33  ;;  %v532_v15 = vand.u32 2147483647, %v531_v47  ;;  %v1945_v21 = vsel %vm1943_vm6, %v1933_v39, 2102212464  ;;  %vm7877_vm9 = vcmp.eq.s32.totalorder %v6668_v62, 0 }
 0x1de   :  { %v446_v25 = vsel %vm7877_vm9, %v5243_v49, %v445_v60  ;;  %vm1941_vm8 = vcmp.lt.s32.totalorder %v6719_v4, 2  ;;  %vm1942_vm15 = vcmp.lt.s32.totalorder %v6719_v4, 3  ;;  %v1949_v30 = vsel %vm1943_vm6, %v1936_v52, 920167782 }
 0x1df   :  { %vm7878_vm11 = vcmp.lt.s32.totalorder %v6668_v62, 2  ;;  %v535_v47 = vmul.f32 %v534_v40, %v532_v15  ;;  %v1944_v38 = vsel %vm1940_vm12, %v1924_v45, %v1927_v29  ;;  %v1950_v35 = vsel %vm1942_vm15, %v1933_v39, %v1949_v30 }
 0x1e0   :  { %v450_v48 = vsel %vm7878_vm11, %v446_v25, %v449_v58  ;;  %vm7879_vm2 = vweird.f32 %v7855_v37  ;;  %v1946_v11 = vsel %vm1942_vm15, %v1930_v63, %v1945_v21  ;;  %v1951_v22 = vsel %vm1941_vm8, %v1948_v12, %v1950_v35 }
 0x1e1   :  { %v6766_v57 = vsel %vm7879_vm2, nan, %v450_v48  ;;  %v1952_v53 = vsel %vm1940_vm12, %v1930_v63, %v1933_v39  ;;  %v536_v6 = vxor.u32 2147483648, %v535_v47  ;;  %v1953_v62 = vsel %vm1943_vm6, %v1939_v61, 1326507024 }
 0x1e2   :  { %v6775_v40 = vmul.u32.u64.low %v6712_v50, %v1951_v22  ;;  %v6776_v58 = vmul.u32.u64.high %v6712_v50, %v1951_v22, %v6775_v40  ;;  %vm7880_vm11 = vcmp.eq.s32.totalorder %v6675_v34, 0  ;;  %vm7881_vm9 = vcmp.eq.s32.totalorder %v6675_v34, 2 }
 0x1e3   :  { %v2117_v29 = vsel %vm7880_vm11, %v5243_v49, %v445_v60  ;;  %v2120_v45 = vsel %vm7881_vm9, %v448_v16, %v5245_v33  ;;  %v1954_v15 = vsel %vm1942_vm15, %v1936_v52, %v1953_v62  ;;  %v4700_v21 = vadd.s32 4294967169, %v6721_v14 }
 0x1e4   :  { %vm7882_vm12 = vcmp.lt.s32.totalorder %v7847_v28, 0  ;;  %v1947_v39 = vsel %vm1941_vm8, %v1944_v38, %v1946_v11  ;;  %v1955_v22 = vsel %vm1941_vm8, %v1952_v53, %v1954_v15  ;;  %v1808_v61 = vshrl.u32 %v1807_v23, 23 }
 0x1e5   :  { %v537_v63 = vsel %vm7882_vm12, %v536_v6, %v535_v47  ;;  %v6794_v60 = vmul.u32.u64.low %v6712_v50, %v1955_v22  ;;  %v6795_v33 = vmul.u32.u64.high %v6712_v50, %v1955_v22, %v6794_v60  ;;  %v1710_v52 = vadd.s32 1, %v4700_v21 }
 0x1e6   :  { %v540_v49 = vsel %vm6637_vm10, %v7847_v28, %v537_v63  ;;  %vm7883_vm15 = vcmp.lt.s32.totalorder %v6675_v34, 2  ;;  %v1966_v14 = vadd.s32 1, %v6776_v58  ;;  %v4704_v11 = vadd.s32 4294967169, %v1808_v61 }
 0x1e7   :  { %5246 = vcosq.f32 %v540_v49  ;;  %v2121_v6 = vsel %vm7883_vm15, %v2117_v29, %v2120_v45  ;;  %v7884_v53 = vsub.s32 4, %v6339_v44  ;;  %vm7885_vm8 = vcmp.lt.s32.totalorder %v7856_v1, 0 }
 0x1e8   :  { %5248 = vsinq.f32 %v540_v49  ;;  %vm1711_vm10 = vcmp.gt.s32.totalorder %v1710_v52, 0  ;;  %v7886_v20 = vand.u32 2147483647, %v6694_v36  ;;  %v7887_v34 = vsub.s32 4, %v6487_v43 }
 0x1e9   :  { %v6805_v4 = vsel %vm7885_vm8, %v7884_v53, %v6339_v44  ;;  %vm7888_vm6 = vcmp.lt.s32.totalorder %v6287_v9, 0  ;;  %5250 = vcosq.f32 %v6699_v46  ;;  %v1712_v12 = vsel %vm1711_vm10, %v1710_v52, 0 }
 0x1ea   :  { %v6809_v23 = vand.u32 8388607, %v7886_v20  ;;  %v6816_v16 = vsel %vm7888_vm6, %v7887_v34, %v6487_v43  ;;  %v6822_v44 = vsel %vm5931_vm14, 0, %v6706_v10  ;;  %v6826_v30 = vsel %vm7879_vm2, nan, %v2121_v6  ;;  %v5184_v20 = vld [vmem:[%s7638_s5] sm:$0xff]   ;;  %v5185_v34 = vld [vmem:[%s7638_s5 + $0x8] sm:$0xff]  }
 0x1eb   :  { %v1963_v48 = vmul.u32 %v6712_v50, %v1947_v39  ;;  %vm1965_vm11 = vc.u32 %v6795_v33, %v6775_v40  ;;  %v1714_v47 = vand.u32 31, %v1712_v12  ;;  %vm551_vm9 = vcmp.eq.s32.totalorder %v6710_v56, 2  ;;  %4960 = vmatprep.subr.bf16.mxu1 %v5184_v20 }
 0x1ec   :  { %vm2221_vm12 = vcmp.eq.s32.totalorder %v6701_v31, 2  ;;  %v1967_v43 = vsel %vm1965_vm11, %v1966_v14, %v6776_v58  ;;  %v6834_v38 = vshrl.u32 %v1712_v12, 5  ;;  %v7890_v10 = vor.u32 8388608, %v6716_v54  ;;  %4961 = vmatpush3.bf16.msra.mxu1 %v5184_v20 }
 0x1ed   :  { %v6840_v37 = vadd.s32 1, %v4704_v11  ;;  %vm548_vm14 = vcmp.eq.s32.totalorder %v6710_v56, 0  ;;  %vm2218_vm15 = vcmp.eq.s32.totalorder %v6701_v31, 0  ;;  %v1968_v50 = vadd.s32 %v1967_v43, %v1963_v48  ;;  %4962 = vmatprep.subr.bf16.mxu1 %v5185_v34 }
 0x1ee   :  { %v6838_v35 = vshll.u32 %v7890_v10, 8  ;;  %v1715_v62 = vsub.s32 32, %v1714_v47  ;;  %v6846_v45 = vadd.s32 3, %v6822_v44  ;;  %v1717_v54 = vshll.u32 %v7776_v42, %v1714_v47 }
 0x1ef   :  { %v1720_v58 = vshll.u32 %v7781_v59, %v1714_v47  ;;  %v1723_v15 = vshll.u32 %v7774_v51, %v1714_v47  ;;  %v1726_v21 = vshll.u32 %v7775_v26, %v1714_v47  ;;  %v1969_v63 = vadd.s32 536870912, %v1968_v50 }
 0x1f0   :  { %v1718_v39 = vshrl.u32 %v7781_v59, %v1715_v62  ;;  %v1721_v22 = vshrl.u32 %v7774_v51, %v1715_v62  ;;  %v1729_v61 = vshll.u32 %v7791_v7, %v1714_v47  ;;  %v1724_v49 = vshrl.u32 %v7775_v26, %v1715_v62  ;;  %4963 = vmatpush3.bf16.msra.mxu1 %v5185_v34 }
 0x1f1   :  { %v1727_v60 = vshrl.u32 %v7791_v7, %v1715_v62  ;;  %v1730_v52 = vshrl.u32 %v7792_v3, %v1715_v62  ;;  %vm1732_vm11 = vcmp.lt.s32.totalorder %v6834_v38, 1  ;;  %v6863_v6 = vshrl.u32 %v1969_v63, 30  ;;  %v5247_v12 = vpop.eup %5246 }
 0x1f2   :  { %v1716_v14 = vshrl.u32 %v7776_v42, %v1715_v62  ;;  %v1719_v11 = vor.u32 %v1718_v39, %v1717_v54  ;;  %v1722_v53 = vor.u32 %v1721_v22, %v1720_v58  ;;  %v1725_v25 = vor.u32 %v1724_v49, %v1723_v15  ;;  %v5249_v47 = vpop.eup %5248 }
 0x1f3   :  { %v1728_v48 = vor.u32 %v1727_v60, %v1726_v21  ;;  %vm1733_vm2 = vcmp.lt.s32.totalorder %v6834_v38, 2  ;;  %vm1734_vm10 = vcmp.lt.s32.totalorder %v6834_v38, 3  ;;  %v552_v43 = vxor.u32 2147483648, %v5247_v12  ;;  %v6876_v54 = vpop.eup %5250  ;;  %v5186_v60 = vld [vmem:[%s7638_s5 + $0x10] sm:$0xff]  }
 0x1f4   :  { %v1971_v10 = vshll.u32 %v6863_v6, 30  ;;  %v1731_v62 = vor.u32 %v1730_v52, %v1729_v61  ;;  %vm1735_vm6 = vcmp.lt.s32.totalorder %v6834_v38, 4  ;;  %7891 = vst [vmem:[#allocation13_spill] sm:$0xff] %v6876_v54  ;;  %v549_v58 = vxor.u32 2147483648, %v5249_v47  ;;  %4964 = vmatprep.subr.bf16.mxu1 %v5186_v60 }
 0x1f5   :  { %vm1910_vm8 = vcmp.lt.s32.totalorder %v6642_v5, 0  ;;  %v1994_v15 = vsub.s32 4, %v6863_v6  ;;  %v1737_v21 = vsel %vm1735_vm6, %v1725_v25, 2102212464  ;;  %v1741_v63 = vsel %vm1735_vm6, %v1728_v48, 920167782  ;;  %4965 = vmatpush3.bf16.msra.mxu1 %v5186_v60 }
 0x1f6   :  { %v553_v39 = vsel %vm551_vm9, %v552_v43, %v5249_v47  ;;  %v2223_v22 = vsel %vm2221_vm12, %v552_v43, %v5249_v47  ;;  %v6888_v61 = vsub.s32 %v1968_v50, %v1971_v10  ;;  %v1740_v49 = vsel %vm1732_vm11, %v1719_v11, %v1722_v53 }
 0x1f7   :  { %v550_v52 = vsel %vm548_vm14, %v5247_v12, %v549_v58  ;;  %v2220_v20 = vsel %vm2218_vm15, %v5247_v12, %v549_v58  ;;  %v1736_v29 = vsel %vm1732_vm11, %v1716_v14, %v1719_v11  ;;  %v1742_v50 = vsel %vm1734_vm10, %v1725_v25, %v1741_v63 }
 0x1f8   :  { %vm7892_vm9 = vcmp.lt.s32.totalorder %v6710_v56, 2  ;;  %vm7893_vm12 = vcmp.lt.s32.totalorder %v6701_v31, 2  ;;  %v1974_v10 = vsub.s32 0, %v6888_v61  ;;  %v1738_v54 = vsel %vm1734_vm10, %v1722_v53, %v1737_v21 }
 0x1f9   :  { %v554_v47 = vsel %vm7892_vm9, %v550_v52, %v553_v39  ;;  %v2224_v43 = vsel %vm7893_vm12, %v2220_v20, %v2223_v22  ;;  %vm7894_vm14 = vweird.f32 %v7847_v28  ;;  %v1743_v11 = vsel %vm1733_vm2, %v1740_v49, %v1742_v50  ;;  %v5187_v28 = vld [vmem:[%s7638_s5 + $0x18] sm:$0xff]  }
 0x1fa   :  { %v6912_v12 = vsel %vm7894_vm14, nan, %v554_v47  ;;  %vm7895_vm15 = vmmov %vm7894_vm14  ;;  %v1744_v56 = vsel %vm1732_vm11, %v1722_v53, %v1725_v25  ;;  %v4709_v21 = vmin.u32 %v1974_v10, %v6888_v61  ;;  %v1745_v63 = vsel %vm1735_vm6, %v1731_v62, 1326507024  ;;  %4966 = vmatprep.subr.bf16.mxu1 %v5187_v28 }
 0x1fb   :  { %v2225_v14 = vsel %vm7895_vm15, nan, %v2224_v43  ;;  %5252 = vsinq.f32 %v6699_v46  ;;  %v1746_v53 = vsel %vm1734_vm10, %v1728_v48, %v1745_v63  ;;  %vm7896_vm11 = vcmask 523264   ;;  %4967 = vmatpush3.bf16.msra.mxu1 %v5187_v28 }
 0x1fc   :  { %v3668_v58 = vpack.c.bf16 %v2225_v14, %v6826_v30  ;;  %v6933_v34 = vmul.u32.u64.low %v6838_v35, %v1743_v11  ;;  %v6934_v25 = vmul.u32.u64.high %v6838_v35, %v1743_v11, %v6933_v34  ;;  %v1976_v30 = vclz %v4709_v21 }
 0x1fd   :  { %v1739_v62 = vsel %vm1733_vm2, %v1736_v29, %v1738_v54  ;;  %v1747_v39 = vsel %vm1733_vm2, %v1744_v56, %v1746_v53  ;;  %vm7897_vm6 = vcmp.gt.s32.totalorder %v6840_v37, 0  ;;  %v1964_v48 = vadd.s32 %v6775_v40, %v6795_v33  ;;  %v5188_v40 = vld [vmem:[%s7638_s5 + $0x20] sm:$0xff]  }
 0x1fe   :  { %4920 = vmatprep.mubr.msk.bf16.mxu0 %vm7896_vm11, %v3668_v58  ;;  %v1816_v46 = vsel %vm7897_vm6, %v6840_v37, 0  ;;  %v6948_v22 = vmul.u32.u64.low %v6838_v35, %v1747_v39  ;;  %v6949_v49 = vmul.u32.u64.high %v6838_v35, %v1747_v39, %v6948_v22  ;;  %v4710_v20 = vadd.s32 4294967294, %v1976_v30  ;;  %4968 = vmatprep.subr.bf16.mxu1 %v5188_v40  ;;  %v5189_v58 = vld [vmem:[%s7638_s5 + $0x28] sm:$0xff]  }
 0x1ff   :  { %v1818_v52 = vand.u32 31, %v1816_v46  ;;  %v6954_v29 = vsel %vm1910_vm8, %v1994_v15, %v6863_v6  ;;  %v7898_v38 = vor.u32 8388608, %v6809_v23  ;;  %v6961_v37 = vand.u32 3, %v6846_v45  ;;  %4969 = vmatpush3.bf16.msra.mxu1 %v5188_v40 }
 0x200   :  { %v1755_v33 = vmul.u32 %v6838_v35, %v1739_v62  ;;  %v1758_v60 = vadd.s32 1, %v6934_v25  ;;  %v6968_v50 = vshrl.u32 %v1816_v46, 5  ;;  %vm4711_vm10 = vcmp.lt.s32.totalorder %v4710_v20, 0  ;;  %4970 = vmatprep.subr.bf16.mxu1 %v5189_v58 }
 0x201   :  { %v6958_v54 = vshll.u32 %v7898_v38, 8  ;;  %v1819_v6 = vsub.s32 32, %v1818_v52  ;;  %v1821_v23 = vshll.u32 %v7776_v42, %v1818_v52  ;;  %v1824_v15 = vshll.u32 %v7781_v59, %v1818_v52 }
 0x202   :  { %v1827_v45 = vshll.u32 %v7774_v51, %v1818_v52  ;;  %v1979_v47 = vsel %vm4711_vm10, 0, %v4710_v20  ;;  %vm1757_vm2 = vc.u32 %v6949_v49, %v6933_v34  ;;  %v1830_v43 = vshll.u32 %v7775_v26, %v1818_v52 }
 0x203   :  { %v1833_v35 = vshll.u32 %v7791_v7, %v1818_v52  ;;  %v1980_v10 = vsub.s32 32, %v1979_v47  ;;  %v1981_v14 = vshll.u32 %v6888_v61, %v1979_v47  ;;  %v1984_v11 = vsub.s32 4294967266, %v1979_v47  ;;  %4971 = vmatpush3.bf16.msra.mxu1 %v5189_v58 }
 0x204   :  { %v1759_v56 = vsel %vm1757_vm2, %v1758_v60, %v6934_v25  ;;  %v1822_v63 = vshrl.u32 %v7781_v59, %v1819_v6  ;;  %v1825_v53 = vshrl.u32 %v7774_v51, %v1819_v6  ;;  %v1828_v30 = vshrl.u32 %v7775_v26, %v1819_v6 }
 0x205   :  { %v1760_v21 = vadd.s32 %v1759_v56, %v1755_v33  ;;  %v1982_v62 = vshrl.u32 %v1964_v48, %v1980_v10  ;;  %v1985_v28 = vadd.s32 127, %v1984_v11  ;;  %v1831_v39 = vshrl.u32 %v7791_v7, %v1819_v6  ;;  %v6987_v46 = vpop.eup %5252  ;;  %v7899_v33 = vld [vmem:[#allocation36_spill] sm:$0xff] }
 0x206   :  { %v1834_v61 = vshrl.u32 %v7792_v3, %v1819_v6  ;;  %v1823_v22 = vor.u32 %v1822_v63, %v1821_v23  ;;  %v1826_v52 = vor.u32 %v1825_v53, %v1824_v15  ;;  %v1829_v20 = vor.u32 %v1828_v30, %v1827_v45 }
 0x207   :  { %v1761_v25 = vadd.s32 536870912, %v1760_v21  ;;  %vm652_vm9 = vcmp.eq.s32.totalorder %v6961_v37, 0  ;;  %v1983_v59 = vor.u32 %v1982_v62, %v1981_v14  ;;  %v1986_v38 = vshll.u32 %v1985_v28, 23 }
 0x208   :  { %v1832_v51 = vor.u32 %v1831_v39, %v1830_v43  ;;  %v653_v26 = vxor.u32 2147483648, %v7899_v33  ;;  %v1820_v7 = vshrl.u32 %v7776_v42, %v1819_v6  ;;  %v1835_v60 = vor.u32 %v1834_v61, %v1833_v35 }
 0x209   :  { %v1762_v48 = vshrl.u32 %v1761_v25, 30  ;;  %vm1836_vm12 = vcmp.lt.s32.totalorder %v6968_v50, 1  ;;  %vm655_vm14 = vcmp.eq.s32.totalorder %v6961_v37, 2  ;;  %v1987_v3 = vor.u32 4788187, %v1986_v38 }
 0x20a   :  { %vm1837_vm15 = vcmp.lt.s32.totalorder %v6968_v50, 2  ;;  %vm1838_vm11 = vcmp.lt.s32.totalorder %v6968_v50, 3  ;;  %vm1839_vm6 = vcmp.lt.s32.totalorder %v6968_v50, 4  ;;  %v1840_v23 = vsel %vm1836_vm12, %v1820_v7, %v1823_v22 }
 0x20b   :  { %v1763_v40 = vshll.u32 %v1762_v48, 30  ;;  %v1841_v42 = vsel %vm1839_vm6, %v1829_v20, 2102212464  ;;  %v1844_v6 = vsel %vm1836_vm12, %v1823_v22, %v1826_v52  ;;  %v7900_v15 = vand.u32 2147483647, %v6642_v5 }
 0x20c   :  { %v1988_v47 = vand.u32 2147483647, %v1987_v3  ;;  %v1990_v43 = vcvt.s32.f32 %v1983_v59  ;;  %v1842_v35 = vsel %vm1838_vm11, %v1826_v52, %v1841_v42  ;;  %v1845_v10 = vsel %vm1839_vm6, %v1832_v51, 920167782 }
 0x20d   :  { %vm7006_vm2 = vcmp.le.f32.partialorder %v7900_v15, 0.7853982  ;;  %v7014_v14 = vsub.s32 %v1760_v21, %v1763_v40  ;;  %v1786_v11 = vsub.s32 4, %v1762_v48  ;;  %v1846_v56 = vsel %vm1838_vm11, %v1829_v20, %v1845_v10 }
 0x20e   :  { %v1848_v58 = vsel %vm1836_vm12, %v1826_v52, %v1829_v20  ;;  %vm648_vm10 = vweird.f32 %v7873_v13  ;;  %v1991_v63 = vmul.f32 %v1990_v43, %v1988_v47  ;;  %v1843_v53 = vsel %vm1837_vm15, %v1840_v23, %v1842_v35  ;;  %v7903_v52 = vld [vmem:[#allocation33_spill] sm:$0xff] }
 0x20f   :  { %v1847_v30 = vsel %vm1837_vm15, %v1844_v6, %v1846_v56  ;;  %v1849_v21 = vsel %vm1839_vm6, %v1835_v60, 1326507024  ;;  %v1766_v62 = vsub.s32 0, %v7014_v14  ;;  %v654_v20 = vsel %vm652_vm9, %v7903_v52, %v653_v26  ;;  %v7904_v60 = vld [vmem:[#allocation24_spill] sm:$0xff] }
 0x210   :  { %v1850_v28 = vsel %vm1838_vm11, %v1832_v51, %v1849_v21  ;;  %v7031_v39 = vmul.u32.u64.low %v6958_v54, %v1847_v30  ;;  %v7032_v61 = vmul.u32.u64.high %v6958_v54, %v1847_v30, %v7031_v39  ;;  %v1992_v25 = vxor.u32 2147483648, %v1991_v63 }
 0x211   :  { %v1851_v22 = vsel %vm1837_vm15, %v1848_v58, %v1850_v28  ;;  %v656_v59 = vxor.u32 2147483648, %v7903_v52  ;;  %v4701_v38 = vmin.u32 %v1766_v62, %v7014_v14  ;;  %v749_v40 = vsel %vm5882_vm7, 0, %v7904_v60  ;;  %v7907_v58 = vld [vmem:[#allocation30_spill] sm:$0xff] }
 0x212   :  { %v7045_v51 = vmul.u32.u64.low %v6958_v54, %v1851_v22  ;;  %v7046_v7 = vmul.u32.u64.high %v6958_v54, %v1851_v22, %v7045_v51  ;;  %v1993_v50 = vsel %vm1910_vm8, %v1992_v25, %v1991_v63  ;;  %vm651_vm12 = vcmp.lt.s32.totalorder %v6961_v37, 2 }
 0x213   :  { %v657_v23 = vsel %vm655_vm14, %v656_v59, %v7899_v33  ;;  %v753_v42 = vadd.s32 3, %v749_v40  ;;  %v1756_v6 = vadd.s32 %v6933_v34, %v6949_v49  ;;  %v1768_v15 = vclz %v4701_v38  ;;  %v7908_v34 = vld [vmem:[#allocation9_spill] sm:$0xff]  ;;  %v7910_v38 = vld [vmem:[#allocation16_spill] sm:$0xff] }
 0x214   :  { %v1862_v47 = vadd.s32 1, %v7032_v61  ;;  %v658_v43 = vsel %vm651_vm12, %v654_v20, %v657_v23  ;;  %vm7906_vm9 = vcmp.lt.s32.totalorder %v6666_v19, 0  ;;  %v1859_v10 = vmul.u32 %v6958_v54, %v1843_v53 }
 0x215   :  { %v7062_v35 = vsel %vm7906_vm9, %v1786_v11, %v1762_v48  ;;  %v754_v56 = vand.u32 3, %v753_v42  ;;  %v757_v63 = vxor.u32 2147483648, %v7907_v58  ;;  %v1996_v37 = vsel %vm7006_vm2, %v6642_v5, %v1993_v50  ;;  %v7909_v11 = vld [vmem:[#allocation29_spill] sm:$0xff] }
 0x216   :  { %v4702_v30 = vadd.s32 4294967294, %v1768_v15  ;;  %vm1861_vm7 = vc.u32 %v7046_v7, %v7031_v39  ;;  %vm752_vm8 = vweird.f32 %v7908_v34  ;;  %v7075_v48 = vsel %vm648_vm10, nan, %v658_v43 }
 0x217   :  { %v1863_v49 = vsel %vm1861_vm7, %v1862_v47, %v7032_v61  ;;  %vm755_vm14 = vcmp.lt.s32.totalorder %v754_v56, 2  ;;  %vm756_vm15 = vcmp.eq.s32.totalorder %v754_v56, 0  ;;  %vm759_vm6 = vcmp.eq.s32.totalorder %v754_v56, 2  ;;  %v7931_v56 = vld [vmem:[#allocation42_spill] sm:$0xff] }
 0x218   :  { %vm4703_vm11 = vcmp.lt.s32.totalorder %v4702_v30, 0  ;;  %v1864_v54 = vadd.s32 %v1863_v49, %v1859_v10  ;;  %v760_v53 = vxor.u32 2147483648, %v7909_v11  ;;  %v758_v62 = vsel %vm756_vm15, %v7909_v11, %v757_v63 }
 0x219   :  { %v1771_v21 = vsel %vm4703_vm11, 0, %v4702_v30  ;;  %v2319_v28 = vand.u32 3, %v6822_v44  ;;  %v2422_v25 = vand.u32 3, %v749_v40  ;;  %v850_v51 = vsub.s32 4, %v7910_v38 }
 0x21a   :  { %v1772_v22 = vsub.s32 32, %v1771_v21  ;;  %v1776_v20 = vsub.s32 4294967266, %v1771_v21  ;;  %v1865_v61 = vadd.s32 536870912, %v1864_v54  ;;  %v1773_v60 = vshll.u32 %v7014_v14, %v1771_v21 }
 0x21b   :  { %v761_v3 = vsel %vm759_vm6, %v760_v53, %v7907_v58  ;;  %vm2321_vm12 = vcmp.eq.s32.totalorder %v2319_v28, 0  ;;  %vm2324_vm9 = vcmp.eq.s32.totalorder %v2319_v28, 2  ;;  %vm1806_vm7 = vcmp.lt.s32.totalorder %v6694_v36, 0 }
 0x21c   :  { %v1774_v50 = vshrl.u32 %v1756_v6, %v1772_v22  ;;  %v1777_v23 = vadd.s32 127, %v1776_v20  ;;  %v1866_v42 = vshrl.u32 %v1865_v61, 30  ;;  %v762_v15 = vsel %vm755_vm14, %v758_v62, %v761_v3  ;;  %v7914_v22 = vld [vmem:[#allocation11_spill] sm:$0xff] }
 0x21d   :  { %v7087_v44 = vsel %vm752_vm8, nan, %v762_v15  ;;  %vm2320_vm15 = vcmp.lt.s32.totalorder %v2319_v28, 2  ;;  %v2323_v14 = vsel %vm2321_vm12, %v7903_v52, %v653_v26  ;;  %v2326_v40 = vsel %vm2324_vm9, %v656_v59, %v7899_v33  ;;  %v7919_v15 = vld [vmem:[#allocation39_spill] sm:$0xff] }
 0x21e   :  { %v1775_v47 = vor.u32 %v1774_v50, %v1773_v60  ;;  %v1778_v43 = vshll.u32 %v1777_v23, 23  ;;  %v1867_v6 = vshll.u32 %v1866_v42, 30  ;;  %vm2423_vm11 = vcmp.lt.s32.totalorder %v2422_v25, 2 }
 0x21f   :  { %v1890_v10 = vsub.s32 4, %v1866_v42  ;;  %v2327_v30 = vsel %vm2320_vm15, %v2323_v14, %v2326_v40  ;;  %vm2424_vm14 = vcmp.eq.s32.totalorder %v2422_v25, 0  ;;  %vm2427_vm6 = vcmp.eq.s32.totalorder %v2422_v25, 2  ;;  %v5181_v40 = vld [vmem:[%s7636_s3 + $0x8] sm:$0xff]  }
 0x220   :  { %v1779_v49 = vor.u32 4788187, %v1778_v43  ;;  %v1782_v21 = vcvt.s32.f32 %v1775_v47  ;;  %v7095_v62 = vsub.s32 %v1864_v54, %v1867_v6  ;;  %v7911_v28 = vand.u32 2147483647, %v6666_v19 }
 0x221   :  { %v2328_v33 = vsel %vm648_vm10, nan, %v2327_v30  ;;  %v2426_v52 = vsel %vm2424_vm14, %v7909_v11, %v757_v63  ;;  %v2429_v59 = vsel %vm2427_vm6, %v760_v53, %v7907_v58  ;;  %vm7915_vm9 = vcmp.lt.s32.totalorder %v7914_v22, 0  ;;  %v7917_v63 = vld [vmem:[#allocation32_spill] sm:$0xff]  ;;  %v7918_v58 = vld [vmem:[#allocation31_spill] sm:$0xff] }
 0x222   :  { %vm7099_vm12 = vcmp.le.f32.partialorder %v7911_v28, 0.7853982  ;;  %v851_v20 = vsel %vm7915_vm9, %v850_v51, %v7910_v38  ;;  %v1780_v54 = vand.u32 2147483647, %v1779_v49  ;;  %v1870_v61 = vsub.s32 0, %v7095_v62  ;;  %v7922_v49 = vld [vmem:[#allocation14_spill] sm:$0xff] }
 0x223   :  { %v2430_v60 = vsel %vm2423_vm11, %v2426_v52, %v2429_v59  ;;  %v7114_v50 = vsel %vm5908_vm13, 0, %v851_v20  ;;  %5254 = vcosq.f32 %v1996_v37  ;;  %v7742_v11 = vxor.u32 2147483648, %v7917_v63 }
 0x224   :  { %v2431_v13 = vsel %vm752_vm8, nan, %v2430_v60  ;;  %v7741_v53 = vxor.u32 2147483648, %v7918_v58  ;;  %v1783_v23 = vmul.f32 %v1782_v21, %v1780_v54  ;;  %v4705_v38 = vmin.u32 %v1870_v61, %v7095_v62  ;;  %v7926_v61 = vld [vmem:[#allocation47_spill] sm:$0xff] }
 0x225   :  { %v3669_v51 = vpack.c.bf16 %v2431_v13, %v2328_v33  ;;  %v7124_v25 = vsel %vm6165_vm1, 0, %v7919_v15  ;;  %5256 = vsinq.f32 %v1996_v37  ;;  %v1860_v34 = vadd.s32 %v7031_v39, %v7046_v7  ;;  %v7923_v33 = vld [vmem:[#allocation44_spill] sm:$0xff] }
 0x226   :  { %v7133_v47 = vsel %vm1806_vm7, %v1890_v10, %v1866_v42  ;;  %v2525_v43 = vand.u32 3, %v7114_v50  ;;  %v1784_v6 = vxor.u32 2147483648, %v1783_v23  ;;  %v1872_v30 = vclz %v4705_v38  ;;  %v5182_v10 = vld [vmem:[%s7636_s3 + $0x10] sm:$0xff]   ;;  %v7928_v38 = vld [vmem:[#allocation21_spill] sm:$0xff] }
 0x227   :  { %vm7921_vm13 = vcmask 523264   ;;  %v7740_v21 = vxor.u32 2147483648, %v7922_v49  ;;  %v2628_v28 = vand.u32 3, %v7124_v25  ;;  %v7739_v52 = vxor.u32 2147483648, %v7923_v33 }
 0x228   :  { %4921 = vmatmul.mubr.msk.bf16.vlgmr.msra.gmra.mrb[0].mxu0 %vm7921_vm13, %v3669_v51  ;;  %vm2526_vm1 = vcmp.lt.s32.totalorder %v2525_v43, 2  ;;  %vm2527_vm10 = vcmp.eq.s32.totalorder %v2525_v43, 0  ;;  %vm2530_vm8 = vcmp.eq.s32.totalorder %v2525_v43, 2  ;;  %vm7924_vm15 = vcmp.lt.s32.totalorder %v6666_v19, 0 }
 0x229   :  { %4937 = vmatpush3.bf16.msra.mxu0 %v6623_v55  ;;  %v1785_v39 = vsel %vm7924_vm15, %v1784_v6, %v1783_v23  ;;  %v4706_v7 = vadd.s32 4294967294, %v1872_v30  ;;  %v2529_v37 = vsel %vm2527_vm10, %v7918_v58, %v7742_v11  ;;  %v2532_v42 = vsel %vm2530_vm8, %v7741_v53, %v7917_v63  ;;  %v7925_v55 = vld [vmem:[#allocation19_spill] sm:$0xff] }
 0x22a   :  { %4938 = vmatprep.subr.bf16.mxu0 %v5181_v40  ;;  %vm856_vm11 = vweird.f32 %v7914_v22  ;;  %vm960_vm14 = vweird.f32 %v7925_v55  ;;  %v2533_v59 = vsel %vm2526_vm1, %v2529_v37, %v2532_v42  ;;  %vm2630_vm6 = vcmp.eq.s32.totalorder %v2628_v28, 0  ;;  %v5183_v6 = vld [vmem:[%s7636_s3 + $0x18] sm:$0xff]   ;;  %v7930_v37 = vld [vmem:[#allocation22_spill] sm:$0xff] }
 0x22b   :  { %v1788_v20 = vsel %vm7099_vm12, %v6666_v19, %v1785_v39  ;;  %vm4707_vm9 = vcmp.lt.s32.totalorder %v4706_v7, 0  ;;  %v2632_v54 = vsel %vm2630_vm6, %v7923_v33, %v7740_v21  ;;  %v7163_v3 = vsel %vm6261_vm4, 0, %v7926_v61  ;;  %v7932_v53 = vld [vmem:[#allocation15_spill] sm:$0xff] }
 0x22c   :  { %v1875_v13 = vsel %vm4707_vm9, 0, %v4706_v7  ;;  %v2534_v23 = vsel %vm856_vm11, nan, %v2533_v59  ;;  %vm2629_vm13 = vcmp.lt.s32.totalorder %v2628_v28, 2  ;;  %vm2633_vm1 = vcmp.eq.s32.totalorder %v2628_v28, 2  ;;  %v7929_v7 = vld [vmem:[#allocation12_spill] sm:$0xff] }
 0x22d   :  { %vm1064_vm10 = vweird.f32 %v7928_v38  ;;  %4939 = vmatpush3.bf16.msra.mxu0 %v5181_v40  ;;  %v1876_v51 = vsub.s32 32, %v1875_v13  ;;  %v1880_v15 = vsub.s32 4294967266, %v1875_v13  ;;  %v2635_v14 = vsel %vm2633_vm1, %v7739_v52, %v7922_v49  ;;  %v7175_v30 = vpop.eup %5254 }
 0x22e   :  { %v7750_v43 = vxor.u32 2147483648, %v6374_v18  ;;  %4940 = vmatprep.subr.bf16.mxu0 %v5182_v10  ;;  %v1877_v28 = vshll.u32 %v7095_v62, %v1875_v13  ;;  %v2636_v39 = vsel %vm2629_vm13, %v2632_v54, %v2635_v14  ;;  %v7748_v40 = vxor.u32 2147483648, %v7929_v7  ;;  %v7934_v62 = vld [vmem:[#allocation41_spill] sm:$0xff] }
 0x22f   :  { %v1162_v42 = vsub.s32 4, %v7930_v37  ;;  %v1878_v59 = vshrl.u32 %v1860_v34, %v1876_v51  ;;  %v1881_v61 = vadd.s32 127, %v1880_v15  ;;  %v2637_v60 = vsel %vm960_vm14, nan, %v2636_v39  ;;  %v7183_v52 = vpop.eup %5256 }
 0x230   :  { %v7747_v31 = vxor.u32 2147483648, %v7931_v56  ;;  %v3670_v21 = vpack.c.bf16 %v2637_v60, %v2534_v23  ;;  %vm7933_vm4 = vcmp.lt.s32.totalorder %v7932_v53, 0  ;;  %v7745_v54 = vxor.u32 2147483648, %v7934_v62 }
 0x231   :  { %v1163_v11 = vsel %vm7933_vm4, %v1162_v42, %v7930_v37  ;;  %v2731_v13 = vand.u32 3, %v7163_v3  ;;  %4941 = vmatpush3.bf16.msra.mxu0 %v5182_v10  ;;  %v1879_v14 = vor.u32 %v1878_v59, %v1877_v28  ;;  %v1882_v34 = vshll.u32 %v1881_v61, 23 }
 0x232   :  { %v7192_v15 = vsel %vm6095_vm5, 0, %v1163_v11  ;;  %v7197_v39 = vsel %vm6418_vm3, 0, %v6469_v2  ;;  %4942 = vmatprep.subr.bf16.mxu0 %v5183_v6  ;;  %vm7936_vm8 = vcmask 523264   ;;  %v7937_v10 = vand.u32 2147483647, %v6694_v36 }
 0x233   :  { %4924 = vmatprep.mubr.msk.bf16.mxu0 %vm7936_vm8, %v3670_v21  ;;  %vm2732_vm15 = vcmp.lt.s32.totalorder %v2731_v13, 2  ;;  %vm2733_vm6 = vcmp.eq.s32.totalorder %v2731_v13, 0  ;;  %vm2736_vm9 = vcmp.eq.s32.totalorder %v2731_v13, 2  ;;  %v2834_v23 = vand.u32 3, %v7192_v15 }
 0x234   :  { %vm7203_vm13 = vcmp.le.f32.partialorder %v7937_v10, 0.7853982  ;;  %v1883_v11 = vor.u32 4788187, %v1882_v34  ;;  %v1886_v37 = vcvt.s32.f32 %v1879_v14  ;;  %v2735_v0 = vsel %vm2733_vm6, %v7929_v7, %v7750_v43 }
 0x235   :  { %v2738_v2 = vsel %vm2736_vm9, %v7748_v40, %v6374_v18  ;;  %vm2835_vm5 = vcmp.lt.s32.totalorder %v2834_v23, 2  ;;  %vm2836_vm3 = vcmp.eq.s32.totalorder %v2834_v23, 0  ;;  %vm2839_vm1 = vcmp.eq.s32.totalorder %v2834_v23, 2  ;;  %4943 = vmatpush3.bf16.msra.mxu0 %v5183_v6  ;;  %v7940_v23 = vld [vmem:[#allocation35_spill] sm:$0xff] }
 0x236   :  { %v2739_v21 = vsel %vm2732_vm15, %v2735_v0, %v2738_v2  ;;  %v1884_v42 = vand.u32 2147483647, %v1883_v11  ;;  %v2838_v61 = vsel %vm2836_vm3, %v7934_v62, %v7747_v31  ;;  %v2841_v60 = vsel %vm2839_vm1, %v7745_v54, %v7931_v56 }
 0x237   :  { %v2740_v59 = vsel %vm1064_vm10, nan, %v2739_v21  ;;  %5258 = vcosq.f32 %v1788_v20  ;;  %vm7752_vm4 = vweird.f32 %v7932_v53  ;;  %v2842_v13 = vsel %vm2835_vm5, %v2838_v61, %v2841_v60  ;;  %v7941_v21 = vld [vmem:[#allocation27_spill] sm:$0xff] }
 0x238   :  { %v7744_v14 = vxor.u32 2147483648, %v6632_v41  ;;  %v1887_v34 = vmul.f32 %v1886_v37, %v1884_v42  ;;  %v2843_v6 = vsel %vm7752_vm4, nan, %v2842_v13  ;;  %v7743_v51 = vxor.u32 2147483648, %v6625_v27 }
 0x239   :  { %v1370_v10 = vsub.s32 4, %v7940_v23  ;;  %5260 = vsinq.f32 %v1788_v20  ;;  %v3671_v11 = vpack.c.bf16 %v2843_v6, %v2740_v59  ;;  %vm1272_vm8 = vweird.f32 %v5988_v8 }
 0x23a   :  { %v2937_v0 = vand.u32 3, %v7197_v39  ;;  %v1888_v2 = vxor.u32 2147483648, %v1887_v34  ;;  %vm7942_vm15 = vcmp.lt.s32.totalorder %v7941_v21, 0  ;;  %v7746_v37 = vxor.u32 2147483648, %v6524_v32 }
 0x23b   :  { %v1371_v61 = vsel %vm7942_vm15, %v1370_v10, %v7940_v23  ;;  %v7749_v42 = vxor.u32 2147483648, %v6384_v17  ;;  %vm7943_vm6 = vcmask 523264   ;;  %v7976_v38 = vxor.u32 2147483648, %v6625_v27 }
 0x23c   :  { %4925 = vmatmul.mubr.msk.bf16.gmra.mrb[4].mxu0 %vm7943_vm6, %v3671_v11  ;;  %v7237_v13 = vsel %vm6280_vm0, 0, %v1371_v61  ;;  %vm2938_vm9 = vcmp.lt.s32.totalorder %v2937_v0, 2  ;;  %vm2939_vm5 = vcmp.eq.s32.totalorder %v2937_v0, 0  ;;  %vm2942_vm3 = vcmp.eq.s32.totalorder %v2937_v0, 2  ;;  %v7945_v0 = vld [vmem:[#allocation10_spill] sm:$0xff]  ;;  %v7948_v61 = vld [vmem:[#allocation8_spill] sm:$0xff] }
 0x23d   :  { %v1889_v20 = vsel %vm1806_vm7, %v1888_v2, %v1887_v34  ;;  %v2941_v59 = vsel %vm2939_vm5, %v6625_v27, %v7744_v14  ;;  %v2944_v6 = vsel %vm2942_vm3, %v7743_v51, %v6632_v41  ;;  %v3040_v23 = vand.u32 3, %v7237_v13  ;;  %v7947_v2 = vld [vmem:[#allocation34_spill] sm:$0xff] }
 0x23e   :  { %v1892_v10 = vsel %vm7203_vm13, %v6694_v36, %v1889_v20  ;;  %vm7751_vm0 = vweird.f32 %v7941_v21  ;;  %v2945_v11 = vsel %vm2938_vm9, %v2941_v59, %v2944_v6  ;;  %vm7946_vm7 = vnez %v7945_v0  ;;  %v7949_v20 = vld [vmem:[#allocation23_spill] sm:$0xff]  ;;  %v7951_v0 = vld [vmem:[#allocation18_spill] sm:$0xff] }
 0x23f   :  { %v7255_v34 = vsel %vm7946_vm7, 0, %v6599_v24  ;;  %5262 = vcosq.f32 %v1892_v10  ;;  %vm3042_vm1 = vcmp.eq.s32.totalorder %v3040_v23, 0  ;;  %vm1480_vm15 = vweird.f32 %v7947_v2 }
 0x240   :  { %v7753_v60 = vxor.u32 2147483648, %v7948_v61  ;;  %5264 = vsinq.f32 %v1892_v10  ;;  %v3044_v51 = vsel %vm3042_vm1, %v6384_v17, %v7746_v37  ;;  %vm3045_vm6 = vcmp.eq.s32.totalorder %v3040_v23, 2  ;;  %v7952_v37 = vld [vmem:[#allocation20_spill] sm:$0xff] }
 0x241   :  { %vm7950_vm9 = vnez %v7949_v20  ;;  %v2946_v24 = vsel %vm1272_vm8, nan, %v2945_v11  ;;  %vm3041_vm5 = vcmp.lt.s32.totalorder %v3040_v23, 2  ;;  %v3047_v6 = vsel %vm3045_vm6, %v7749_v42, %v6524_v32  ;;  %v7273_v14 = vpop.eup %5258  ;;  %v7953_v23 = vld [vmem:[#allocation38_spill] sm:$0xff]  ;;  %v7954_v42 = vld [vmem:[#allocation17_spill] sm:$0xff] }
 0x242   :  { %v7265_v59 = vsel %vm7950_vm9, 0, %v6805_v4  ;;  %v3048_v54 = vsel %vm3041_vm5, %v3044_v51, %v3047_v6  ;;  %v7754_v31 = vxor.u32 2147483648, %v7952_v37  ;;  %v3143_v40 = vand.u32 3, %v7255_v34 }
 0x243   :  { %v3246_v4 = vand.u32 3, %v7265_v59  ;;  %v3049_v20 = vsel %vm7751_vm0, nan, %v3048_v54  ;;  %vm1584_vm3 = vweird.f32 %v7856_v1  ;;  %vm7955_vm7 = vnez %v7954_v42  ;;  %v7287_v10 = vpop.eup %5260 }
 0x244   :  { %v7285_v43 = vsel %vm7955_vm7, 0, %v6816_v16  ;;  %v3672_v51 = vpack.c.bf16 %v3049_v20, %v2946_v24  ;;  %vm3145_vm1 = vcmp.eq.s32.totalorder %v3143_v40, 0  ;;  %vm3148_vm6 = vcmp.eq.s32.totalorder %v3143_v40, 2 }
 0x245   :  { %vm1688_vm9 = vweird.f32 %v6287_v9  ;;  %vm3144_vm5 = vcmp.lt.s32.totalorder %v3143_v40, 2  ;;  %v3147_v54 = vsel %vm3145_vm1, %v7951_v0, %v7753_v60  ;;  %v7956_v11 = vxor.u32 2147483648, %v7951_v0 }
 0x246   :  { %vm3248_vm7 = vcmp.eq.s32.totalorder %v3246_v4, 0  ;;  %vm7957_vm0 = vcmask 523264   ;;  %vm3251_vm4 = vcmp.eq.s32.totalorder %v3246_v4, 2  ;;  %v7304_v40 = vsel %vm7099_vm12, 0, %v7062_v35 }
 0x247   :  { %v3150_v42 = vsel %vm3148_vm6, %v7956_v11, %v7948_v61  ;;  %4928 = vmatprep.mubr.msk.bf16.mxu0 %vm7957_vm0, %v3672_v51  ;;  %v3250_v24 = vsel %vm3248_vm7, %v7953_v23, %v7754_v31  ;;  %vm3247_vm1 = vcmp.lt.s32.totalorder %v3246_v4, 2  ;;  %v7958_v11 = vxor.u32 2147483648, %v7953_v23  ;;  %v7959_v51 = vld [vmem:[#allocation13_spill] sm:$0xff] }
 0x248   :  { %v3151_v16 = vsel %vm3144_vm5, %v3147_v54, %v3150_v42  ;;  %v7756_v54 = vxor.u32 2147483648, %v7959_v51  ;;  %v7757_v6 = vxor.u32 2147483648, %v7287_v10  ;;  %v3349_v31 = vand.u32 3, %v7285_v43 }
 0x249   :  { %v3152_v20 = vsel %vm1480_vm15, nan, %v3151_v16  ;;  %v3253_v60 = vsel %vm3251_vm4, %v7958_v11, %v7952_v37  ;;  %v3452_v0 = vand.u32 3, %v7304_v40  ;;  %v7315_v26 = vpop.eup %5262  ;;  %vm1792_vm12 = vweird.f32 %v6666_v19 }
 0x24a   :  { %v3254_v42 = vsel %vm3247_vm1, %v3250_v24, %v3253_v60  ;;  %v7324_v16 = vsel %vm7203_vm13, 0, %v7133_v47  ;;  %v7326_v60 = vpop.eup %5264  ;;  %vm3351_vm4 = vcmp.eq.s32.totalorder %v3349_v31, 0  ;;  %vm3354_vm0 = vcmp.eq.s32.totalorder %v3349_v31, 2 }
 0x24b   :  { %v3255_v35 = vsel %vm1584_vm3, nan, %v3254_v42  ;;  %vm7760_vm6 = vweird.f32 %v6694_v36  ;;  %v7332_v11 = vsel %vm7006_vm2, 0, %v6954_v29  ;;  %vm3350_vm5 = vcmp.lt.s32.totalorder %v3349_v31, 2 }
 0x24c   :  { %v3673_v24 = vpack.c.bf16 %v3255_v35, %v3152_v20  ;;  %v7960_v42 = vxor.u32 2147483648, %v6987_v46  ;;  %v3356_v47 = vsel %vm3354_vm0, %v7756_v54, %v6987_v46  ;;  %vm3454_vm13 = vcmp.eq.s32.totalorder %v3452_v0, 0 }
 0x24d   :  { %vm7961_vm7 = vcmask 523264   ;;  %vm3453_vm1 = vcmp.lt.s32.totalorder %v3452_v0, 2  ;;  %v3456_v45 = vsel %vm3454_vm13, %v7273_v14, %v7757_v6  ;;  %vm3457_vm2 = vcmp.eq.s32.totalorder %v3452_v0, 2 }
 0x24e   :  { %v3353_v4 = vsel %vm3351_vm4, %v7959_v51, %v7960_v42  ;;  %4929 = vmatmul.mubr.msk.bf16.gmra.mrb[8].mxu0 %vm7961_vm7, %v3673_v24  ;;  %v7962_v29 = vxor.u32 2147483648, %v7273_v14  ;;  %v1901_v35 = vxor.u32 2147483648, %v7326_v60  ;;  %v7759_v42 = vxor.u32 2147483648, %v7315_v26 }
 0x24f   :  { %v3357_v28 = vsel %vm3350_vm5, %v3353_v4, %v3356_v47  ;;  %v2005_v4 = vxor.u32 2147483648, %v7183_v52  ;;  %v7761_v24 = vxor.u32 2147483648, %v7175_v30  ;;  %v3555_v47 = vand.u32 3, %v7324_v16 }
 0x250   :  { %v3358_v31 = vsel %vm1688_vm9, nan, %v3357_v28  ;;  %v3459_v20 = vsel %vm3457_vm2, %v7962_v29, %v7287_v10  ;;  %v3658_v28 = vand.u32 3, %v7332_v11  ;;  %v857_v6 = vadd.s32 3, %v7114_v50 }
 0x251   :  { %v3460_v54 = vsel %vm3453_vm1, %v3456_v45, %v3459_v20  ;;  %v961_v29 = vadd.s32 3, %v7124_v25  ;;  %vm3556_vm4 = vcmp.lt.s32.totalorder %v3555_v47, 2  ;;  %vm3557_vm0 = vcmp.eq.s32.totalorder %v3555_v47, 0 }
 0x252   :  { %v3461_v0 = vsel %vm1792_vm12, nan, %v3460_v54  ;;  %vm3560_vm5 = vcmp.eq.s32.totalorder %v3555_v47, 2  ;;  %v3559_v45 = vsel %vm3557_vm0, %v7315_v26, %v1901_v35  ;;  %vm3659_vm13 = vcmp.lt.s32.totalorder %v3658_v28, 2 }
 0x253   :  { %v3674_v9 = vpack.c.bf16 %v3461_v0, %v3358_v31  ;;  %v3562_v20 = vsel %vm3560_vm5, %v7759_v42, %v7326_v60  ;;  %vm3660_vm7 = vcmp.eq.s32.totalorder %v3658_v28, 0  ;;  %vm7963_vm1 = vcmask 523264  }
 0x254   :  { %v3563_v54 = vsel %vm3556_vm4, %v3559_v45, %v3562_v20  ;;  %v3662_v50 = vsel %vm3660_vm7, %v7175_v30, %v2005_v4  ;;  %vm3663_vm2 = vcmp.eq.s32.totalorder %v3658_v28, 2  ;;  %v858_v25 = vand.u32 3, %v857_v6 }
 0x255   :  { %4932 = vmatprep.mubr.msk.bf16.mxu0 %vm7963_vm1, %v3674_v9  ;;  %v3564_v31 = vsel %vm7760_vm6, nan, %v3563_v54  ;;  %v3665_v47 = vsel %vm3663_vm2, %v7761_v24, %v7183_v52  ;;  %v962_v0 = vand.u32 3, %v961_v29  ;;  %v1065_v42 = vadd.s32 3, %v7163_v3 }
 0x256   :  { %vm2000_vm0 = vweird.f32 %v6642_v5  ;;  %v3666_v9 = vsel %vm3659_vm13, %v3662_v50, %v3665_v47  ;;  %vm860_vm4 = vcmp.eq.s32.totalorder %v858_v25, 0  ;;  %vm863_vm5 = vcmp.eq.s32.totalorder %v858_v25, 2  ;;  %v5192_v5 = vld [vmem:[%s7637_s4] sm:$0xff]  }
 0x257   :  { %v3667_v45 = vsel %vm2000_vm0, nan, %v3666_v9  ;;  %vm859_vm7 = vcmp.lt.s32.totalorder %v858_v25, 2  ;;  %v7964_v6 = vxor.u32 2147483648, %v7917_v63  ;;  %v7965_v20 = vxor.u32 2147483648, %v7918_v58 }
 0x258   :  { %v3675_v29 = vpack.c.bf16 %v3667_v45, %v3564_v31  ;;  %vm963_vm1 = vcmp.lt.s32.totalorder %v962_v0, 2  ;;  %vm964_vm2 = vcmp.eq.s32.totalorder %v962_v0, 0  ;;  %vm967_vm6 = vcmp.eq.s32.totalorder %v962_v0, 2 }
 0x259   :  { %v862_v28 = vsel %vm860_vm4, %v7918_v58, %v7964_v6  ;;  %v865_v54 = vsel %vm863_vm5, %v7965_v20, %v7917_v63  ;;  %v7966_v50 = vxor.u32 2147483648, %v7922_v49  ;;  %v7967_v25 = vxor.u32 2147483648, %v7923_v33 }
 0x25a   :  { %v866_v3 = vsel %vm859_vm7, %v862_v28, %v865_v54  ;;  %v1066_v24 = vand.u32 3, %v1065_v42  ;;  %vm7968_vm13 = vcmask 523264   ;;  %v1169_v58 = vadd.s32 3, %v7192_v15 }
 0x25b   :  { %v966_v47 = vsel %vm964_vm2, %v7923_v33, %v7966_v50  ;;  %v969_v9 = vsel %vm967_vm6, %v7967_v25, %v7922_v49  ;;  %4933 = vmatmul.mubr.msk.bf16.gmra.mrb[12].mxu0 %vm7968_vm13, %v3675_v29  ;;  %v1273_v63 = vadd.s32 3, %v7197_v39  ;;  %v1377_v31 = vadd.s32 3, %v7237_v13  ;;  %vm7970_vm4 = vmmov %vm7968_vm13 }
 0x25c   :  { %v970_v6 = vsel %vm963_vm1, %v966_v47, %v969_v9  ;;  %v7969_v0 = vpack.c.bf16 %v6912_v12, %v6766_v57  ;;  %vm1068_vm5 = vcmp.eq.s32.totalorder %v1066_v24, 0  ;;  %vm1071_vm6 = vcmp.eq.s32.totalorder %v1066_v24, 2 }
 0x25d   :  { %v971_v45 = vsel %vm960_vm14, nan, %v970_v6  ;;  %vm1067_vm7 = vcmp.lt.s32.totalorder %v1066_v24, 2  ;;  %v7971_v49 = vxor.u32 2147483648, %v6374_v18  ;;  %v7972_v15 = vxor.u32 2147483648, %v7929_v7 }
 0x25e   :  { %4944 = vmatprep.mubr.msk.bf16.mxu0 %vm7970_vm4, %v7969_v0  ;;  %v1170_v13 = vand.u32 3, %v1169_v58  ;;  %v867_v57 = vsel %vm856_vm11, nan, %v866_v3  ;;  %v1274_v42 = vand.u32 3, %v1273_v63  ;;  %v1378_v28 = vand.u32 3, %v1377_v31 }
 0x25f   :  { %v1070_v33 = vsel %vm1068_vm5, %v7929_v7, %v7971_v49  ;;  %v1073_v39 = vsel %vm1071_vm6, %v7972_v15, %v6374_v18  ;;  %v2014_v55 = vpack.c.bf16 %v971_v45, %v867_v57  ;;  %v1481_v24 = vadd.s32 3, %v7255_v34 }
 0x260   :  { %v1074_v12 = vsel %vm1067_vm7, %v1070_v33, %v1073_v39  ;;  %vm1172_vm14 = vcmp.eq.s32.totalorder %v1170_v13, 0  ;;  %vm1175_vm1 = vcmp.eq.s32.totalorder %v1170_v13, 2  ;;  %v7973_v54 = vxor.u32 2147483648, %v7931_v56  ;;  %v7985_v33 = vld [vmem:[#allocation18_spill] sm:$0xff] }
 0x261   :  { %v1075_v20 = vsel %vm1064_vm10, nan, %v1074_v12  ;;  %v7974_v18 = vxor.u32 2147483648, %v7934_v62  ;;  %vm1276_vm11 = vcmp.eq.s32.totalorder %v1274_v42, 0  ;;  %vm1171_vm2 = vcmp.lt.s32.totalorder %v1170_v13, 2 }
 0x262   :  { %v1174_v7 = vsel %vm1172_vm14, %v7934_v62, %v7973_v54  ;;  %vm1275_vm13 = vcmp.lt.s32.totalorder %v1274_v42, 2  ;;  %v7975_v29 = vxor.u32 2147483648, %v6632_v41  ;;  %vm1279_vm4 = vcmp.eq.s32.totalorder %v1274_v42, 2 }
 0x263   :  { %v1177_v22 = vsel %vm1175_vm1, %v7974_v18, %v7931_v56  ;;  %v1281_v50 = vsel %vm1279_vm4, %v7976_v38, %v6632_v41  ;;  %vm1380_vm10 = vcmp.eq.s32.totalorder %v1378_v28, 0  ;;  %vm1383_vm5 = vcmp.eq.s32.totalorder %v1378_v28, 2 }
 0x264   :  { %v1278_v3 = vsel %vm1276_vm11, %v6625_v27, %v7975_v29  ;;  %v1178_v34 = vsel %vm1171_vm2, %v1174_v7, %v1177_v22  ;;  %v7977_v47 = vpack.c.bf16 %v7087_v44, %v7075_v48  ;;  %vm7978_vm6 = vcmask 523264  }
 0x265   :  { %v1282_v56 = vsel %vm1275_vm13, %v1278_v3, %v1281_v50  ;;  %vm1379_vm7 = vcmp.lt.s32.totalorder %v1378_v28, 2  ;;  %v7979_v62 = vxor.u32 2147483648, %v6524_v32  ;;  %v7980_v9 = vxor.u32 2147483648, %v6384_v17  ;;  %vm7981_vm14 = vmmov %vm7978_vm6 }
 0x266   :  { %4945 = vmatmul.mubr.msk.bf16.vlgmr.msra.gmra.mrb[0].mxu0 %vm7978_vm6, %v7977_v47  ;;  %v1283_v27 = vsel %vm1272_vm8, nan, %v1282_v56  ;;  %v1482_v58 = vand.u32 3, %v1481_v24  ;;  %v1585_v48 = vadd.s32 3, %v7265_v59  ;;  %vm7982_vm1 = vweird.f32 %v7932_v53 }
 0x267   :  { %v1382_v25 = vsel %vm1380_vm10, %v6384_v17, %v7979_v62  ;;  %v1385_v6 = vsel %vm1383_vm5, %v7980_v9, %v6524_v32  ;;  %4948 = vmatprep.mubr.msk.bf16.mxu0 %vm7981_vm14, %v2014_v55  ;;  %v1179_v44 = vsel %vm7982_vm1, nan, %v1178_v34  ;;  %v1689_v63 = vadd.s32 3, %v7285_v43 }
 0x268   :  { %v1386_v41 = vsel %vm1379_vm7, %v1382_v25, %v1385_v6  ;;  %v1793_v31 = vadd.s32 3, %v7304_v40  ;;  %v1897_v0 = vadd.s32 3, %v7324_v16  ;;  %v2015_v17 = vpack.c.bf16 %v1179_v44, %v1075_v20  ;;  %vm7989_vm7 = vmmov %vm7981_vm14 }
 0x269   :  { %vm7983_vm11 = vweird.f32 %v7941_v21  ;;  %vm1484_vm2 = vcmp.eq.s32.totalorder %v1482_v58, 0  ;;  %v1586_v8 = vand.u32 3, %v1585_v48  ;;  %v1690_v49 = vand.u32 3, %v1689_v63  ;;  %vm7991_vm1 = vmmov %vm7989_vm7 }
 0x26a   :  { %v1387_v32 = vsel %vm7983_vm11, nan, %v1386_v41  ;;  %vm1483_vm8 = vcmp.lt.s32.totalorder %v1482_v58, 2  ;;  %v7984_v59 = vxor.u32 2147483648, %v7948_v61  ;;  %vm1487_vm13 = vcmp.eq.s32.totalorder %v1482_v58, 2 }
 0x26b   :  { %v2016_v45 = vpack.c.bf16 %v1387_v32, %v1283_v27  ;;  %v1794_v15 = vand.u32 3, %v1793_v31  ;;  %v7986_v43 = vxor.u32 2147483648, %v7985_v33  ;;  %vm1588_vm4 = vcmp.eq.s32.totalorder %v1586_v8, 0 }
 0x26c   :  { %v1486_v53 = vsel %vm1484_vm2, %v7985_v33, %v7984_v59  ;;  %vm1591_vm10 = vcmp.eq.s32.totalorder %v1586_v8, 2  ;;  %v1898_v16 = vand.u32 3, %v1897_v0  ;;  %vm1587_vm5 = vcmp.lt.s32.totalorder %v1586_v8, 2  ;;  %v5193_v59 = vld [vmem:[%s7637_s4 + $0x8] sm:$0xff]   ;;  %s5266_s4 = scalar_lea.vmem %s4634_s27, 2048 }
 0x26d   :  { %v1489_v40 = vsel %vm1487_vm13, %v7986_v43, %v7948_v61  ;;  %v7987_v21 = vxor.u32 2147483648, %v7952_v37  ;;  %v7988_v13 = vxor.u32 2147483648, %v7953_v23  ;;  %vm1692_vm6 = vcmp.eq.s32.totalorder %v1690_v49, 0  ;;  %p5267_p0 = scmp.ne.s32.totalorder %s4634_s27, %s5266_s4  ;;  %p5272_p2 = scmp.lt.s32.totalorder %s5266_s4, %s5266_s4 }
 0x26e   :  { %4949 = vmatmul.mubr.msk.bf16.gmra.mrb[4].mxu0 %vm7989_vm7, %v2015_v17  ;;  %v7990_v42 = vxor.u32 2147483648, %v6987_v46  ;;  %vm1695_vm14 = vcmp.eq.s32.totalorder %v1690_v49, 2  ;;  %v2001_v28 = vadd.s32 3, %v7332_v11  ;;  %v1490_v55 = vsel %vm1483_vm8, %v1486_v53, %v1489_v40 }
 0x26f   :  { %v1590_v39 = vsel %vm1588_vm4, %v7953_v23, %v7987_v21  ;;  %v1593_v57 = vsel %vm1591_vm10, %v7988_v13, %v7952_v37  ;;  %4952 = vmatprep.mubr.msk.bf16.mxu0 %vm7991_vm1, %v2016_v45  ;;  %v7992_v24 = vxor.u32 2147483648, %v7959_v51  ;;  %vm1796_vm11 = vcmp.eq.s32.totalorder %v1794_v15, 0  ;;  %p5273_p3 = por %p5272_p2, %p5271_p1 }
 0x270   :  { %v1594_v12 = vsel %vm1587_vm5, %v1590_v39, %v1593_v57  ;;  %v1694_v61 = vsel %vm1692_vm6, %v7959_v51, %v7990_v42  ;;  %vm1799_vm2 = vcmp.eq.s32.totalorder %v1794_v15, 2  ;;  %vm1691_vm13 = vcmp.lt.s32.totalorder %v1690_v49, 2  ;;  %vm7999_vm6 = vmmov %vm7991_vm1 }
 0x271   :  { %v1697_v23 = vsel %vm1695_vm14, %v7992_v24, %v6987_v46  ;;  %vm1795_vm4 = vcmp.lt.s32.totalorder %v1794_v15, 2  ;;  %v7993_v37 = vxor.u32 2147483648, %v7287_v10  ;;  %v7994_v54 = vxor.u32 2147483648, %v7273_v14  ;;  %vm8001_vm14 = vmmov %vm7991_vm1  ;;  %p5274_p4 = pnand %p5273_p3, %p5267_p0 }
 0x272   :  { %v1595_v7 = vsel %vm1584_vm3, nan, %v1594_v12  ;;  %v1698_v18 = vsel %vm1691_vm13, %v1694_v61, %v1697_v23  ;;  %vm1900_vm8 = vcmp.eq.s32.totalorder %v1898_v16, 0  ;;  %vm1903_vm10 = vcmp.eq.s32.totalorder %v1898_v16, 2 }
 0x273   :  { %v1798_v20 = vsel %vm1796_vm11, %v7273_v14, %v7993_v37  ;;  %v1801_v11 = vsel %vm1799_vm2, %v7994_v54, %v7287_v10  ;;  %v2002_v51 = vand.u32 3, %v2001_v28  ;;  %v1491_v29 = vsel %vm1480_vm15, nan, %v1490_v55  ;;  %vm7998_vm15 = vmmov %vm7991_vm1 }
 0x274   :  { %v1802_v22 = vsel %vm1795_vm4, %v1798_v20, %v1801_v11  ;;  %v1902_v3 = vsel %vm1900_vm8, %v7315_v26, %v1901_v35  ;;  %v7995_v14 = vxor.u32 2147483648, %v7315_v26  ;;  %v2017_v10 = vpack.c.bf16 %v1595_v7, %v1491_v29 }
 0x275   :  { %v1803_v46 = vsel %vm1792_vm12, nan, %v1802_v22  ;;  %v1699_v38 = vsel %vm1688_vm9, nan, %v1698_v18  ;;  %vm2004_vm3 = vcmp.eq.s32.totalorder %v2002_v51, 0  ;;  %vm2007_vm12 = vcmp.eq.s32.totalorder %v2002_v51, 2 }
 0x276   :  { %v1905_v1 = vsel %vm1903_vm10, %v7995_v14, %v7326_v60  ;;  %v2018_v19 = vpack.c.bf16 %v1803_v46, %v1699_v38  ;;  %vm1899_vm5 = vcmp.lt.s32.totalorder %v1898_v16, 2  ;;  %v2006_v2 = vsel %vm2004_vm3, %v7175_v30, %v2005_v4  ;;  %4953 = vmatmul.mubr.msk.bf16.gmra.mrb[8].mxu0 %vm7998_vm15, %v2017_v10 }
 0x277   :  { %v7997_v50 = vxor.u32 2147483648, %v7175_v30  ;;  %v1906_v26 = vsel %vm1899_vm5, %v1902_v3, %v1905_v1  ;;  %vm2003_vm7 = vcmp.lt.s32.totalorder %v2002_v51, 2  ;;  %vm8000_vm9 = vweird.f32 %v6694_v36  ;;  %v5191_v30 = vld [vmem:[%s7638_s5 + $0x38] sm:$0xff]   ;;  %v4800_v36 = vld [vmem:[%s7639_s6] ss:$0 sm:$0xff] }
 0x278   :  { %4956 = vmatprep.mubr.msk.bf16.mxu0 %vm7999_vm6, %v2018_v19  ;;  %v1907_v47 = vsel %vm8000_vm9, nan, %v1906_v26 }
 0x279   :  { %v2009_v35 = vsel %vm2007_vm12, %v7997_v50, %v7183_v52  ;;  %v5190_v52 = vld [vmem:[%s7638_s5 + $0x30] sm:$0xff]   ;;  %v4226_v50 = vld [vmem:[%s7634_s1] sm:$0xff] }
 0x27a   :  { %v2010_v60 = vsel %vm2003_vm7, %v2006_v2, %v2009_v35  ;;  %4972 = vmatprep.subr.bf16.mxu1 %v5190_v52  ;;  %v4227_v35 = vld [vmem:[%s7634_s1 + $0x8] sm:$0xff] }
 0x27b   :  { %v2011_v56 = vsel %vm2000_vm0, nan, %v2010_v60  ;;  %4973 = vmatpush3.bf16.msra.mxu1 %v5190_v52  ;;  %vm4271_vm0 = vcmask 261120   ;;  %v4228_v52 = vld [vmem:[%s7634_s1 + $0x10] sm:$0xff] }
 0x27c   :  { %v2019_v62 = vpack.c.bf16 %v2011_v56, %v1907_v47  ;;  %4974 = vmatprep.subr.bf16.mxu1 %v5191_v30 }
 0x27e   :  { %4957 = vmatmul.mubr.msk.bf16.gmra.mrb[12].mxu0 %vm8001_vm14, %v2019_v62  ;;  %v4242_v62 = vpack.c.bf16 %v4227_v35, %v4226_v50 }
 0x27f   :  { %4975 = vmatpush3.bf16.msra.mxu1 %v5191_v30  ;;  %v4229_v30 = vld [vmem:[%s7634_s1 + $0x18] sm:$0xff] }
 0x280   :  { %4992 = vmatprep.subr.bf16.mxu1 %v5192_v5 }
 0x339   :  { %v4946_v4 = vpop.f32.mrb[0].mxu0 }
 0x33a   :  { %v3990_v25 = vadd.f32 %v4946_v4, %v4800_v36  ;;  %v3920_v9 = vpop.f32.mrb[1].mxu0  ;;  %v4243_v4 = vpack.c.bf16 %v4229_v30, %v4228_v52 }
 0x33b   :  { %v3988_v6 = vadd.f32 %v4800_v36, %v3920_v9  ;;  %v4947_v27 = vpop.f32.mrb[2].mxu0  ;;  %v4232_v9 = vld [vmem:[%s7634_s1 + $0x30] sm:$0xff] }
 0x33c   :  { %v3991_v41 = vadd.f32 %v4947_v27, %v4800_v36  ;;  %v3923_v58 = vpop.f32.mrb[3].mxu0  ;;  %v4006_v44 = vmax.f32 %v3990_v25, 0.0  ;;  %v4234_v27 = vld [vmem:[%s7634_s1 + $0x40] sm:$0xff] }
 0x33d   :  { %v3989_v48 = vadd.f32 %v4800_v36, %v3923_v58  ;;  %v4004_v31 = vmax.f32 %v3988_v6, 0.0  ;;  %v4233_v6 = vld [vmem:[%s7634_s1 + $0x38] sm:$0xff] }
 0x33e   :  { %v4007_v63 = vmax.f32 %v3991_v41, 0.0  ;;  %v4235_v41 = vld [vmem:[%s7634_s1 + $0x48] sm:$0xff]  ;;  %v4245_v58 = vpack.c.bf16 %v4233_v6, %v4232_v9 }
 0x33f   :  { %v4005_v0 = vmax.f32 %v3989_v48, 0.0  ;;  %v4246_v48 = vpack.c.bf16 %v4235_v41, %v4234_v27 }
 0x340   :  { %v4021_v17 = vpack.c.bf16 %v4007_v63, %v4006_v44  ;;  %v4236_v44 = vld [vmem:[%s7634_s1 + $0x50] sm:$0xff]  ;;  %v4237_v63 = vld [vmem:[%s7634_s1 + $0x58] sm:$0xff] }
 0x341   :  { %v4950_v32 = vpop.f32.mrb[4].mxu0  ;;  %v4020_v45 = vpack.c.bf16 %v4005_v0, %v4004_v31  ;;  %v4238_v31 = vld [vmem:[%s7634_s1 + $0x60] sm:$0xff]  ;;  %v4239_v0 = vld [vmem:[%s7634_s1 + $0x68] sm:$0xff] }
 0x342   :  { %v3994_v8 = vadd.f32 %v4950_v32, %v4800_v36  ;;  %v3936_v49 = vpop.f32.mrb[5].mxu0  ;;  %v4248_v32 = vpack.c.bf16 %v4239_v0, %v4238_v31  ;;  %v4810_v31 = vld [vmem:[%s7639_s6 + $0x2] ss:$0 sm:$0xff] }
 0x343   :  { %v3992_v33 = vadd.f32 %v4800_v36, %v3936_v49  ;;  %v4951_v53 = vpop.f32.mrb[6].mxu0  ;;  %4976 = vmatprep.mubr.bf16.mxu1 %v4020_v45  ;;  %v4240_v45 = vld [vmem:[%s7634_s1 + $0x70] sm:$0xff] }
 0x344   :  { %v3995_v15 = vadd.f32 %v4951_v53, %v4800_v36  ;;  %v3939_v43 = vpop.f32.mrb[7].mxu0  ;;  %4977 = vmatmul.mubr.bf16.vlgmr.msra.gmra.mrb[0].mxu1 %v4021_v17  ;;  %v4010_v16 = vmax.f32 %v3994_v8, 0.0  ;;  %v4247_v17 = vpack.c.bf16 %v4237_v63, %v4236_v44  ;;  %v4241_v8 = vld [vmem:[%s7634_s1 + $0x78] sm:$0xff]  ;;  %v5196_v53 = vld [vmem:[%s7638_s5 + $0x50] sm:$0xff]  }
 0x345   :  { %v3993_v40 = vadd.f32 %v4800_v36, %v3939_v43  ;;  %4993 = vmatpush3.bf16.msra.mxu1 %v5192_v5  ;;  %v4008_v39 = vmax.f32 %v3992_v33, 0.0  ;;  %v4230_v5 = vld [vmem:[%s7634_s1 + $0x20] sm:$0xff]  ;;  %v4249_v49 = vpack.c.bf16 %v4241_v8, %v4240_v45  ;;  %v5195_v33 = vld [vmem:[%s7638_s5 + $0x48] sm:$0xff]  }
 0x346   :  { %v4011_v21 = vmax.f32 %v3995_v15, 0.0  ;;  %4994 = vmatprep.subr.bf16.mxu1 %v5193_v59  ;;  %v5197_v15 = vld [vmem:[%s7638_s5 + $0x58] sm:$0xff]   ;;  %v5198_v43 = vld [vmem:[%s7638_s5 + $0x60] sm:$0xff]  }
 0x347   :  { %v4009_v13 = vmax.f32 %v3993_v40, 0.0  ;;  %v5199_v40 = vld [vmem:[%s7638_s5 + $0x68] sm:$0xff]  }
 0x348   :  { %v4023_v57 = vpack.c.bf16 %v4011_v21, %v4010_v16  ;;  %v5200_v16 = vld [vmem:[%s7638_s5 + $0x70] sm:$0xff]   ;;  %v5201_v21 = vld [vmem:[%s7638_s5 + $0x78] sm:$0xff]  }
 0x349   :  { %v4022_v12 = vpack.c.bf16 %v4009_v13, %v4008_v39  ;;  %v4954_v42 = vpop.f32.mrb[8].mxu0  ;;  %4995 = vmatpush3.bf16.msra.mxu1 %v5193_v59  ;;  %v5194_v59 = vld [vmem:[%s7638_s5 + $0x40] sm:$0xff]  }
 0x34a   :  { %v3998_v61 = vadd.f32 %v4954_v42, %v4800_v36  ;;  %v3952_v28 = vpop.f32.mrb[9].mxu0  ;;  %5012 = vmatprep.subr.bf16.mxu0 %v5194_v59  ;;  %5044 = vmatprep.subr.bf16.mxu1 %v5194_v59  ;;  %v4801_v39 = vld [vmem:[%s7639_s6 + $0x1] ss:$0 sm:$0xff] }
 0x34b   :  { %v3996_v55 = vadd.f32 %v4800_v36, %v3952_v28  ;;  %v4955_v24 = vpop.f32.mrb[10].mxu0  ;;  %4980 = vmatprep.mubr.bf16.mxu1 %v4022_v12  ;;  %5013 = vmatpush3.bf16.msra.mxu0 %v5194_v59 }
 0x34c   :  { %v3999_v23 = vadd.f32 %v4955_v24, %v4800_v36  ;;  %v3955_v37 = vpop.f32.mrb[11].mxu0  ;;  %4981 = vmatmul.mubr.bf16.gmra.mrb[4].mxu1 %v4023_v57  ;;  %v4014_v54 = vmax.f32 %v3998_v61, 0.0  ;;  %5014 = vmatprep.subr.bf16.mxu0 %v5195_v33 }
 0x34d   :  { %v3997_v20 = vadd.f32 %v4800_v36, %v3955_v37  ;;  %v4012_v7 = vmax.f32 %v3996_v55, 0.0 }
 0x34e   :  { %v4015_v11 = vmax.f32 %v3999_v23, 0.0 }
 0x34f   :  { %v4013_v18 = vmax.f32 %v3997_v20, 0.0  ;;  %5015 = vmatpush3.bf16.msra.mxu0 %v5195_v33 }
 0x350   :  { %v4025_v22 = vpack.c.bf16 %v4015_v11, %v4014_v54  ;;  %5016 = vmatprep.subr.bf16.mxu0 %v5196_v53 }
 0x351   :  { %v4024_v46 = vpack.c.bf16 %v4013_v18, %v4012_v7  ;;  %v4958_v51 = vpop.f32.mrb[12].mxu0 }
 0x352   :  { %v4002_v29 = vadd.f32 %v4958_v51, %v4800_v36  ;;  %v3968_v3 = vpop.f32.mrb[13].mxu0 }
 0x353   :  { %v4000_v14 = vadd.f32 %v4800_v36, %v3968_v3  ;;  %v4959_v1 = vpop.f32.mrb[14].mxu0  ;;  %4984 = vmatprep.mubr.bf16.mxu1 %v4024_v46  ;;  %5017 = vmatpush3.bf16.msra.mxu0 %v5196_v53 }
 0x354   :  { %v4003_v10 = vadd.f32 %v4959_v1, %v4800_v36  ;;  %v3971_v34 = vpop.f32.mrb[15].mxu0  ;;  %4985 = vmatmul.mubr.bf16.gmra.mrb[8].mxu1 %v4025_v22  ;;  %v4018_v19 = vmax.f32 %v4002_v29, 0.0  ;;  %5018 = vmatprep.subr.bf16.mxu0 %v5197_v15 }
 0x355   :  { %v4001_v38 = vadd.f32 %v4800_v36, %v3971_v34  ;;  %v4016_v26 = vmax.f32 %v4000_v14, 0.0  ;;  %v4231_v36 = vld [vmem:[%s7634_s1 + $0x28] sm:$0xff] }
 0x356   :  { %v4019_v2 = vmax.f32 %v4003_v10, 0.0  ;;  %v4244_v25 = vpack.c.bf16 %v4231_v36, %v4230_v5 }
 0x357   :  { %v4017_v60 = vmax.f32 %v4001_v38, 0.0  ;;  %5019 = vmatpush3.bf16.msra.mxu0 %v5197_v15 }
 0x358   :  { %v4027_v47 = vpack.c.bf16 %v4019_v2, %v4018_v19  ;;  %5020 = vmatprep.subr.bf16.mxu0 %v5198_v43 }
 0x359   :  { %v4026_v56 = vpack.c.bf16 %v4017_v60, %v4016_v26 }
 0x35b   :  { %4988 = vmatprep.mubr.bf16.mxu1 %v4026_v56  ;;  %5021 = vmatpush3.bf16.msra.mxu0 %v5198_v43 }
 0x35c   :  { %4989 = vmatmul.mubr.bf16.gmra.mrb[12].mxu1 %v4027_v47  ;;  %5022 = vmatprep.subr.bf16.mxu0 %v5199_v40 }
 0x35d   :  { %4996 = vmatprep.mubr.msk.bf16.mxu1 %vm4271_vm0, %v4242_v62 }
 0x35f   :  { %5023 = vmatpush3.bf16.msra.mxu0 %v5199_v40 }
 0x360   :  { %5024 = vmatprep.subr.bf16.mxu0 %v5200_v16 }
 0x363   :  { %5025 = vmatpush3.bf16.msra.mxu0 %v5200_v16 }
 0x364   :  { %4997 = vmatmul.mubr.msk.bf16.vlgmr.msra.gmra.mrb[16].mxu1 %vm4271_vm0, %v4243_v4  ;;  %5026 = vmatprep.subr.bf16.mxu0 %v5201_v21 }
 0x365   :  { %5000 = vmatprep.mubr.msk.bf16.mxu1 %vm4271_vm0, %v4244_v25  ;;  %5052 = vmatpush3.bf16.msra.mxu1 %v5194_v59 }
 0x366   :  { %5045 = vmatprep.subr.bf16.mxu1 %v5195_v33 }
 0x367   :  { %5027 = vmatpush3.bf16.msra.mxu0 %v5201_v21 }
 0x369   :  { %5053 = vmatpush3.bf16.msra.mxu1 %v5195_v33 }
 0x36a   :  { %5046 = vmatprep.subr.bf16.mxu1 %v5196_v53 }
 0x36c   :  { %5001 = vmatmul.mubr.msk.bf16.gmra.mrb[20].mxu1 %vm4271_vm0, %v4245_v58 }
 0x36d   :  { %5004 = vmatprep.mubr.msk.bf16.mxu1 %vm4271_vm0, %v4246_v48  ;;  %5054 = vmatpush3.bf16.msra.mxu1 %v5196_v53 }
 0x36e   :  { %5047 = vmatprep.subr.bf16.mxu1 %v5197_v15 }
 0x371   :  { %5055 = vmatpush3.bf16.msra.mxu1 %v5197_v15 }
 0x372   :  { %5048 = vmatprep.subr.bf16.mxu1 %v5198_v43 }
 0x374   :  { %5005 = vmatmul.mubr.msk.bf16.gmra.mrb[24].mxu1 %vm4271_vm0, %v4247_v17 }
 0x375   :  { %5008 = vmatprep.mubr.msk.bf16.mxu1 %vm4271_vm0, %v4248_v32  ;;  %5056 = vmatpush3.bf16.msra.mxu1 %v5198_v43 }
 0x376   :  { %5049 = vmatprep.subr.bf16.mxu1 %v5199_v40 }
 0x379   :  { %5057 = vmatpush3.bf16.msra.mxu1 %v5199_v40 }
 0x37a   :  { %5050 = vmatprep.subr.bf16.mxu1 %v5200_v16 }
 0x37c   :  { %5009 = vmatmul.mubr.msk.bf16.gmra.mrb[28].mxu1 %vm4271_vm0, %v4249_v49 }
 0x37d   :  { %5058 = vmatpush3.bf16.msra.mxu1 %v5200_v16 }
 0x37e   :  { %5051 = vmatprep.subr.bf16.mxu1 %v5201_v21 }
 0x381   :  { %5059 = vmatpush3.bf16.msra.mxu1 %v5201_v21 }
 0x417   :  { %v4978_v13 = vpop.f32.mrb[0].mxu1 }
 0x418   :  { %v4140_v57 = vadd.f32 %v4978_v13, %v4801_v39  ;;  %v4131_v12 = vpop.f32.mrb[1].mxu1 }
 0x419   :  { %v4132_v42 = vadd.f32 %v4801_v39, %v4131_v12  ;;  %v4979_v61 = vpop.f32.mrb[2].mxu1 }
 0x41a   :  { %v4196_v28 = vmax.f32 %v4140_v57, 0.0  ;;  %v4143_v55 = vadd.f32 %v4979_v61, %v4801_v39  ;;  %v4134_v24 = vpop.f32.mrb[3].mxu1 }
 0x41b   :  { %v4194_v23 = vmax.f32 %v4132_v42, 0.0  ;;  %v4135_v37 = vadd.f32 %v4801_v39, %v4134_v24 }
 0x41c   :  { %4212 = vst [vmem:[#allocation4 + $0x10] sm:$0xff] %v4196_v28  ;;  %v4197_v20 = vmax.f32 %v4143_v55, 0.0 }
 0x41d   :  { %4210 = vst [vmem:[#allocation4] sm:$0xff] %v4194_v23  ;;  %v4195_v54 = vmax.f32 %v4135_v37, 0.0 }
 0x41e   :  { %4213 = vst [vmem:[#allocation4 + $0x18] sm:$0xff] %v4197_v20 }
 0x41f   :  { %4211 = vst [vmem:[#allocation4 + $0x8] sm:$0xff] %v4195_v54  ;;  %v4982_v11 = vpop.f32.mrb[4].mxu1 }
 0x420   :  { %v4156_v7 = vadd.f32 %v4982_v11, %v4801_v39  ;;  %v4147_v18 = vpop.f32.mrb[5].mxu1 }
 0x421   :  { %v4148_v22 = vadd.f32 %v4801_v39, %v4147_v18  ;;  %v4983_v46 = vpop.f32.mrb[6].mxu1 }
 0x422   :  { %v4200_v51 = vmax.f32 %v4156_v7, 0.0  ;;  %v4159_v29 = vadd.f32 %v4983_v46, %v4801_v39  ;;  %v4150_v3 = vpop.f32.mrb[7].mxu1 }
 0x423   :  { %v4198_v14 = vmax.f32 %v4148_v22, 0.0  ;;  %v4151_v1 = vadd.f32 %v4801_v39, %v4150_v3 }
 0x424   :  { %4216 = vst [vmem:[#allocation4 + $0x30] sm:$0xff] %v4200_v51  ;;  %v4201_v10 = vmax.f32 %v4159_v29, 0.0 }
 0x425   :  { %4214 = vst [vmem:[#allocation4 + $0x20] sm:$0xff] %v4198_v14  ;;  %v4199_v34 = vmax.f32 %v4151_v1, 0.0 }
 0x426   :  { %4217 = vst [vmem:[#allocation4 + $0x38] sm:$0xff] %v4201_v10 }
 0x427   :  { %4215 = vst [vmem:[#allocation4 + $0x28] sm:$0xff] %v4199_v34  ;;  %v4986_v38 = vpop.f32.mrb[8].mxu1 }
 0x428   :  { %v4172_v19 = vadd.f32 %v4986_v38, %v4801_v39  ;;  %v4163_v2 = vpop.f32.mrb[9].mxu1 }
 0x429   :  { %v4164_v50 = vadd.f32 %v4801_v39, %v4163_v2  ;;  %v4987_v35 = vpop.f32.mrb[10].mxu1 }
 0x42a   :  { %v4204_v26 = vmax.f32 %v4172_v19, 0.0  ;;  %v4175_v60 = vadd.f32 %v4987_v35, %v4801_v39  ;;  %v4166_v47 = vpop.f32.mrb[11].mxu1 }
 0x42b   :  { %v4202_v56 = vmax.f32 %v4164_v50, 0.0  ;;  %v4167_v62 = vadd.f32 %v4801_v39, %v4166_v47 }
 0x42c   :  { %4220 = vst [vmem:[#allocation4 + $0x50] sm:$0xff] %v4204_v26  ;;  %v4205_v52 = vmax.f32 %v4175_v60, 0.0 }
 0x42d   :  { %4218 = vst [vmem:[#allocation4 + $0x40] sm:$0xff] %v4202_v56  ;;  %v4203_v30 = vmax.f32 %v4167_v62, 0.0 }
 0x42e   :  { %4221 = vst [vmem:[#allocation4 + $0x58] sm:$0xff] %v4205_v52 }
 0x42f   :  { %4219 = vst [vmem:[#allocation4 + $0x48] sm:$0xff] %v4203_v30  ;;  %v4990_v5 = vpop.f32.mrb[12].mxu1 }
 0x430   :  { %v4188_v36 = vadd.f32 %v4990_v5, %v4801_v39  ;;  %v4179_v4 = vpop.f32.mrb[13].mxu1 }
 0x431   :  { %v4180_v25 = vadd.f32 %v4801_v39, %v4179_v4  ;;  %v4991_v9 = vpop.f32.mrb[14].mxu1 }
 0x432   :  { %v4208_v6 = vmax.f32 %v4188_v36, 0.0  ;;  %v4191_v27 = vadd.f32 %v4991_v9, %v4801_v39  ;;  %v4182_v41 = vpop.f32.mrb[15].mxu1 }
 0x433   :  { %v4206_v58 = vmax.f32 %v4180_v25, 0.0  ;;  %v4183_v48 = vadd.f32 %v4801_v39, %v4182_v41 }
 0x434   :  { %4224 = vst [vmem:[#allocation4 + $0x70] sm:$0xff] %v4208_v6  ;;  %v4209_v44 = vmax.f32 %v4191_v27, 0.0 }
 0x435   :  { %4222 = vst [vmem:[#allocation4 + $0x60] sm:$0xff] %v4206_v58  ;;  %v4207_v63 = vmax.f32 %v4183_v48, 0.0 }
 0x436   :  { %4225 = vst [vmem:[#allocation4 + $0x78] sm:$0xff] %v4209_v44 }
 0x437   :  { %4223 = vst [vmem:[#allocation4 + $0x68] sm:$0xff] %v4207_v63  ;;  %v4998_v0 = vpop.f32.mrb[16].mxu1 }
 0x438   :  { %v4339_v17 = vadd.f32 %v4998_v0, %v4810_v31  ;;  %v4330_v32 = vpop.f32.mrb[17].mxu1 }
 0x439   :  { %v4331_v45 = vadd.f32 %v4810_v31, %v4330_v32  ;;  %v4999_v8 = vpop.f32.mrb[18].mxu1 }
 0x43a   :  { %v4342_v49 = vadd.f32 %v4999_v8, %v4810_v31  ;;  %v4333_v59 = vpop.f32.mrb[19].mxu1  ;;  %v4395_v53 = vmax.f32 %v4339_v17, 0.0 }
 0x43b   :  { %v4334_v33 = vadd.f32 %v4810_v31, %v4333_v59  ;;  %v4393_v43 = vmax.f32 %v4331_v45, 0.0 }
 0x43c   :  { %v4396_v15 = vmax.f32 %v4342_v49, 0.0 }
 0x43d   :  { %v4394_v40 = vmax.f32 %v4334_v33, 0.0 }
 0x43e   :  { %v4410_v16 = vpack.c.bf16 %v4396_v15, %v4395_v53 }
 0x43f   :  { %v4409_v21 = vpack.c.bf16 %v4394_v40, %v4393_v43  ;;  %v5002_v39 = vpop.f32.mrb[20].mxu1 }
 0x440   :  { %v4355_v13 = vadd.f32 %v5002_v39, %v4810_v31  ;;  %v4346_v57 = vpop.f32.mrb[21].mxu1 }
 0x441   :  { %v4347_v12 = vadd.f32 %v4810_v31, %v4346_v57  ;;  %v5003_v42 = vpop.f32.mrb[22].mxu1  ;;  %5028 = vmatprep.mubr.bf16.mxu0 %v4409_v21 }
 0x442   :  { %v4358_v61 = vadd.f32 %v5003_v42, %v4810_v31  ;;  %v4349_v28 = vpop.f32.mrb[23].mxu1  ;;  %5029 = vmatmul.mubr.bf16.vlgmr.msra.gmra.mrb[16].mxu0 %v4410_v16  ;;  %v4399_v24 = vmax.f32 %v4355_v13, 0.0 }
 0x443   :  { %v4350_v55 = vadd.f32 %v4810_v31, %v4349_v28  ;;  %v4397_v37 = vmax.f32 %v4347_v12, 0.0 }
 0x444   :  { %v4400_v23 = vmax.f32 %v4358_v61, 0.0 }
 0x445   :  { %v4398_v20 = vmax.f32 %v4350_v55, 0.0 }
 0x446   :  { %v4412_v54 = vpack.c.bf16 %v4400_v23, %v4399_v24 }
 0x447   :  { %v4411_v11 = vpack.c.bf16 %v4398_v20, %v4397_v37  ;;  %v5006_v7 = vpop.f32.mrb[24].mxu1 }
 0x448   :  { %v4371_v18 = vadd.f32 %v5006_v7, %v4810_v31  ;;  %v4362_v22 = vpop.f32.mrb[25].mxu1 }
 0x449   :  { %v4363_v46 = vadd.f32 %v4810_v31, %v4362_v22  ;;  %v5007_v51 = vpop.f32.mrb[26].mxu1  ;;  %5032 = vmatprep.mubr.bf16.mxu0 %v4411_v11 }
 0x44a   :  { %v4374_v29 = vadd.f32 %v5007_v51, %v4810_v31  ;;  %v4365_v3 = vpop.f32.mrb[27].mxu1  ;;  %5033 = vmatmul.mubr.bf16.gmra.mrb[20].mxu0 %v4412_v54  ;;  %v4403_v1 = vmax.f32 %v4371_v18, 0.0 }
 0x44b   :  { %v4366_v14 = vadd.f32 %v4810_v31, %v4365_v3  ;;  %v4401_v34 = vmax.f32 %v4363_v46, 0.0 }
 0x44c   :  { %v4404_v10 = vmax.f32 %v4374_v29, 0.0 }
 0x44d   :  { %v4402_v38 = vmax.f32 %v4366_v14, 0.0 }
 0x44e   :  { %v4414_v19 = vpack.c.bf16 %v4404_v10, %v4403_v1 }
 0x44f   :  { %v4413_v2 = vpack.c.bf16 %v4402_v38, %v4401_v34  ;;  %v5010_v50 = vpop.f32.mrb[28].mxu1 }
 0x450   :  { %v4387_v35 = vadd.f32 %v5010_v50, %v4810_v31  ;;  %v4378_v26 = vpop.f32.mrb[29].mxu1 }
 0x451   :  { %v4379_v60 = vadd.f32 %v4810_v31, %v4378_v26  ;;  %v5011_v47 = vpop.f32.mrb[30].mxu1  ;;  %5036 = vmatprep.mubr.bf16.mxu0 %v4413_v2 }
 0x452   :  { %v4390_v56 = vadd.f32 %v5011_v47, %v4810_v31  ;;  %v4381_v62 = vpop.f32.mrb[31].mxu1  ;;  %5037 = vmatmul.mubr.bf16.gmra.mrb[24].mxu0 %v4414_v19  ;;  %v4407_v30 = vmax.f32 %v4387_v35, 0.0 }
 0x453   :  { %v4382_v52 = vadd.f32 %v4810_v31, %v4381_v62  ;;  %v4405_v36 = vmax.f32 %v4379_v60, 0.0 }
 0x454   :  { %v4408_v5 = vmax.f32 %v4390_v56, 0.0 }
 0x455   :  { %v4406_v4 = vmax.f32 %v4382_v52, 0.0 }
 0x456   :  { %v4416_v25 = vpack.c.bf16 %v4408_v5, %v4407_v30 }
 0x457   :  { %v4415_v9 = vpack.c.bf16 %v4406_v4, %v4405_v36 }
 0x459   :  { %5040 = vmatprep.mubr.bf16.mxu1 %v4415_v9 }
 0x45a   :  { %5041 = vmatmul.mubr.bf16.vlgmr.msra.gmra.mrb[32].mxu1 %v4416_v25 }
 0x45b   :  { %5277 = shalt.err (!%p5274_p4)
}
 0x45c   :  { %s5278_s30 = scalar_lea.hbm %s7641_s8, 2048 }
 0x45d   :  { %p5279_p5 = scmp.ne.s32.totalorder %s7641_s8, %s5278_s30  ;;  %p5282_p6 = scmp.lt.u32.totalorder %s5278_s30, %s7641_s8 }
 0x45f   :  { %p5284_p7 = pnand %p5282_p6, %p5279_p5 }
 0x461   :  { %5287 = shalt.err (!%p5284_p7)
}
 0x462   :  { %s5324_s13 = smov 128   ;;  %s5325_s14 = smov 8   ;;  %v4837_v6 = vld [vmem:[%s7639_s6 + $0x3] ss:$0 sm:$0xff] }
 0x463   :  { %4639 = dma.vmem_to_hbm [thread:$0]  %s4634_s27, 2048, %s7641_s8, [#allocation5], %s5324_s13, %s5324_s13, %s5325_s14  }
 0x464   :  { %s5326_s6 = smov [#allocation2]  }
 0x465   :  { %s4621_s8 = sshll.u32 %s5326_s6, 4  ;;  %s4622_s8 = int_to_ptr.vmem [resolvable:$true] %s4621_s8 }
 0x466   :  { %s5288_s16 = scalar_lea.vmem %s4622_s8, 2048  ;;  %p5293_p9 = scmp.lt.s32.totalorder %s4622_s8, %s4622_s8 }
 0x467   :  { %p5289_p8 = scmp.ne.s32.totalorder %s4622_s8, %s5288_s16  ;;  %p5294_p10 = scmp.lt.s32.totalorder %s5288_s16, %s5288_s16 }
 0x469   :  { %p5295_p11 = por %p5294_p10, %p5293_p9 }
 0x46b   :  { %p5296_p12 = pnand %p5295_p11, %p5289_p8 }
 0x515   :  { %v5030_v27 = vpop.f32.mrb[16].mxu0 }
 0x516   :  { %v4530_v41 = vadd.f32 %v5030_v27, %v4837_v6  ;;  %v4521_v58 = vpop.f32.mrb[17].mxu0 }
 0x517   :  { %v4522_v48 = vadd.f32 %v4837_v6, %v4521_v58  ;;  %v5031_v44 = vpop.f32.mrb[18].mxu0 }
 0x518   :  { %v4586_v63 = vmax.f32 %v4530_v41, 0.0  ;;  %v4533_v31 = vadd.f32 %v5031_v44, %v4837_v6  ;;  %v4524_v0 = vpop.f32.mrb[19].mxu0 }
 0x519   :  { %v4584_v17 = vmax.f32 %v4522_v48, 0.0  ;;  %v4525_v32 = vadd.f32 %v4837_v6, %v4524_v0 }
 0x51a   :  { %4602 = vst [vmem:[#allocation2 + $0x10] sm:$0xff] %v4586_v63  ;;  %v4587_v45 = vmax.f32 %v4533_v31, 0.0 }
 0x51b   :  { %4600 = vst [vmem:[#allocation2] sm:$0xff] %v4584_v17  ;;  %v4585_v8 = vmax.f32 %v4525_v32, 0.0 }
 0x51c   :  { %4603 = vst [vmem:[#allocation2 + $0x18] sm:$0xff] %v4587_v45 }
 0x51d   :  { %4601 = vst [vmem:[#allocation2 + $0x8] sm:$0xff] %v4585_v8  ;;  %v5034_v49 = vpop.f32.mrb[20].mxu0 }
 0x51e   :  { %v4546_v59 = vadd.f32 %v5034_v49, %v4837_v6  ;;  %v4537_v33 = vpop.f32.mrb[21].mxu0 }
 0x51f   :  { %v4538_v53 = vadd.f32 %v4837_v6, %v4537_v33  ;;  %v5035_v15 = vpop.f32.mrb[22].mxu0 }
 0x520   :  { %v4590_v43 = vmax.f32 %v4546_v59, 0.0  ;;  %v4549_v40 = vadd.f32 %v5035_v15, %v4837_v6  ;;  %v4540_v16 = vpop.f32.mrb[23].mxu0 }
 0x521   :  { %v4588_v21 = vmax.f32 %v4538_v53, 0.0  ;;  %v4541_v39 = vadd.f32 %v4837_v6, %v4540_v16 }
 0x522   :  { %4606 = vst [vmem:[#allocation2 + $0x30] sm:$0xff] %v4590_v43  ;;  %v4591_v13 = vmax.f32 %v4549_v40, 0.0 }
 0x523   :  { %4604 = vst [vmem:[#allocation2 + $0x20] sm:$0xff] %v4588_v21  ;;  %v4589_v57 = vmax.f32 %v4541_v39, 0.0 }
 0x524   :  { %4607 = vst [vmem:[#allocation2 + $0x38] sm:$0xff] %v4591_v13 }
 0x525   :  { %4605 = vst [vmem:[#allocation2 + $0x28] sm:$0xff] %v4589_v57  ;;  %v5038_v12 = vpop.f32.mrb[24].mxu0 }
 0x526   :  { %v4562_v42 = vadd.f32 %v5038_v12, %v4837_v6  ;;  %v4553_v61 = vpop.f32.mrb[25].mxu0 }
 0x527   :  { %v4554_v28 = vadd.f32 %v4837_v6, %v4553_v61  ;;  %v5039_v55 = vpop.f32.mrb[26].mxu0 }
 0x528   :  { %v4594_v24 = vmax.f32 %v4562_v42, 0.0  ;;  %v4565_v23 = vadd.f32 %v5039_v55, %v4837_v6  ;;  %v4556_v37 = vpop.f32.mrb[27].mxu0 }
 0x529   :  { %v4592_v20 = vmax.f32 %v4554_v28, 0.0  ;;  %v4557_v54 = vadd.f32 %v4837_v6, %v4556_v37 }
 0x52a   :  { %4610 = vst [vmem:[#allocation2 + $0x50] sm:$0xff] %v4594_v24  ;;  %v4595_v11 = vmax.f32 %v4565_v23, 0.0 }
 0x52b   :  { %4608 = vst [vmem:[#allocation2 + $0x40] sm:$0xff] %v4592_v20  ;;  %v4593_v7 = vmax.f32 %v4557_v54, 0.0 }
 0x52c   :  { %4611 = vst [vmem:[#allocation2 + $0x58] sm:$0xff] %v4595_v11 }
 0x52d   :  { %4609 = vst [vmem:[#allocation2 + $0x48] sm:$0xff] %v4593_v7  ;;  %v5042_v18 = vpop.f32.mrb[32].mxu1 }
 0x52e   :  { %v4578_v22 = vadd.f32 %v5042_v18, %v4837_v6  ;;  %v4569_v46 = vpop.f32.mrb[33].mxu1 }
 0x52f   :  { %v4570_v51 = vadd.f32 %v4837_v6, %v4569_v46  ;;  %v5043_v29 = vpop.f32.mrb[34].mxu1 }
 0x530   :  { %v4598_v3 = vmax.f32 %v4578_v22, 0.0  ;;  %v4581_v14 = vadd.f32 %v5043_v29, %v4837_v6  ;;  %v4572_v1 = vpop.f32.mrb[35].mxu1 }
 0x531   :  { %v4596_v10 = vmax.f32 %v4570_v51, 0.0  ;;  %v4573_v34 = vadd.f32 %v4837_v6, %v4572_v1 }
 0x532   :  { %4614 = vst [vmem:[#allocation2 + $0x70] sm:$0xff] %v4598_v3  ;;  %v4599_v38 = vmax.f32 %v4581_v14, 0.0 }
 0x533   :  { %4612 = vst [vmem:[#allocation2 + $0x60] sm:$0xff] %v4596_v10  ;;  %v4597_v19 = vmax.f32 %v4573_v34, 0.0 }
 0x534   :  { %4615 = vst [vmem:[#allocation2 + $0x78] sm:$0xff] %v4599_v38 }
 0x535   :  { %4613 = vst [vmem:[#allocation2 + $0x68] sm:$0xff] %v4597_v19 }
 0x536   :  { %5299 = shalt.err (!%p5296_p12)
}
 0x537   :  { %s5300_s3 = scalar_lea.hbm %s7640_s7, 2048 }
 0x538   :  { %p5301_p13 = scmp.ne.s32.totalorder %s7640_s7, %s5300_s3  ;;  %p5304_p0 = scmp.lt.u32.totalorder %s5300_s3, %s7640_s7 }
 0x53a   :  { %p5306_p1 = pnand %p5304_p0, %p5301_p13 }
 0x53c   :  { %5309 = shalt.err (!%p5306_p1)
}
 0x53d   :  { %4627 = dma.vmem_to_hbm [thread:$0]  %s4622_s8, 2048, %s7640_s7, [#allocation3], %s5324_s13, %s5324_s13, %s5325_s14  }
 0x53e   :  { %5310 = dma.done.wait [#allocation3], 2048  }
 0x53f   :  { %5311 = vsyncadd [#allocation3], 4294965248 }
 0x540   :  { %5312 = dma.done.wait [#allocation5], 2048  }
 0x541   :  { %5313 = vsyncadd [#allocation5], 4294965248 }
 0x542   :  { %4646 = vsyncpa [#allocation3], 1 }
 0x543   :  { %4647 = vsyncpa [#allocation5], 1 }

</bundles_post_ra>
